<compile_context>
chip_gen: v7x
topology: tpu7x:2x2x1
jax: 0.10.0
libtpu: 0.0.40
codegen_flags: <defaults>
</compile_context>

<pallas_src>
import jax
import jax.numpy as jnp
from jax.experimental import pallas as pl
from jax.experimental.pallas import tpu as pltpu


# ---------------------------------------------------------------------------
# Fused encoder + decoder kernel (single grid step, in-kernel time loops)
# ---------------------------------------------------------------------------
def _nmt_fused_kernel(
    # encoder inputs
    enc_g_ref,     # (S, B, 3H): precomputed x@W_ih + b_ih (+ b_hh for r/z folded)
    enc_whh_ref,   # (H, 3H)   : hidden weights, single fused matmul per step
    enc_bhn_ref,   # (1, H)    : hidden bias of the n gate
    upd_ref,       # (S, B, 1) : 1.0 while t < lengths[b] else 0.0
    # decoder inputs
    dec_g_ref,     # (T, B, 3H)
    dec_whh_ref,   # (H, 3H)
    dec_bhn_ref,   # (1, H)
    amask_ref,     # (B, S)    : additive attention mask (0 / -1e9)
    wc_ref,        # (H, H)    : linear_out split over [ctx ; h]   (no bias)
    who_ref,       # (H, H)
    # outputs (b-major rows; wrapper restores (T,B,*) layout)
    dec_out_ref,   # (B*T, H)
    attn_out_ref,  # (B*T, S)
    # scratch
    mem_scr,       # (S, B, H) : memory bank, never leaves VMEM
    h_scr,         # (T, B, H) : decoder hidden states for the hoisted attention
):
    S = enc_g_ref.shape[0]
    B = enc_g_ref.shape[1]
    T = dec_g_ref.shape[0]
    H = enc_whh_ref.shape[0]

    def gru_step(gi, whh, bhn, h):
        # Only h @ W_hh stays in the recurrence; x @ W_ih (and the r/z hidden
        # biases) were hoisted into one bulk matmul in the wrapper.  The three
        # gate dots are fused into a single (B,H)@(H,3H) matmul (perf feedback):
        # at production H (multiple of 128) the 3H slices below are lane-aligned.
        gh = jnp.dot(h, whh, preferred_element_type=jnp.float32)        # (B, 3H)
        rz = jax.nn.sigmoid(gi[:, :2 * H] + gh[:, :2 * H])
        r = rz[:, :H]
        z = rz[:, H:]
        n = jnp.tanh(gi[:, 2 * H:] + r * (gh[:, 2 * H:] + bhn))
        return (1.0 - z) * n + z * h

    # ---------------- encoder: GRU over source time ----------------
    e_whh = enc_whh_ref[...]
    e_bhn = enc_bhn_ref[...]

    def enc_body(t, h):
        h_new = gru_step(enc_g_ref[t], e_whh, e_bhn, h)
        m = upd_ref[t]                       # (B, 1)
        mem_scr[t] = m * h_new               # padded steps -> zeros (pack_padded parity)
        return m * h_new + (1.0 - m) * h     # carry hidden of each row's last valid step

    h0 = jnp.zeros((B, H), dtype=jnp.float32)
    enc_state = jax.lax.fori_loop(0, S, enc_body, h0, unroll=True)

    # ---------------- decoder: GRU recurrence only (attention hoisted) ----------
    d_whh = dec_whh_ref[...]
    d_bhn = dec_bhn_ref[...]

    def dec_body(t, h):
        h_new = gru_step(dec_g_ref[t], d_whh, d_bhn, h)
        h_scr[t] = h_new
        return h_new

    jax.lax.fori_loop(0, T, dec_body, enc_state, unroll=True)

    # ---------------- hoisted Luong attention + linear_out ----------------
    # At these toy sizes the full memory bank / hidden block fit in a few vregs;
    # at production sizes read tiles from the scratch refs instead of one load.
    mem = mem_scr[...]                       # (S, B, H)
    h_all = h_scr[...]                       # (T, B, H)
    amask = amask_ref[...]                   # (B, S) additive mask

    # scores[b,t,s] = <h_all[t,b], mem[s,b]>  (length-masked softmax over s)
    scores = jnp.einsum('tbh,sbh->bts', h_all, mem,
                        preferred_element_type=jnp.float32)
    scores = scores + amask[:, None, :]
    scores = scores - jnp.max(scores, axis=-1, keepdims=True)
    e = jnp.exp(scores)
    attn = e / jnp.sum(e, axis=-1, keepdims=True)        # exact softmax (off hot path)

    # context[b,t,h] = sum_s attn[b,t,s] * mem[s,b,h]
    ctx = jnp.einsum('bts,sbh->bth', attn, mem,
                     preferred_element_type=jnp.float32)

    # linear_out (no bias): tanh(W [ctx; h]) == tanh(ctx @ Wc + h @ Who)
    # h contribution is produced directly in b-major order via a batched matmul
    # so no value transpose is needed before the elementwise add.
    who_b = jnp.broadcast_to(who_ref[...], (B, H, H))
    h_who = jnp.einsum('tbh,bhk->btk', h_all, who_b,
                       preferred_element_type=jnp.float32)             # (B, T, H)

    attn_h = jnp.tanh(
        jnp.dot(ctx.reshape(B * T, H), wc_ref[...],
                preferred_element_type=jnp.float32)
        + h_who.reshape(B * T, H))

    # single bulk stores (wrapper restores (T,B,*) layout); at production sizes
    # pad H/S to multiples of 128 so these become unmasked lane-dense stores.
    dec_out_ref[...] = attn_h
    attn_out_ref[...] = attn.reshape(B * T, S)


def _run_fused(enc_g, enc_whh, enc_bhn, upd,
               dec_g, dec_whh, dec_bhn, amask, wc, who):
    S, B, G = enc_g.shape
    H = G // 3
    T = dec_g.shape[0]

    def full_spec(shape):
        nd = len(shape)
        return pl.BlockSpec(shape, lambda i, nd=nd: (0,) * nd)

    args = (enc_g, enc_whh, enc_bhn, upd,
            dec_g, dec_whh, dec_bhn, amask, wc, who)

    dec_flat, attn_flat = pl.pallas_call(
        _nmt_fused_kernel,
        out_shape=(jax.ShapeDtypeStruct((B * T, H), jnp.float32),
                   jax.ShapeDtypeStruct((B * T, S), jnp.float32)),
        grid_spec=pltpu.PrefetchScalarGridSpec(
            num_scalar_prefetch=0,
            grid=(1,),
            in_specs=[full_spec(a.shape) for a in args],
            out_specs=[full_spec((B * T, H)), full_spec((B * T, S))],
            scratch_shapes=[pltpu.VMEM((S, B, H), jnp.float32),
                            pltpu.VMEM((T, B, H), jnp.float32)],
        ),
        compiler_params=pltpu.CompilerParams(
            dimension_semantics=("arbitrary",)),
    )(*args)
    return dec_flat, attn_flat


# ---------------------------------------------------------------------------
# Wrapper glue: embeddings, bulk (time-batched) input projections, masks
# ---------------------------------------------------------------------------
def _precompute_gates(emb, wih, bih, bhh, H):
    """Bulk input projection for all timesteps: one MXU-friendly matmul.

    Returns a packed (L, B, 3H) gate tensor.  The r/z hidden biases are folded
    in; the n-gate hidden bias must stay inside r * (h @ W_hn + b_hn)."""
    gi = jnp.einsum('lbe,eg->lbg', emb, wih,
                    preferred_element_type=jnp.float32) + bih
    rz_bias = jnp.concatenate([bhh[:2 * H], jnp.zeros((H,), bhh.dtype)])
    return gi + rz_bias


def nmt_forward(params, src, tgt, lengths):
    # tgt = tgt[:-1]  (exclude the final token for the decoder input)
    tgt_in = tgt[:-1]

    # embeddings (integer gathers: XLA glue, not a kernel hot path)
    src_emb = jnp.take(params['emb_src'], src, axis=0)       # (S, B, E)
    tgt_emb = jnp.take(params['emb_tgt'], tgt_in, axis=0)    # (T, B, E)

    S, B = src.shape
    T = tgt_in.shape[0]
    H = params['enc_whh'].shape[0]

    # hoisted time-batched input projections, packed per stage as (L, B, 3H)
    enc_g = _precompute_gates(src_emb, params['enc_wih'],
                              params['enc_bih'], params['enc_bhh'], H)
    dec_g = _precompute_gates(tgt_emb, params['dec_wih'],
                              params['dec_bih'], params['dec_bhh'], H)

    enc_bhn = params['enc_bhh'][2 * H:].reshape(1, H)
    dec_bhn = params['dec_bhh'][2 * H:].reshape(1, H)

    # length masks (precomputed: kernel only multiplies / adds)
    t_idx = jnp.arange(S)
    upd = (t_idx[:, None] < lengths[None, :]).astype(jnp.float32)[:, :, None]            # (S,B,1)
    amask = jnp.where(t_idx[None, :] < lengths[:, None], 0.0, -1e9).astype(jnp.float32)  # (B,S)

    dec_flat, attn_flat = _run_fused(
        enc_g, params['enc_whh'], enc_bhn, upd,
        dec_g, params['dec_whh'], dec_bhn,
        amask, params['dec_wc'], params['dec_wh'])

    # kernel outputs are b-major rows; restore the module's (T, B, *) layout
    dec_out = dec_flat.reshape(B, T, H).transpose(1, 0, 2)
    attn_std = attn_flat.reshape(B, T, S).transpose(1, 0, 2)
    return dec_out, {"std": attn_std}


# ---------------------------------------------------------------------------
# Pure-JAX reference (OpenNMT semantics) for correctness checking
# ---------------------------------------------------------------------------
def nmt_reference(params, src, tgt, lengths):
    tgt_in = tgt[:-1]
    src_emb = jnp.take(params['emb_src'], src, axis=0)
    tgt_emb = jnp.take(params['emb_tgt'], tgt_in, axis=0)
    S, B = src.shape
    H = params['enc_whh'].shape[0]

    def gru(emb, h0, wih, whh, bih, bhh, upd):
        def step(h, xs):
            x, m = xs
            gi = x @ wih + bih
            gh = h @ whh + bhh
            r = jax.nn.sigmoid(gi[:, :H] + gh[:, :H])
            z = jax.nn.sigmoid(gi[:, H:2 * H] + gh[:, H:2 * H])
            n = jnp.tanh(gi[:, 2 * H:] + r * gh[:, 2 * H:])
            h_new = (1.0 - z) * n + z * h
            return m * h_new + (1.0 - m) * h, m * h_new
        return jax.lax.scan(step, h0, (emb, upd))

    upd_src = (jnp.arange(S)[:, None] < lengths[None, :]).astype(jnp.float32)[:, :, None]
    h0 = jnp.zeros((B, H), jnp.float32)
    enc_state, mem = gru(src_emb, h0, params['enc_wih'], params['enc_whh'],
                         params['enc_bih'], params['enc_bhh'], upd_src)

    T = tgt_in.shape[0]
    upd_tgt = jnp.ones((T, B, 1), jnp.float32)
    _, hdec = gru(tgt_emb, enc_state, params['dec_wih'], params['dec_whh'],
                  params['dec_bih'], params['dec_bhh'], upd_tgt)

    valid = jnp.arange(S)[None, :] < lengths[:, None]        # (B, S)
    scores = jnp.einsum('tbh,sbh->tbs', hdec, mem)
    scores = jnp.where(valid[None], scores, -1e9)
    attn = jax.nn.softmax(scores, axis=-1)
    ctx = jnp.einsum('tbs,sbh->tbh', attn, mem)
    dec_out = jnp.tanh(ctx @ params['dec_wc'] + hdec @ params['dec_wh'])
    return dec_out, {"std": attn}


def init_params(key, vocab_src, vocab_tgt, E, H):
    ks = jax.random.split(key, 12)
    s = 0.1
    return {
        'emb_src': s * jax.random.normal(ks[0], (vocab_src, E), jnp.float32),
        'emb_tgt': s * jax.random.normal(ks[1], (vocab_tgt, E), jnp.float32),
        'enc_wih': s * jax.random.normal(ks[2], (E, 3 * H), jnp.float32),
        'enc_whh': s * jax.random.normal(ks[3], (H, 3 * H), jnp.float32),
        'enc_bih': s * jax.random.normal(ks[4], (3 * H,), jnp.float32),
        'enc_bhh': s * jax.random.normal(ks[5], (3 * H,), jnp.float32),
        'dec_wih': s * jax.random.normal(ks[6], (E, 3 * H), jnp.float32),
        'dec_whh': s * jax.random.normal(ks[7], (H, 3 * H), jnp.float32),
        'dec_bih': s * jax.random.normal(ks[8], (3 * H,), jnp.float32),
        'dec_bhh': s * jax.random.normal(ks[9], (3 * H,), jnp.float32),
        'dec_wc': s * jax.random.normal(ks[10], (H, H), jnp.float32),
        'dec_wh': s * jax.random.normal(ks[11], (H, H), jnp.float32),
    }


if __name__ == "__main__":
    # small shapes consistent with the module's forward contract
    S, T, B = 8, 9, 2          # src_len, tgt_len (before [:-1]), batch
    E, H = 16, 32              # embedding dim, hidden dim
    VOCAB_SRC, VOCAB_TGT = 20, 24

    key = jax.random.PRNGKey(0)
    k_src, k_tgt, k_par = jax.random.split(key, 3)

    src = jax.random.randint(k_src, (S, B), 0, VOCAB_SRC, dtype=jnp.int32)   # [len, batch]
    tgt = jax.random.randint(k_tgt, (T, B), 0, VOCAB_TGT, dtype=jnp.int32)   # [tgt_len, batch]
    lengths = jnp.array([S, S - 3], dtype=jnp.int32)                          # [batch]

    params = init_params(k_par, VOCAB_SRC, VOCAB_TGT, E, H)

    dec_out, attns = jax.jit(nmt_forward)(params, src, tgt, lengths)
    dec_out = jax.block_until_ready(dec_out)
    attn_std = jax.block_until_ready(attns["std"])

    assert dec_out.shape == (T - 1, B, H)
    assert attn_std.shape == (T - 1, B, S)
    assert bool(jnp.all(jnp.isfinite(dec_out)))
    # attention over padded positions of the shorter sequence must be ~0
    assert float(jnp.max(attn_std[:, 1, S - 3:])) < 1e-6

    # pure-JAX reference check
    ref_out, ref_attns = jax.jit(nmt_reference)(params, src, tgt, lengths)
    assert bool(jnp.allclose(dec_out, ref_out, atol=1e-4, rtol=1e-4))
    assert bool(jnp.allclose(attn_std, ref_attns["std"], atol=1e-4, rtol=1e-4))

    print("KERNEL_OK")
</pallas_src>

<mosaic_0001>
module attributes {stable_mosaic.version = 11 : i64} {
  func.func @_nmt_fused_kernel(%arg0: i32, %arg1: memref<8x2x96xf32, #tpu.memory_space<vmem>>, %arg2: memref<32x96xf32, #tpu.memory_space<vmem>>, %arg3: memref<1x32xf32, #tpu.memory_space<vmem>>, %arg4: memref<8x2x1xf32, #tpu.memory_space<vmem>>, %arg5: memref<8x2x96xf32, #tpu.memory_space<vmem>>, %arg6: memref<32x96xf32, #tpu.memory_space<vmem>>, %arg7: memref<1x32xf32, #tpu.memory_space<vmem>>, %arg8: memref<2x8xf32, #tpu.memory_space<vmem>>, %arg9: memref<32x32xf32, #tpu.memory_space<vmem>>, %arg10: memref<32x32xf32, #tpu.memory_space<vmem>>, %arg11: memref<16x32xf32, #tpu.memory_space<vmem>>, %arg12: memref<16x8xf32, #tpu.memory_space<vmem>>, %arg13: memref<8x2x32xf32, #tpu.memory_space<vmem>>, %arg14: memref<8x2x32xf32, #tpu.memory_space<vmem>>) attributes {dimension_semantics = [#tpu.dimension_semantics<arbitrary>], iteration_bounds = array<i64: 1>, scalar_prefetch = 0 : i64, scratch_operands = 2 : i64, tpu.core_type = #tpu.core_type<tc>, window_params = [{pipeline_mode = #tpu.pipeline_mode<synchronous>, transform_indices = @transform_0, window_bounds = array<i64: 8, 2, 96>}, {pipeline_mode = #tpu.pipeline_mode<synchronous>, transform_indices = @transform_1, window_bounds = array<i64: 32, 96>}, {pipeline_mode = #tpu.pipeline_mode<synchronous>, transform_indices = @transform_2, window_bounds = array<i64: 1, 32>}, {pipeline_mode = #tpu.pipeline_mode<synchronous>, transform_indices = @transform_3, window_bounds = array<i64: 8, 2, 1>}, {pipeline_mode = #tpu.pipeline_mode<synchronous>, transform_indices = @transform_4, window_bounds = array<i64: 8, 2, 96>}, {pipeline_mode = #tpu.pipeline_mode<synchronous>, transform_indices = @transform_5, window_bounds = array<i64: 32, 96>}, {pipeline_mode = #tpu.pipeline_mode<synchronous>, transform_indices = @transform_6, window_bounds = array<i64: 1, 32>}, {pipeline_mode = #tpu.pipeline_mode<synchronous>, transform_indices = @transform_7, window_bounds = array<i64: 2, 8>}, {pipeline_mode = #tpu.pipeline_mode<synchronous>, transform_indices = @transform_8, window_bounds = array<i64: 32, 32>}, {pipeline_mode = #tpu.pipeline_mode<synchronous>, transform_indices = @transform_9, window_bounds = array<i64: 32, 32>}, {pipeline_mode = #tpu.pipeline_mode<synchronous>, transform_indices = @transform_10, window_bounds = array<i64: 16, 32>}, {pipeline_mode = #tpu.pipeline_mode<synchronous>, transform_indices = @transform_11, window_bounds = array<i64: 16, 8>}]} {
    %c0 = arith.constant 0 : index
    %c0_0 = arith.constant 0 : index
    %0 = vector.load %arg2[%c0, %c0_0] : memref<32x96xf32, #tpu.memory_space<vmem>>, vector<32x96xf32>
    %c0_1 = arith.constant 0 : index
    %c0_2 = arith.constant 0 : index
    %1 = vector.load %arg3[%c0_1, %c0_2] : memref<1x32xf32, #tpu.memory_space<vmem>>, vector<1x32xf32>
    %cst = arith.constant 0.000000e+00 : f32
    %2 = vector.broadcast %cst : f32 to vector<2x32xf32>
    %c0_i32 = arith.constant 0 : i32
    %3 = arith.index_cast %c0_i32 : i32 to index
    %c0_3 = arith.constant 0 : index
    %c0_4 = arith.constant 0 : index
    %4 = vector.load %arg1[%3, %c0_3, %c0_4] : memref<8x2x96xf32, #tpu.memory_space<vmem>>, vector<1x2x96xf32>
    %5 = vector.shape_cast %4 : vector<1x2x96xf32> to vector<2x96xf32>
    %cst_5 = arith.constant dense<0.000000e+00> : vector<2x96xf32>
    %6 = tpu.matmul %2, %0, %cst_5 {dimension_numbers = #tpu.dot_dimension_numbers<[1], [0], [0], [1], [0, 0, 1, 1], [], []>} : vector<2x32xf32>, vector<32x96xf32>, vector<2x96xf32> -> vector<2x96xf32>
    %7 = vector.extract_strided_slice %5 {offsets = [0, 0], sizes = [2, 64], strides = [1, 1]} : vector<2x96xf32> to vector<2x64xf32>
    %8 = vector.extract_strided_slice %6 {offsets = [0, 0], sizes = [2, 64], strides = [1, 1]} : vector<2x96xf32> to vector<2x64xf32>
    %9 = arith.addf %7, %8 : vector<2x64xf32>
    %10 = arith.negf %9 : vector<2x64xf32>
    %11 = math.exp %10 : vector<2x64xf32>
    %cst_6 = arith.constant 1.000000e+00 : f32
    %12 = vector.broadcast %cst_6 : f32 to vector<2x64xf32>
    %13 = arith.addf %12, %11 : vector<2x64xf32>
    %14 = arith.divf %12, %13 : vector<2x64xf32>
    %15 = vector.extract_strided_slice %14 {offsets = [0, 0], sizes = [2, 32], strides = [1, 1]} : vector<2x64xf32> to vector<2x32xf32>
    %16 = vector.extract_strided_slice %14 {offsets = [0, 32], sizes = [2, 32], strides = [1, 1]} : vector<2x64xf32> to vector<2x32xf32>
    %17 = vector.extract_strided_slice %5 {offsets = [0, 64], sizes = [2, 32], strides = [1, 1]} : vector<2x96xf32> to vector<2x32xf32>
    %18 = vector.extract_strided_slice %6 {offsets = [0, 64], sizes = [2, 32], strides = [1, 1]} : vector<2x96xf32> to vector<2x32xf32>
    %19 = vector.broadcast %1 : vector<1x32xf32> to vector<2x32xf32>
    %20 = arith.addf %18, %19 : vector<2x32xf32>
    %21 = arith.mulf %15, %20 : vector<2x32xf32>
    %22 = arith.addf %17, %21 : vector<2x32xf32>
    %23 = math.tanh %22 : vector<2x32xf32>
    %cst_7 = arith.constant 1.000000e+00 : f32
    %24 = vector.broadcast %cst_7 : f32 to vector<2x32xf32>
    %25 = arith.subf %24, %16 : vector<2x32xf32>
    %26 = arith.mulf %25, %23 : vector<2x32xf32>
    %27 = arith.mulf %16, %2 : vector<2x32xf32>
    %28 = arith.addf %26, %27 : vector<2x32xf32>
    %29 = arith.index_cast %c0_i32 : i32 to index
    %c0_8 = arith.constant 0 : index
    %c0_9 = arith.constant 0 : index
    %30 = vector.load %arg4[%29, %c0_8, %c0_9] : memref<8x2x1xf32, #tpu.memory_space<vmem>>, vector<1x2x1xf32>
    %31 = vector.shape_cast %30 : vector<1x2x1xf32> to vector<2x1xf32>
    %32 = vector.broadcast %31 : vector<2x1xf32> to vector<2x32xf32>
    %33 = arith.mulf %32, %28 : vector<2x32xf32>
    %34 = arith.index_cast %c0_i32 : i32 to index
    %c0_10 = arith.constant 0 : index
    %c0_11 = arith.constant 0 : index
    %35 = vector.load %arg13[%34, %c0_10, %c0_11] : memref<8x2x32xf32, #tpu.memory_space<vmem>>, vector<1x2x32xf32>
    %36 = vector.shape_cast %35 : vector<1x2x32xf32> to vector<2x32xf32>
    %37 = vector.shape_cast %33 : vector<2x32xf32> to vector<1x2x32xf32>
    tpu.vector_store %arg13[%34, %c0_10, %c0_11], %37 {strides = array<i32>} : memref<8x2x32xf32, #tpu.memory_space<vmem>>, vector<1x2x32xf32>,
    %38 = vector.broadcast %31 : vector<2x1xf32> to vector<2x32xf32>
    %39 = arith.mulf %38, %28 : vector<2x32xf32>
    %cst_12 = arith.constant 1.000000e+00 : f32
    %40 = vector.broadcast %cst_12 : f32 to vector<2x1xf32>
    %41 = arith.subf %40, %31 : vector<2x1xf32>
    %42 = vector.broadcast %41 : vector<2x1xf32> to vector<2x32xf32>
    %43 = arith.mulf %42, %2 : vector<2x32xf32>
    %44 = arith.addf %39, %43 : vector<2x32xf32>
    %c1_i32 = arith.constant 1 : i32
    %45 = arith.index_cast %c1_i32 : i32 to index
    %c0_13 = arith.constant 0 : index
    %c0_14 = arith.constant 0 : index
    %46 = vector.load %arg1[%45, %c0_13, %c0_14] : memref<8x2x96xf32, #tpu.memory_space<vmem>>, vector<1x2x96xf32>
    %47 = vector.shape_cast %46 : vector<1x2x96xf32> to vector<2x96xf32>
    %cst_15 = arith.constant dense<0.000000e+00> : vector<2x96xf32>
    %48 = tpu.matmul %44, %0, %cst_15 {dimension_numbers = #tpu.dot_dimension_numbers<[1], [0], [0], [1], [0, 0, 1, 1], [], []>} : vector<2x32xf32>, vector<32x96xf32>, vector<2x96xf32> -> vector<2x96xf32>
    %49 = vector.extract_strided_slice %47 {offsets = [0, 0], sizes = [2, 64], strides = [1, 1]} : vector<2x96xf32> to vector<2x64xf32>
    %50 = vector.extract_strided_slice %48 {offsets = [0, 0], sizes = [2, 64], strides = [1, 1]} : vector<2x96xf32> to vector<2x64xf32>
    %51 = arith.addf %49, %50 : vector<2x64xf32>
    %52 = arith.negf %51 : vector<2x64xf32>
    %53 = math.exp %52 : vector<2x64xf32>
    %cst_16 = arith.constant 1.000000e+00 : f32
    %54 = vector.broadcast %cst_16 : f32 to vector<2x64xf32>
    %55 = arith.addf %54, %53 : vector<2x64xf32>
    %56 = arith.divf %54, %55 : vector<2x64xf32>
    %57 = vector.extract_strided_slice %56 {offsets = [0, 0], sizes = [2, 32], strides = [1, 1]} : vector<2x64xf32> to vector<2x32xf32>
    %58 = vector.extract_strided_slice %56 {offsets = [0, 32], sizes = [2, 32], strides = [1, 1]} : vector<2x64xf32> to vector<2x32xf32>
    %59 = vector.extract_strided_slice %47 {offsets = [0, 64], sizes = [2, 32], strides = [1, 1]} : vector<2x96xf32> to vector<2x32xf32>
    %60 = vector.extract_strided_slice %48 {offsets = [0, 64], sizes = [2, 32], strides = [1, 1]} : vector<2x96xf32> to vector<2x32xf32>
    %61 = vector.broadcast %1 : vector<1x32xf32> to vector<2x32xf32>
    %62 = arith.addf %60, %61 : vector<2x32xf32>
    %63 = arith.mulf %57, %62 : vector<2x32xf32>
    %64 = arith.addf %59, %63 : vector<2x32xf32>
    %65 = math.tanh %64 : vector<2x32xf32>
    %cst_17 = arith.constant 1.000000e+00 : f32
    %66 = vector.broadcast %cst_17 : f32 to vector<2x32xf32>
    %67 = arith.subf %66, %58 : vector<2x32xf32>
    %68 = arith.mulf %67, %65 : vector<2x32xf32>
    %69 = arith.mulf %58, %44 : vector<2x32xf32>
    %70 = arith.addf %68, %69 : vector<2x32xf32>
    %71 = arith.index_cast %c1_i32 : i32 to index
    %c0_18 = arith.constant 0 : index
    %c0_19 = arith.constant 0 : index
    %72 = vector.load %arg4[%71, %c0_18, %c0_19] : memref<8x2x1xf32, #tpu.memory_space<vmem>>, vector<1x2x1xf32>
    %73 = vector.shape_cast %72 : vector<1x2x1xf32> to vector<2x1xf32>
    %74 = vector.broadcast %73 : vector<2x1xf32> to vector<2x32xf32>
    %75 = arith.mulf %74, %70 : vector<2x32xf32>
    %76 = arith.index_cast %c1_i32 : i32 to index
    %c0_20 = arith.constant 0 : index
    %c0_21 = arith.constant 0 : index
    %77 = vector.load %arg13[%76, %c0_20, %c0_21] : memref<8x2x32xf32, #tpu.memory_space<vmem>>, vector<1x2x32xf32>
    %78 = vector.shape_cast %77 : vector<1x2x32xf32> to vector<2x32xf32>
    %79 = vector.shape_cast %75 : vector<2x32xf32> to vector<1x2x32xf32>
    tpu.vector_store %arg13[%76, %c0_20, %c0_21], %79 {strides = array<i32>} : memref<8x2x32xf32, #tpu.memory_space<vmem>>, vector<1x2x32xf32>,
    %80 = vector.broadcast %73 : vector<2x1xf32> to vector<2x32xf32>
    %81 = arith.mulf %80, %70 : vector<2x32xf32>
    %cst_22 = arith.constant 1.000000e+00 : f32
    %82 = vector.broadcast %cst_22 : f32 to vector<2x1xf32>
    %83 = arith.subf %82, %73 : vector<2x1xf32>
    %84 = vector.broadcast %83 : vector<2x1xf32> to vector<2x32xf32>
    %85 = arith.mulf %84, %44 : vector<2x32xf32>
    %86 = arith.addf %81, %85 : vector<2x32xf32>
    %c2_i32 = arith.constant 2 : i32
    %87 = arith.index_cast %c2_i32 : i32 to index
    %c0_23 = arith.constant 0 : index
    %c0_24 = arith.constant 0 : index
    %88 = vector.load %arg1[%87, %c0_23, %c0_24] : memref<8x2x96xf32, #tpu.memory_space<vmem>>, vector<1x2x96xf32>
    %89 = vector.shape_cast %88 : vector<1x2x96xf32> to vector<2x96xf32>
    %cst_25 = arith.constant dense<0.000000e+00> : vector<2x96xf32>
    %90 = tpu.matmul %86, %0, %cst_25 {dimension_numbers = #tpu.dot_dimension_numbers<[1], [0], [0], [1], [0, 0, 1, 1], [], []>} : vector<2x32xf32>, vector<32x96xf32>, vector<2x96xf32> -> vector<2x96xf32>
    %91 = vector.extract_strided_slice %89 {offsets = [0, 0], sizes = [2, 64], strides = [1, 1]} : vector<2x96xf32> to vector<2x64xf32>
    %92 = vector.extract_strided_slice %90 {offsets = [0, 0], sizes = [2, 64], strides = [1, 1]} : vector<2x96xf32> to vector<2x64xf32>
    %93 = arith.addf %91, %92 : vector<2x64xf32>
    %94 = arith.negf %93 : vector<2x64xf32>
    %95 = math.exp %94 : vector<2x64xf32>
    %cst_26 = arith.constant 1.000000e+00 : f32
    %96 = vector.broadcast %cst_26 : f32 to vector<2x64xf32>
    %97 = arith.addf %96, %95 : vector<2x64xf32>
    %98 = arith.divf %96, %97 : vector<2x64xf32>
    %99 = vector.extract_strided_slice %98 {offsets = [0, 0], sizes = [2, 32], strides = [1, 1]} : vector<2x64xf32> to vector<2x32xf32>
    %100 = vector.extract_strided_slice %98 {offsets = [0, 32], sizes = [2, 32], strides = [1, 1]} : vector<2x64xf32> to vector<2x32xf32>
    %101 = vector.extract_strided_slice %89 {offsets = [0, 64], sizes = [2, 32], strides = [1, 1]} : vector<2x96xf32> to vector<2x32xf32>
    %102 = vector.extract_strided_slice %90 {offsets = [0, 64], sizes = [2, 32], strides = [1, 1]} : vector<2x96xf32> to vector<2x32xf32>
    %103 = vector.broadcast %1 : vector<1x32xf32> to vector<2x32xf32>
    %104 = arith.addf %102, %103 : vector<2x32xf32>
    %105 = arith.mulf %99, %104 : vector<2x32xf32>
    %106 = arith.addf %101, %105 : vector<2x32xf32>
    %107 = math.tanh %106 : vector<2x32xf32>
    %cst_27 = arith.constant 1.000000e+00 : f32
    %108 = vector.broadcast %cst_27 : f32 to vector<2x32xf32>
    %109 = arith.subf %108, %100 : vector<2x32xf32>
    %110 = arith.mulf %109, %107 : vector<2x32xf32>
    %111 = arith.mulf %100, %86 : vector<2x32xf32>
    %112 = arith.addf %110, %111 : vector<2x32xf32>
    %113 = arith.index_cast %c2_i32 : i32 to index
    %c0_28 = arith.constant 0 : index
    %c0_29 = arith.constant 0 : index
    %114 = vector.load %arg4[%113, %c0_28, %c0_29] : memref<8x2x1xf32, #tpu.memory_space<vmem>>, vector<1x2x1xf32>
    %115 = vector.shape_cast %114 : vector<1x2x1xf32> to vector<2x1xf32>
    %116 = vector.broadcast %115 : vector<2x1xf32> to vector<2x32xf32>
    %117 = arith.mulf %116, %112 : vector<2x32xf32>
    %118 = arith.index_cast %c2_i32 : i32 to index
    %c0_30 = arith.constant 0 : index
    %c0_31 = arith.constant 0 : index
    %119 = vector.load %arg13[%118, %c0_30, %c0_31] : memref<8x2x32xf32, #tpu.memory_space<vmem>>, vector<1x2x32xf32>
    %120 = vector.shape_cast %119 : vector<1x2x32xf32> to vector<2x32xf32>
    %121 = vector.shape_cast %117 : vector<2x32xf32> to vector<1x2x32xf32>
    tpu.vector_store %arg13[%118, %c0_30, %c0_31], %121 {strides = array<i32>} : memref<8x2x32xf32, #tpu.memory_space<vmem>>, vector<1x2x32xf32>,
    %122 = vector.broadcast %115 : vector<2x1xf32> to vector<2x32xf32>
    %123 = arith.mulf %122, %112 : vector<2x32xf32>
    %cst_32 = arith.constant 1.000000e+00 : f32
    %124 = vector.broadcast %cst_32 : f32 to vector<2x1xf32>
    %125 = arith.subf %124, %115 : vector<2x1xf32>
    %126 = vector.broadcast %125 : vector<2x1xf32> to vector<2x32xf32>
    %127 = arith.mulf %126, %86 : vector<2x32xf32>
    %128 = arith.addf %123, %127 : vector<2x32xf32>
    %c3_i32 = arith.constant 3 : i32
    %129 = arith.index_cast %c3_i32 : i32 to index
    %c0_33 = arith.constant 0 : index
    %c0_34 = arith.constant 0 : index
    %130 = vector.load %arg1[%129, %c0_33, %c0_34] : memref<8x2x96xf32, #tpu.memory_space<vmem>>, vector<1x2x96xf32>
    %131 = vector.shape_cast %130 : vector<1x2x96xf32> to vector<2x96xf32>
    %cst_35 = arith.constant dense<0.000000e+00> : vector<2x96xf32>
    %132 = tpu.matmul %128, %0, %cst_35 {dimension_numbers = #tpu.dot_dimension_numbers<[1], [0], [0], [1], [0, 0, 1, 1], [], []>} : vector<2x32xf32>, vector<32x96xf32>, vector<2x96xf32> -> vector<2x96xf32>
    %133 = vector.extract_strided_slice %131 {offsets = [0, 0], sizes = [2, 64], strides = [1, 1]} : vector<2x96xf32> to vector<2x64xf32>
    %134 = vector.extract_strided_slice %132 {offsets = [0, 0], sizes = [2, 64], strides = [1, 1]} : vector<2x96xf32> to vector<2x64xf32>
    %135 = arith.addf %133, %134 : vector<2x64xf32>
    %136 = arith.negf %135 : vector<2x64xf32>
    %137 = math.exp %136 : vector<2x64xf32>
    %cst_36 = arith.constant 1.000000e+00 : f32
    %138 = vector.broadcast %cst_36 : f32 to vector<2x64xf32>
    %139 = arith.addf %138, %137 : vector<2x64xf32>
    %140 = arith.divf %138, %139 : vector<2x64xf32>
    %141 = vector.extract_strided_slice %140 {offsets = [0, 0], sizes = [2, 32], strides = [1, 1]} : vector<2x64xf32> to vector<2x32xf32>
    %142 = vector.extract_strided_slice %140 {offsets = [0, 32], sizes = [2, 32], strides = [1, 1]} : vector<2x64xf32> to vector<2x32xf32>
    %143 = vector.extract_strided_slice %131 {offsets = [0, 64], sizes = [2, 32], strides = [1, 1]} : vector<2x96xf32> to vector<2x32xf32>
    %144 = vector.extract_strided_slice %132 {offsets = [0, 64], sizes = [2, 32], strides = [1, 1]} : vector<2x96xf32> to vector<2x32xf32>
    %145 = vector.broadcast %1 : vector<1x32xf32> to vector<2x32xf32>
    %146 = arith.addf %144, %145 : vector<2x32xf32>
    %147 = arith.mulf %141, %146 : vector<2x32xf32>
    %148 = arith.addf %143, %147 : vector<2x32xf32>
    %149 = math.tanh %148 : vector<2x32xf32>
    %cst_37 = arith.constant 1.000000e+00 : f32
    %150 = vector.broadcast %cst_37 : f32 to vector<2x32xf32>
    %151 = arith.subf %150, %142 : vector<2x32xf32>
    %152 = arith.mulf %151, %149 : vector<2x32xf32>
    %153 = arith.mulf %142, %128 : vector<2x32xf32>
    %154 = arith.addf %152, %153 : vector<2x32xf32>
    %155 = arith.index_cast %c3_i32 : i32 to index
    %c0_38 = arith.constant 0 : index
    %c0_39 = arith.constant 0 : index
    %156 = vector.load %arg4[%155, %c0_38, %c0_39] : memref<8x2x1xf32, #tpu.memory_space<vmem>>, vector<1x2x1xf32>
    %157 = vector.shape_cast %156 : vector<1x2x1xf32> to vector<2x1xf32>
    %158 = vector.broadcast %157 : vector<2x1xf32> to vector<2x32xf32>
    %159 = arith.mulf %158, %154 : vector<2x32xf32>
    %160 = arith.index_cast %c3_i32 : i32 to index
    %c0_40 = arith.constant 0 : index
    %c0_41 = arith.constant 0 : index
    %161 = vector.load %arg13[%160, %c0_40, %c0_41] : memref<8x2x32xf32, #tpu.memory_space<vmem>>, vector<1x2x32xf32>
    %162 = vector.shape_cast %161 : vector<1x2x32xf32> to vector<2x32xf32>
    %163 = vector.shape_cast %159 : vector<2x32xf32> to vector<1x2x32xf32>
    tpu.vector_store %arg13[%160, %c0_40, %c0_41], %163 {strides = array<i32>} : memref<8x2x32xf32, #tpu.memory_space<vmem>>, vector<1x2x32xf32>,
    %164 = vector.broadcast %157 : vector<2x1xf32> to vector<2x32xf32>
    %165 = arith.mulf %164, %154 : vector<2x32xf32>
    %cst_42 = arith.constant 1.000000e+00 : f32
    %166 = vector.broadcast %cst_42 : f32 to vector<2x1xf32>
    %167 = arith.subf %166, %157 : vector<2x1xf32>
    %168 = vector.broadcast %167 : vector<2x1xf32> to vector<2x32xf32>
    %169 = arith.mulf %168, %128 : vector<2x32xf32>
    %170 = arith.addf %165, %169 : vector<2x32xf32>
    %c4_i32 = arith.constant 4 : i32
    %171 = arith.index_cast %c4_i32 : i32 to index
    %c0_43 = arith.constant 0 : index
    %c0_44 = arith.constant 0 : index
    %172 = vector.load %arg1[%171, %c0_43, %c0_44] : memref<8x2x96xf32, #tpu.memory_space<vmem>>, vector<1x2x96xf32>
    %173 = vector.shape_cast %172 : vector<1x2x96xf32> to vector<2x96xf32>
    %cst_45 = arith.constant dense<0.000000e+00> : vector<2x96xf32>
    %174 = tpu.matmul %170, %0, %cst_45 {dimension_numbers = #tpu.dot_dimension_numbers<[1], [0], [0], [1], [0, 0, 1, 1], [], []>} : vector<2x32xf32>, vector<32x96xf32>, vector<2x96xf32> -> vector<2x96xf32>
    %175 = vector.extract_strided_slice %173 {offsets = [0, 0], sizes = [2, 64], strides = [1, 1]} : vector<2x96xf32> to vector<2x64xf32>
    %176 = vector.extract_strided_slice %174 {offsets = [0, 0], sizes = [2, 64], strides = [1, 1]} : vector<2x96xf32> to vector<2x64xf32>
    %177 = arith.addf %175, %176 : vector<2x64xf32>
    %178 = arith.negf %177 : vector<2x64xf32>
    %179 = math.exp %178 : vector<2x64xf32>
    %cst_46 = arith.constant 1.000000e+00 : f32
    %180 = vector.broadcast %cst_46 : f32 to vector<2x64xf32>
    %181 = arith.addf %180, %179 : vector<2x64xf32>
    %182 = arith.divf %180, %181 : vector<2x64xf32>
    %183 = vector.extract_strided_slice %182 {offsets = [0, 0], sizes = [2, 32], strides = [1, 1]} : vector<2x64xf32> to vector<2x32xf32>
    %184 = vector.extract_strided_slice %182 {offsets = [0, 32], sizes = [2, 32], strides = [1, 1]} : vector<2x64xf32> to vector<2x32xf32>
    %185 = vector.extract_strided_slice %173 {offsets = [0, 64], sizes = [2, 32], strides = [1, 1]} : vector<2x96xf32> to vector<2x32xf32>
    %186 = vector.extract_strided_slice %174 {offsets = [0, 64], sizes = [2, 32], strides = [1, 1]} : vector<2x96xf32> to vector<2x32xf32>
    %187 = vector.broadcast %1 : vector<1x32xf32> to vector<2x32xf32>
    %188 = arith.addf %186, %187 : vector<2x32xf32>
    %189 = arith.mulf %183, %188 : vector<2x32xf32>
    %190 = arith.addf %185, %189 : vector<2x32xf32>
    %191 = math.tanh %190 : vector<2x32xf32>
    %cst_47 = arith.constant 1.000000e+00 : f32
    %192 = vector.broadcast %cst_47 : f32 to vector<2x32xf32>
    %193 = arith.subf %192, %184 : vector<2x32xf32>
    %194 = arith.mulf %193, %191 : vector<2x32xf32>
    %195 = arith.mulf %184, %170 : vector<2x32xf32>
    %196 = arith.addf %194, %195 : vector<2x32xf32>
    %197 = arith.index_cast %c4_i32 : i32 to index
    %c0_48 = arith.constant 0 : index
    %c0_49 = arith.constant 0 : index
    %198 = vector.load %arg4[%197, %c0_48, %c0_49] : memref<8x2x1xf32, #tpu.memory_space<vmem>>, vector<1x2x1xf32>
    %199 = vector.shape_cast %198 : vector<1x2x1xf32> to vector<2x1xf32>
    %200 = vector.broadcast %199 : vector<2x1xf32> to vector<2x32xf32>
    %201 = arith.mulf %200, %196 : vector<2x32xf32>
    %202 = arith.index_cast %c4_i32 : i32 to index
    %c0_50 = arith.constant 0 : index
    %c0_51 = arith.constant 0 : index
    %203 = vector.load %arg13[%202, %c0_50, %c0_51] : memref<8x2x32xf32, #tpu.memory_space<vmem>>, vector<1x2x32xf32>
    %204 = vector.shape_cast %203 : vector<1x2x32xf32> to vector<2x32xf32>
    %205 = vector.shape_cast %201 : vector<2x32xf32> to vector<1x2x32xf32>
    tpu.vector_store %arg13[%202, %c0_50, %c0_51], %205 {strides = array<i32>} : memref<8x2x32xf32, #tpu.memory_space<vmem>>, vector<1x2x32xf32>,
    %206 = vector.broadcast %199 : vector<2x1xf32> to vector<2x32xf32>
    %207 = arith.mulf %206, %196 : vector<2x32xf32>
    %cst_52 = arith.constant 1.000000e+00 : f32
    %208 = vector.broadcast %cst_52 : f32 to vector<2x1xf32>
    %209 = arith.subf %208, %199 : vector<2x1xf32>
    %210 = vector.broadcast %209 : vector<2x1xf32> to vector<2x32xf32>
    %211 = arith.mulf %210, %170 : vector<2x32xf32>
    %212 = arith.addf %207, %211 : vector<2x32xf32>
    %c5_i32 = arith.constant 5 : i32
    %213 = arith.index_cast %c5_i32 : i32 to index
    %c0_53 = arith.constant 0 : index
    %c0_54 = arith.constant 0 : index
    %214 = vector.load %arg1[%213, %c0_53, %c0_54] : memref<8x2x96xf32, #tpu.memory_space<vmem>>, vector<1x2x96xf32>
    %215 = vector.shape_cast %214 : vector<1x2x96xf32> to vector<2x96xf32>
    %cst_55 = arith.constant dense<0.000000e+00> : vector<2x96xf32>
    %216 = tpu.matmul %212, %0, %cst_55 {dimension_numbers = #tpu.dot_dimension_numbers<[1], [0], [0], [1], [0, 0, 1, 1], [], []>} : vector<2x32xf32>, vector<32x96xf32>, vector<2x96xf32> -> vector<2x96xf32>
    %217 = vector.extract_strided_slice %215 {offsets = [0, 0], sizes = [2, 64], strides = [1, 1]} : vector<2x96xf32> to vector<2x64xf32>
    %218 = vector.extract_strided_slice %216 {offsets = [0, 0], sizes = [2, 64], strides = [1, 1]} : vector<2x96xf32> to vector<2x64xf32>
    %219 = arith.addf %217, %218 : vector<2x64xf32>
    %220 = arith.negf %219 : vector<2x64xf32>
    %221 = math.exp %220 : vector<2x64xf32>
    %cst_56 = arith.constant 1.000000e+00 : f32
    %222 = vector.broadcast %cst_56 : f32 to vector<2x64xf32>
    %223 = arith.addf %222, %221 : vector<2x64xf32>
    %224 = arith.divf %222, %223 : vector<2x64xf32>
    %225 = vector.extract_strided_slice %224 {offsets = [0, 0], sizes = [2, 32], strides = [1, 1]} : vector<2x64xf32> to vector<2x32xf32>
    %226 = vector.extract_strided_slice %224 {offsets = [0, 32], sizes = [2, 32], strides = [1, 1]} : vector<2x64xf32> to vector<2x32xf32>
    %227 = vector.extract_strided_slice %215 {offsets = [0, 64], sizes = [2, 32], strides = [1, 1]} : vector<2x96xf32> to vector<2x32xf32>
    %228 = vector.extract_strided_slice %216 {offsets = [0, 64], sizes = [2, 32], strides = [1, 1]} : vector<2x96xf32> to vector<2x32xf32>
    %229 = vector.broadcast %1 : vector<1x32xf32> to vector<2x32xf32>
    %230 = arith.addf %228, %229 : vector<2x32xf32>
    %231 = arith.mulf %225, %230 : vector<2x32xf32>
    %232 = arith.addf %227, %231 : vector<2x32xf32>
    %233 = math.tanh %232 : vector<2x32xf32>
    %cst_57 = arith.constant 1.000000e+00 : f32
    %234 = vector.broadcast %cst_57 : f32 to vector<2x32xf32>
    %235 = arith.subf %234, %226 : vector<2x32xf32>
    %236 = arith.mulf %235, %233 : vector<2x32xf32>
    %237 = arith.mulf %226, %212 : vector<2x32xf32>
    %238 = arith.addf %236, %237 : vector<2x32xf32>
    %239 = arith.index_cast %c5_i32 : i32 to index
    %c0_58 = arith.constant 0 : index
    %c0_59 = arith.constant 0 : index
    %240 = vector.load %arg4[%239, %c0_58, %c0_59] : memref<8x2x1xf32, #tpu.memory_space<vmem>>, vector<1x2x1xf32>
    %241 = vector.shape_cast %240 : vector<1x2x1xf32> to vector<2x1xf32>
    %242 = vector.broadcast %241 : vector<2x1xf32> to vector<2x32xf32>
    %243 = arith.mulf %242, %238 : vector<2x32xf32>
    %244 = arith.index_cast %c5_i32 : i32 to index
    %c0_60 = arith.constant 0 : index
    %c0_61 = arith.constant 0 : index
    %245 = vector.load %arg13[%244, %c0_60, %c0_61] : memref<8x2x32xf32, #tpu.memory_space<vmem>>, vector<1x2x32xf32>
    %246 = vector.shape_cast %245 : vector<1x2x32xf32> to vector<2x32xf32>
    %247 = vector.shape_cast %243 : vector<2x32xf32> to vector<1x2x32xf32>
    tpu.vector_store %arg13[%244, %c0_60, %c0_61], %247 {strides = array<i32>} : memref<8x2x32xf32, #tpu.memory_space<vmem>>, vector<1x2x32xf32>,
    %248 = vector.broadcast %241 : vector<2x1xf32> to vector<2x32xf32>
    %249 = arith.mulf %248, %238 : vector<2x32xf32>
    %cst_62 = arith.constant 1.000000e+00 : f32
    %250 = vector.broadcast %cst_62 : f32 to vector<2x1xf32>
    %251 = arith.subf %250, %241 : vector<2x1xf32>
    %252 = vector.broadcast %251 : vector<2x1xf32> to vector<2x32xf32>
    %253 = arith.mulf %252, %212 : vector<2x32xf32>
    %254 = arith.addf %249, %253 : vector<2x32xf32>
    %c6_i32 = arith.constant 6 : i32
    %255 = arith.index_cast %c6_i32 : i32 to index
    %c0_63 = arith.constant 0 : index
    %c0_64 = arith.constant 0 : index
    %256 = vector.load %arg1[%255, %c0_63, %c0_64] : memref<8x2x96xf32, #tpu.memory_space<vmem>>, vector<1x2x96xf32>
    %257 = vector.shape_cast %256 : vector<1x2x96xf32> to vector<2x96xf32>
    %cst_65 = arith.constant dense<0.000000e+00> : vector<2x96xf32>
    %258 = tpu.matmul %254, %0, %cst_65 {dimension_numbers = #tpu.dot_dimension_numbers<[1], [0], [0], [1], [0, 0, 1, 1], [], []>} : vector<2x32xf32>, vector<32x96xf32>, vector<2x96xf32> -> vector<2x96xf32>
    %259 = vector.extract_strided_slice %257 {offsets = [0, 0], sizes = [2, 64], strides = [1, 1]} : vector<2x96xf32> to vector<2x64xf32>
    %260 = vector.extract_strided_slice %258 {offsets = [0, 0], sizes = [2, 64], strides = [1, 1]} : vector<2x96xf32> to vector<2x64xf32>
    %261 = arith.addf %259, %260 : vector<2x64xf32>
    %262 = arith.negf %261 : vector<2x64xf32>
    %263 = math.exp %262 : vector<2x64xf32>
    %cst_66 = arith.constant 1.000000e+00 : f32
    %264 = vector.broadcast %cst_66 : f32 to vector<2x64xf32>
    %265 = arith.addf %264, %263 : vector<2x64xf32>
    %266 = arith.divf %264, %265 : vector<2x64xf32>
    %267 = vector.extract_strided_slice %266 {offsets = [0, 0], sizes = [2, 32], strides = [1, 1]} : vector<2x64xf32> to vector<2x32xf32>
    %268 = vector.extract_strided_slice %266 {offsets = [0, 32], sizes = [2, 32], strides = [1, 1]} : vector<2x64xf32> to vector<2x32xf32>
    %269 = vector.extract_strided_slice %257 {offsets = [0, 64], sizes = [2, 32], strides = [1, 1]} : vector<2x96xf32> to vector<2x32xf32>
    %270 = vector.extract_strided_slice %258 {offsets = [0, 64], sizes = [2, 32], strides = [1, 1]} : vector<2x96xf32> to vector<2x32xf32>
    %271 = vector.broadcast %1 : vector<1x32xf32> to vector<2x32xf32>
    %272 = arith.addf %270, %271 : vector<2x32xf32>
    %273 = arith.mulf %267, %272 : vector<2x32xf32>
    %274 = arith.addf %269, %273 : vector<2x32xf32>
    %275 = math.tanh %274 : vector<2x32xf32>
    %cst_67 = arith.constant 1.000000e+00 : f32
    %276 = vector.broadcast %cst_67 : f32 to vector<2x32xf32>
    %277 = arith.subf %276, %268 : vector<2x32xf32>
    %278 = arith.mulf %277, %275 : vector<2x32xf32>
    %279 = arith.mulf %268, %254 : vector<2x32xf32>
    %280 = arith.addf %278, %279 : vector<2x32xf32>
    %281 = arith.index_cast %c6_i32 : i32 to index
    %c0_68 = arith.constant 0 : index
    %c0_69 = arith.constant 0 : index
    %282 = vector.load %arg4[%281, %c0_68, %c0_69] : memref<8x2x1xf32, #tpu.memory_space<vmem>>, vector<1x2x1xf32>
    %283 = vector.shape_cast %282 : vector<1x2x1xf32> to vector<2x1xf32>
    %284 = vector.broadcast %283 : vector<2x1xf32> to vector<2x32xf32>
    %285 = arith.mulf %284, %280 : vector<2x32xf32>
    %286 = arith.index_cast %c6_i32 : i32 to index
    %c0_70 = arith.constant 0 : index
    %c0_71 = arith.constant 0 : index
    %287 = vector.load %arg13[%286, %c0_70, %c0_71] : memref<8x2x32xf32, #tpu.memory_space<vmem>>, vector<1x2x32xf32>
    %288 = vector.shape_cast %287 : vector<1x2x32xf32> to vector<2x32xf32>
    %289 = vector.shape_cast %285 : vector<2x32xf32> to vector<1x2x32xf32>
    tpu.vector_store %arg13[%286, %c0_70, %c0_71], %289 {strides = array<i32>} : memref<8x2x32xf32, #tpu.memory_space<vmem>>, vector<1x2x32xf32>,
    %290 = vector.broadcast %283 : vector<2x1xf32> to vector<2x32xf32>
    %291 = arith.mulf %290, %280 : vector<2x32xf32>
    %cst_72 = arith.constant 1.000000e+00 : f32
    %292 = vector.broadcast %cst_72 : f32 to vector<2x1xf32>
    %293 = arith.subf %292, %283 : vector<2x1xf32>
    %294 = vector.broadcast %293 : vector<2x1xf32> to vector<2x32xf32>
    %295 = arith.mulf %294, %254 : vector<2x32xf32>
    %296 = arith.addf %291, %295 : vector<2x32xf32>
    %c7_i32 = arith.constant 7 : i32
    %297 = arith.index_cast %c7_i32 : i32 to index
    %c0_73 = arith.constant 0 : index
    %c0_74 = arith.constant 0 : index
    %298 = vector.load %arg1[%297, %c0_73, %c0_74] : memref<8x2x96xf32, #tpu.memory_space<vmem>>, vector<1x2x96xf32>
    %299 = vector.shape_cast %298 : vector<1x2x96xf32> to vector<2x96xf32>
    %cst_75 = arith.constant dense<0.000000e+00> : vector<2x96xf32>
    %300 = tpu.matmul %296, %0, %cst_75 {dimension_numbers = #tpu.dot_dimension_numbers<[1], [0], [0], [1], [0, 0, 1, 1], [], []>} : vector<2x32xf32>, vector<32x96xf32>, vector<2x96xf32> -> vector<2x96xf32>
    %301 = vector.extract_strided_slice %299 {offsets = [0, 0], sizes = [2, 64], strides = [1, 1]} : vector<2x96xf32> to vector<2x64xf32>
    %302 = vector.extract_strided_slice %300 {offsets = [0, 0], sizes = [2, 64], strides = [1, 1]} : vector<2x96xf32> to vector<2x64xf32>
    %303 = arith.addf %301, %302 : vector<2x64xf32>
    %304 = arith.negf %303 : vector<2x64xf32>
    %305 = math.exp %304 : vector<2x64xf32>
    %cst_76 = arith.constant 1.000000e+00 : f32
    %306 = vector.broadcast %cst_76 : f32 to vector<2x64xf32>
    %307 = arith.addf %306, %305 : vector<2x64xf32>
    %308 = arith.divf %306, %307 : vector<2x64xf32>
    %309 = vector.extract_strided_slice %308 {offsets = [0, 0], sizes = [2, 32], strides = [1, 1]} : vector<2x64xf32> to vector<2x32xf32>
    %310 = vector.extract_strided_slice %308 {offsets = [0, 32], sizes = [2, 32], strides = [1, 1]} : vector<2x64xf32> to vector<2x32xf32>
    %311 = vector.extract_strided_slice %299 {offsets = [0, 64], sizes = [2, 32], strides = [1, 1]} : vector<2x96xf32> to vector<2x32xf32>
    %312 = vector.extract_strided_slice %300 {offsets = [0, 64], sizes = [2, 32], strides = [1, 1]} : vector<2x96xf32> to vector<2x32xf32>
    %313 = vector.broadcast %1 : vector<1x32xf32> to vector<2x32xf32>
    %314 = arith.addf %312, %313 : vector<2x32xf32>
    %315 = arith.mulf %309, %314 : vector<2x32xf32>
    %316 = arith.addf %311, %315 : vector<2x32xf32>
    %317 = math.tanh %316 : vector<2x32xf32>
    %cst_77 = arith.constant 1.000000e+00 : f32
    %318 = vector.broadcast %cst_77 : f32 to vector<2x32xf32>
    %319 = arith.subf %318, %310 : vector<2x32xf32>
    %320 = arith.mulf %319, %317 : vector<2x32xf32>
    %321 = arith.mulf %310, %296 : vector<2x32xf32>
    %322 = arith.addf %320, %321 : vector<2x32xf32>
    %323 = arith.index_cast %c7_i32 : i32 to index
    %c0_78 = arith.constant 0 : index
    %c0_79 = arith.constant 0 : index
    %324 = vector.load %arg4[%323, %c0_78, %c0_79] : memref<8x2x1xf32, #tpu.memory_space<vmem>>, vector<1x2x1xf32>
    %325 = vector.shape_cast %324 : vector<1x2x1xf32> to vector<2x1xf32>
    %326 = vector.broadcast %325 : vector<2x1xf32> to vector<2x32xf32>
    %327 = arith.mulf %326, %322 : vector<2x32xf32>
    %328 = arith.index_cast %c7_i32 : i32 to index
    %c0_80 = arith.constant 0 : index
    %c0_81 = arith.constant 0 : index
    %329 = vector.load %arg13[%328, %c0_80, %c0_81] : memref<8x2x32xf32, #tpu.memory_space<vmem>>, vector<1x2x32xf32>
    %330 = vector.shape_cast %329 : vector<1x2x32xf32> to vector<2x32xf32>
    %331 = vector.shape_cast %327 : vector<2x32xf32> to vector<1x2x32xf32>
    tpu.vector_store %arg13[%328, %c0_80, %c0_81], %331 {strides = array<i32>} : memref<8x2x32xf32, #tpu.memory_space<vmem>>, vector<1x2x32xf32>,
    %332 = vector.broadcast %325 : vector<2x1xf32> to vector<2x32xf32>
    %333 = arith.mulf %332, %322 : vector<2x32xf32>
    %cst_82 = arith.constant 1.000000e+00 : f32
    %334 = vector.broadcast %cst_82 : f32 to vector<2x1xf32>
    %335 = arith.subf %334, %325 : vector<2x1xf32>
    %336 = vector.broadcast %335 : vector<2x1xf32> to vector<2x32xf32>
    %337 = arith.mulf %336, %296 : vector<2x32xf32>
    %338 = arith.addf %333, %337 : vector<2x32xf32>
    %c8_i32 = arith.constant 8 : i32
    %c0_83 = arith.constant 0 : index
    %c0_84 = arith.constant 0 : index
    %339 = vector.load %arg6[%c0_83, %c0_84] : memref<32x96xf32, #tpu.memory_space<vmem>>, vector<32x96xf32>
    %c0_85 = arith.constant 0 : index
    %c0_86 = arith.constant 0 : index
    %340 = vector.load %arg7[%c0_85, %c0_86] : memref<1x32xf32, #tpu.memory_space<vmem>>, vector<1x32xf32>
    %c0_i32_87 = arith.constant 0 : i32
    %341 = arith.index_cast %c0_i32_87 : i32 to index
    %c0_88 = arith.constant 0 : index
    %c0_89 = arith.constant 0 : index
    %342 = vector.load %arg5[%341, %c0_88, %c0_89] : memref<8x2x96xf32, #tpu.memory_space<vmem>>, vector<1x2x96xf32>
    %343 = vector.shape_cast %342 : vector<1x2x96xf32> to vector<2x96xf32>
    %cst_90 = arith.constant dense<0.000000e+00> : vector<2x96xf32>
    %344 = tpu.matmul %338, %339, %cst_90 {dimension_numbers = #tpu.dot_dimension_numbers<[1], [0], [0], [1], [0, 0, 1, 1], [], []>} : vector<2x32xf32>, vector<32x96xf32>, vector<2x96xf32> -> vector<2x96xf32>
    %345 = vector.extract_strided_slice %343 {offsets = [0, 0], sizes = [2, 64], strides = [1, 1]} : vector<2x96xf32> to vector<2x64xf32>
    %346 = vector.extract_strided_slice %344 {offsets = [0, 0], sizes = [2, 64], strides = [1, 1]} : vector<2x96xf32> to vector<2x64xf32>
    %347 = arith.addf %345, %346 : vector<2x64xf32>
    %348 = arith.negf %347 : vector<2x64xf32>
    %349 = math.exp %348 : vector<2x64xf32>
    %cst_91 = arith.constant 1.000000e+00 : f32
    %350 = vector.broadcast %cst_91 : f32 to vector<2x64xf32>
    %351 = arith.addf %350, %349 : vector<2x64xf32>
    %352 = arith.divf %350, %351 : vector<2x64xf32>
    %353 = vector.extract_strided_slice %352 {offsets = [0, 0], sizes = [2, 32], strides = [1, 1]} : vector<2x64xf32> to vector<2x32xf32>
    %354 = vector.extract_strided_slice %352 {offsets = [0, 32], sizes = [2, 32], strides = [1, 1]} : vector<2x64xf32> to vector<2x32xf32>
    %355 = vector.extract_strided_slice %343 {offsets = [0, 64], sizes = [2, 32], strides = [1, 1]} : vector<2x96xf32> to vector<2x32xf32>
    %356 = vector.extract_strided_slice %344 {offsets = [0, 64], sizes = [2, 32], strides = [1, 1]} : vector<2x96xf32> to vector<2x32xf32>
    %357 = vector.broadcast %340 : vector<1x32xf32> to vector<2x32xf32>
    %358 = arith.addf %356, %357 : vector<2x32xf32>
    %359 = arith.mulf %353, %358 : vector<2x32xf32>
    %360 = arith.addf %355, %359 : vector<2x32xf32>
    %361 = math.tanh %360 : vector<2x32xf32>
    %cst_92 = arith.constant 1.000000e+00 : f32
    %362 = vector.broadcast %cst_92 : f32 to vector<2x32xf32>
    %363 = arith.subf %362, %354 : vector<2x32xf32>
    %364 = arith.mulf %363, %361 : vector<2x32xf32>
    %365 = arith.mulf %354, %338 : vector<2x32xf32>
    %366 = arith.addf %364, %365 : vector<2x32xf32>
    %367 = arith.index_cast %c0_i32_87 : i32 to index
    %c0_93 = arith.constant 0 : index
    %c0_94 = arith.constant 0 : index
    %368 = vector.load %arg14[%367, %c0_93, %c0_94] : memref<8x2x32xf32, #tpu.memory_space<vmem>>, vector<1x2x32xf32>
    %369 = vector.shape_cast %368 : vector<1x2x32xf32> to vector<2x32xf32>
    %370 = vector.shape_cast %366 : vector<2x32xf32> to vector<1x2x32xf32>
    tpu.vector_store %arg14[%367, %c0_93, %c0_94], %370 {strides = array<i32>} : memref<8x2x32xf32, #tpu.memory_space<vmem>>, vector<1x2x32xf32>,
    %c1_i32_95 = arith.constant 1 : i32
    %371 = arith.index_cast %c1_i32_95 : i32 to index
    %c0_96 = arith.constant 0 : index
    %c0_97 = arith.constant 0 : index
    %372 = vector.load %arg5[%371, %c0_96, %c0_97] : memref<8x2x96xf32, #tpu.memory_space<vmem>>, vector<1x2x96xf32>
    %373 = vector.shape_cast %372 : vector<1x2x96xf32> to vector<2x96xf32>
    %cst_98 = arith.constant dense<0.000000e+00> : vector<2x96xf32>
    %374 = tpu.matmul %366, %339, %cst_98 {dimension_numbers = #tpu.dot_dimension_numbers<[1], [0], [0], [1], [0, 0, 1, 1], [], []>} : vector<2x32xf32>, vector<32x96xf32>, vector<2x96xf32> -> vector<2x96xf32>
    %375 = vector.extract_strided_slice %373 {offsets = [0, 0], sizes = [2, 64], strides = [1, 1]} : vector<2x96xf32> to vector<2x64xf32>
    %376 = vector.extract_strided_slice %374 {offsets = [0, 0], sizes = [2, 64], strides = [1, 1]} : vector<2x96xf32> to vector<2x64xf32>
    %377 = arith.addf %375, %376 : vector<2x64xf32>
    %378 = arith.negf %377 : vector<2x64xf32>
    %379 = math.exp %378 : vector<2x64xf32>
    %cst_99 = arith.constant 1.000000e+00 : f32
    %380 = vector.broadcast %cst_99 : f32 to vector<2x64xf32>
    %381 = arith.addf %380, %379 : vector<2x64xf32>
    %382 = arith.divf %380, %381 : vector<2x64xf32>
    %383 = vector.extract_strided_slice %382 {offsets = [0, 0], sizes = [2, 32], strides = [1, 1]} : vector<2x64xf32> to vector<2x32xf32>
    %384 = vector.extract_strided_slice %382 {offsets = [0, 32], sizes = [2, 32], strides = [1, 1]} : vector<2x64xf32> to vector<2x32xf32>
    %385 = vector.extract_strided_slice %373 {offsets = [0, 64], sizes = [2, 32], strides = [1, 1]} : vector<2x96xf32> to vector<2x32xf32>
    %386 = vector.extract_strided_slice %374 {offsets = [0, 64], sizes = [2, 32], strides = [1, 1]} : vector<2x96xf32> to vector<2x32xf32>
    %387 = vector.broadcast %340 : vector<1x32xf32> to vector<2x32xf32>
    %388 = arith.addf %386, %387 : vector<2x32xf32>
    %389 = arith.mulf %383, %388 : vector<2x32xf32>
    %390 = arith.addf %385, %389 : vector<2x32xf32>
    %391 = math.tanh %390 : vector<2x32xf32>
    %cst_100 = arith.constant 1.000000e+00 : f32
    %392 = vector.broadcast %cst_100 : f32 to vector<2x32xf32>
    %393 = arith.subf %392, %384 : vector<2x32xf32>
    %394 = arith.mulf %393, %391 : vector<2x32xf32>
    %395 = arith.mulf %384, %366 : vector<2x32xf32>
    %396 = arith.addf %394, %395 : vector<2x32xf32>
    %397 = arith.index_cast %c1_i32_95 : i32 to index
    %c0_101 = arith.constant 0 : index
    %c0_102 = arith.constant 0 : index
    %398 = vector.load %arg14[%397, %c0_101, %c0_102] : memref<8x2x32xf32, #tpu.memory_space<vmem>>, vector<1x2x32xf32>
    %399 = vector.shape_cast %398 : vector<1x2x32xf32> to vector<2x32xf32>
    %400 = vector.shape_cast %396 : vector<2x32xf32> to vector<1x2x32xf32>
    tpu.vector_store %arg14[%397, %c0_101, %c0_102], %400 {strides = array<i32>} : memref<8x2x32xf32, #tpu.memory_space<vmem>>, vector<1x2x32xf32>,
    %c2_i32_103 = arith.constant 2 : i32
    %401 = arith.index_cast %c2_i32_103 : i32 to index
    %c0_104 = arith.constant 0 : index
    %c0_105 = arith.constant 0 : index
    %402 = vector.load %arg5[%401, %c0_104, %c0_105] : memref<8x2x96xf32, #tpu.memory_space<vmem>>, vector<1x2x96xf32>
    %403 = vector.shape_cast %402 : vector<1x2x96xf32> to vector<2x96xf32>
    %cst_106 = arith.constant dense<0.000000e+00> : vector<2x96xf32>
    %404 = tpu.matmul %396, %339, %cst_106 {dimension_numbers = #tpu.dot_dimension_numbers<[1], [0], [0], [1], [0, 0, 1, 1], [], []>} : vector<2x32xf32>, vector<32x96xf32>, vector<2x96xf32> -> vector<2x96xf32>
    %405 = vector.extract_strided_slice %403 {offsets = [0, 0], sizes = [2, 64], strides = [1, 1]} : vector<2x96xf32> to vector<2x64xf32>
    %406 = vector.extract_strided_slice %404 {offsets = [0, 0], sizes = [2, 64], strides = [1, 1]} : vector<2x96xf32> to vector<2x64xf32>
    %407 = arith.addf %405, %406 : vector<2x64xf32>
    %408 = arith.negf %407 : vector<2x64xf32>
    %409 = math.exp %408 : vector<2x64xf32>
    %cst_107 = arith.constant 1.000000e+00 : f32
    %410 = vector.broadcast %cst_107 : f32 to vector<2x64xf32>
    %411 = arith.addf %410, %409 : vector<2x64xf32>
    %412 = arith.divf %410, %411 : vector<2x64xf32>
    %413 = vector.extract_strided_slice %412 {offsets = [0, 0], sizes = [2, 32], strides = [1, 1]} : vector<2x64xf32> to vector<2x32xf32>
    %414 = vector.extract_strided_slice %412 {offsets = [0, 32], sizes = [2, 32], strides = [1, 1]} : vector<2x64xf32> to vector<2x32xf32>
    %415 = vector.extract_strided_slice %403 {offsets = [0, 64], sizes = [2, 32], strides = [1, 1]} : vector<2x96xf32> to vector<2x32xf32>
    %416 = vector.extract_strided_slice %404 {offsets = [0, 64], sizes = [2, 32], strides = [1, 1]} : vector<2x96xf32> to vector<2x32xf32>
    %417 = vector.broadcast %340 : vector<1x32xf32> to vector<2x32xf32>
    %418 = arith.addf %416, %417 : vector<2x32xf32>
    %419 = arith.mulf %413, %418 : vector<2x32xf32>
    %420 = arith.addf %415, %419 : vector<2x32xf32>
    %421 = math.tanh %420 : vector<2x32xf32>
    %cst_108 = arith.constant 1.000000e+00 : f32
    %422 = vector.broadcast %cst_108 : f32 to vector<2x32xf32>
    %423 = arith.subf %422, %414 : vector<2x32xf32>
    %424 = arith.mulf %423, %421 : vector<2x32xf32>
    %425 = arith.mulf %414, %396 : vector<2x32xf32>
    %426 = arith.addf %424, %425 : vector<2x32xf32>
    %427 = arith.index_cast %c2_i32_103 : i32 to index
    %c0_109 = arith.constant 0 : index
    %c0_110 = arith.constant 0 : index
    %428 = vector.load %arg14[%427, %c0_109, %c0_110] : memref<8x2x32xf32, #tpu.memory_space<vmem>>, vector<1x2x32xf32>
    %429 = vector.shape_cast %428 : vector<1x2x32xf32> to vector<2x32xf32>
    %430 = vector.shape_cast %426 : vector<2x32xf32> to vector<1x2x32xf32>
    tpu.vector_store %arg14[%427, %c0_109, %c0_110], %430 {strides = array<i32>} : memref<8x2x32xf32, #tpu.memory_space<vmem>>, vector<1x2x32xf32>,
    %c3_i32_111 = arith.constant 3 : i32
    %431 = arith.index_cast %c3_i32_111 : i32 to index
    %c0_112 = arith.constant 0 : index
    %c0_113 = arith.constant 0 : index
    %432 = vector.load %arg5[%431, %c0_112, %c0_113] : memref<8x2x96xf32, #tpu.memory_space<vmem>>, vector<1x2x96xf32>
    %433 = vector.shape_cast %432 : vector<1x2x96xf32> to vector<2x96xf32>
    %cst_114 = arith.constant dense<0.000000e+00> : vector<2x96xf32>
    %434 = tpu.matmul %426, %339, %cst_114 {dimension_numbers = #tpu.dot_dimension_numbers<[1], [0], [0], [1], [0, 0, 1, 1], [], []>} : vector<2x32xf32>, vector<32x96xf32>, vector<2x96xf32> -> vector<2x96xf32>
    %435 = vector.extract_strided_slice %433 {offsets = [0, 0], sizes = [2, 64], strides = [1, 1]} : vector<2x96xf32> to vector<2x64xf32>
    %436 = vector.extract_strided_slice %434 {offsets = [0, 0], sizes = [2, 64], strides = [1, 1]} : vector<2x96xf32> to vector<2x64xf32>
    %437 = arith.addf %435, %436 : vector<2x64xf32>
    %438 = arith.negf %437 : vector<2x64xf32>
    %439 = math.exp %438 : vector<2x64xf32>
    %cst_115 = arith.constant 1.000000e+00 : f32
    %440 = vector.broadcast %cst_115 : f32 to vector<2x64xf32>
    %441 = arith.addf %440, %439 : vector<2x64xf32>
    %442 = arith.divf %440, %441 : vector<2x64xf32>
    %443 = vector.extract_strided_slice %442 {offsets = [0, 0], sizes = [2, 32], strides = [1, 1]} : vector<2x64xf32> to vector<2x32xf32>
    %444 = vector.extract_strided_slice %442 {offsets = [0, 32], sizes = [2, 32], strides = [1, 1]} : vector<2x64xf32> to vector<2x32xf32>
    %445 = vector.extract_strided_slice %433 {offsets = [0, 64], sizes = [2, 32], strides = [1, 1]} : vector<2x96xf32> to vector<2x32xf32>
    %446 = vector.extract_strided_slice %434 {offsets = [0, 64], sizes = [2, 32], strides = [1, 1]} : vector<2x96xf32> to vector<2x32xf32>
    %447 = vector.broadcast %340 : vector<1x32xf32> to vector<2x32xf32>
    %448 = arith.addf %446, %447 : vector<2x32xf32>
    %449 = arith.mulf %443, %448 : vector<2x32xf32>
    %450 = arith.addf %445, %449 : vector<2x32xf32>
    %451 = math.tanh %450 : vector<2x32xf32>
    %cst_116 = arith.constant 1.000000e+00 : f32
    %452 = vector.broadcast %cst_116 : f32 to vector<2x32xf32>
    %453 = arith.subf %452, %444 : vector<2x32xf32>
    %454 = arith.mulf %453, %451 : vector<2x32xf32>
    %455 = arith.mulf %444, %426 : vector<2x32xf32>
    %456 = arith.addf %454, %455 : vector<2x32xf32>
    %457 = arith.index_cast %c3_i32_111 : i32 to index
    %c0_117 = arith.constant 0 : index
    %c0_118 = arith.constant 0 : index
    %458 = vector.load %arg14[%457, %c0_117, %c0_118] : memref<8x2x32xf32, #tpu.memory_space<vmem>>, vector<1x2x32xf32>
    %459 = vector.shape_cast %458 : vector<1x2x32xf32> to vector<2x32xf32>
    %460 = vector.shape_cast %456 : vector<2x32xf32> to vector<1x2x32xf32>
    tpu.vector_store %arg14[%457, %c0_117, %c0_118], %460 {strides = array<i32>} : memref<8x2x32xf32, #tpu.memory_space<vmem>>, vector<1x2x32xf32>,
    %c4_i32_119 = arith.constant 4 : i32
    %461 = arith.index_cast %c4_i32_119 : i32 to index
    %c0_120 = arith.constant 0 : index
    %c0_121 = arith.constant 0 : index
    %462 = vector.load %arg5[%461, %c0_120, %c0_121] : memref<8x2x96xf32, #tpu.memory_space<vmem>>, vector<1x2x96xf32>
    %463 = vector.shape_cast %462 : vector<1x2x96xf32> to vector<2x96xf32>
    %cst_122 = arith.constant dense<0.000000e+00> : vector<2x96xf32>
    %464 = tpu.matmul %456, %339, %cst_122 {dimension_numbers = #tpu.dot_dimension_numbers<[1], [0], [0], [1], [0, 0, 1, 1], [], []>} : vector<2x32xf32>, vector<32x96xf32>, vector<2x96xf32> -> vector<2x96xf32>
    %465 = vector.extract_strided_slice %463 {offsets = [0, 0], sizes = [2, 64], strides = [1, 1]} : vector<2x96xf32> to vector<2x64xf32>
    %466 = vector.extract_strided_slice %464 {offsets = [0, 0], sizes = [2, 64], strides = [1, 1]} : vector<2x96xf32> to vector<2x64xf32>
    %467 = arith.addf %465, %466 : vector<2x64xf32>
    %468 = arith.negf %467 : vector<2x64xf32>
    %469 = math.exp %468 : vector<2x64xf32>
    %cst_123 = arith.constant 1.000000e+00 : f32
    %470 = vector.broadcast %cst_123 : f32 to vector<2x64xf32>
    %471 = arith.addf %470, %469 : vector<2x64xf32>
    %472 = arith.divf %470, %471 : vector<2x64xf32>
    %473 = vector.extract_strided_slice %472 {offsets = [0, 0], sizes = [2, 32], strides = [1, 1]} : vector<2x64xf32> to vector<2x32xf32>
    %474 = vector.extract_strided_slice %472 {offsets = [0, 32], sizes = [2, 32], strides = [1, 1]} : vector<2x64xf32> to vector<2x32xf32>
    %475 = vector.extract_strided_slice %463 {offsets = [0, 64], sizes = [2, 32], strides = [1, 1]} : vector<2x96xf32> to vector<2x32xf32>
    %476 = vector.extract_strided_slice %464 {offsets = [0, 64], sizes = [2, 32], strides = [1, 1]} : vector<2x96xf32> to vector<2x32xf32>
    %477 = vector.broadcast %340 : vector<1x32xf32> to vector<2x32xf32>
    %478 = arith.addf %476, %477 : vector<2x32xf32>
    %479 = arith.mulf %473, %478 : vector<2x32xf32>
    %480 = arith.addf %475, %479 : vector<2x32xf32>
    %481 = math.tanh %480 : vector<2x32xf32>
    %cst_124 = arith.constant 1.000000e+00 : f32
    %482 = vector.broadcast %cst_124 : f32 to vector<2x32xf32>
    %483 = arith.subf %482, %474 : vector<2x32xf32>
    %484 = arith.mulf %483, %481 : vector<2x32xf32>
    %485 = arith.mulf %474, %456 : vector<2x32xf32>
    %486 = arith.addf %484, %485 : vector<2x32xf32>
    %487 = arith.index_cast %c4_i32_119 : i32 to index
    %c0_125 = arith.constant 0 : index
    %c0_126 = arith.constant 0 : index
    %488 = vector.load %arg14[%487, %c0_125, %c0_126] : memref<8x2x32xf32, #tpu.memory_space<vmem>>, vector<1x2x32xf32>
    %489 = vector.shape_cast %488 : vector<1x2x32xf32> to vector<2x32xf32>
    %490 = vector.shape_cast %486 : vector<2x32xf32> to vector<1x2x32xf32>
    tpu.vector_store %arg14[%487, %c0_125, %c0_126], %490 {strides = array<i32>} : memref<8x2x32xf32, #tpu.memory_space<vmem>>, vector<1x2x32xf32>,
    %c5_i32_127 = arith.constant 5 : i32
    %491 = arith.index_cast %c5_i32_127 : i32 to index
    %c0_128 = arith.constant 0 : index
    %c0_129 = arith.constant 0 : index
    %492 = vector.load %arg5[%491, %c0_128, %c0_129] : memref<8x2x96xf32, #tpu.memory_space<vmem>>, vector<1x2x96xf32>
    %493 = vector.shape_cast %492 : vector<1x2x96xf32> to vector<2x96xf32>
    %cst_130 = arith.constant dense<0.000000e+00> : vector<2x96xf32>
    %494 = tpu.matmul %486, %339, %cst_130 {dimension_numbers = #tpu.dot_dimension_numbers<[1], [0], [0], [1], [0, 0, 1, 1], [], []>} : vector<2x32xf32>, vector<32x96xf32>, vector<2x96xf32> -> vector<2x96xf32>
    %495 = vector.extract_strided_slice %493 {offsets = [0, 0], sizes = [2, 64], strides = [1, 1]} : vector<2x96xf32> to vector<2x64xf32>
    %496 = vector.extract_strided_slice %494 {offsets = [0, 0], sizes = [2, 64], strides = [1, 1]} : vector<2x96xf32> to vector<2x64xf32>
    %497 = arith.addf %495, %496 : vector<2x64xf32>
    %498 = arith.negf %497 : vector<2x64xf32>
    %499 = math.exp %498 : vector<2x64xf32>
    %cst_131 = arith.constant 1.000000e+00 : f32
    %500 = vector.broadcast %cst_131 : f32 to vector<2x64xf32>
    %501 = arith.addf %500, %499 : vector<2x64xf32>
    %502 = arith.divf %500, %501 : vector<2x64xf32>
    %503 = vector.extract_strided_slice %502 {offsets = [0, 0], sizes = [2, 32], strides = [1, 1]} : vector<2x64xf32> to vector<2x32xf32>
    %504 = vector.extract_strided_slice %502 {offsets = [0, 32], sizes = [2, 32], strides = [1, 1]} : vector<2x64xf32> to vector<2x32xf32>
    %505 = vector.extract_strided_slice %493 {offsets = [0, 64], sizes = [2, 32], strides = [1, 1]} : vector<2x96xf32> to vector<2x32xf32>
    %506 = vector.extract_strided_slice %494 {offsets = [0, 64], sizes = [2, 32], strides = [1, 1]} : vector<2x96xf32> to vector<2x32xf32>
    %507 = vector.broadcast %340 : vector<1x32xf32> to vector<2x32xf32>
    %508 = arith.addf %506, %507 : vector<2x32xf32>
    %509 = arith.mulf %503, %508 : vector<2x32xf32>
    %510 = arith.addf %505, %509 : vector<2x32xf32>
    %511 = math.tanh %510 : vector<2x32xf32>
    %cst_132 = arith.constant 1.000000e+00 : f32
    %512 = vector.broadcast %cst_132 : f32 to vector<2x32xf32>
    %513 = arith.subf %512, %504 : vector<2x32xf32>
    %514 = arith.mulf %513, %511 : vector<2x32xf32>
    %515 = arith.mulf %504, %486 : vector<2x32xf32>
    %516 = arith.addf %514, %515 : vector<2x32xf32>
    %517 = arith.index_cast %c5_i32_127 : i32 to index
    %c0_133 = arith.constant 0 : index
    %c0_134 = arith.constant 0 : index
    %518 = vector.load %arg14[%517, %c0_133, %c0_134] : memref<8x2x32xf32, #tpu.memory_space<vmem>>, vector<1x2x32xf32>
    %519 = vector.shape_cast %518 : vector<1x2x32xf32> to vector<2x32xf32>
    %520 = vector.shape_cast %516 : vector<2x32xf32> to vector<1x2x32xf32>
    tpu.vector_store %arg14[%517, %c0_133, %c0_134], %520 {strides = array<i32>} : memref<8x2x32xf32, #tpu.memory_space<vmem>>, vector<1x2x32xf32>,
    %c6_i32_135 = arith.constant 6 : i32
    %521 = arith.index_cast %c6_i32_135 : i32 to index
    %c0_136 = arith.constant 0 : index
    %c0_137 = arith.constant 0 : index
    %522 = vector.load %arg5[%521, %c0_136, %c0_137] : memref<8x2x96xf32, #tpu.memory_space<vmem>>, vector<1x2x96xf32>
    %523 = vector.shape_cast %522 : vector<1x2x96xf32> to vector<2x96xf32>
    %cst_138 = arith.constant dense<0.000000e+00> : vector<2x96xf32>
    %524 = tpu.matmul %516, %339, %cst_138 {dimension_numbers = #tpu.dot_dimension_numbers<[1], [0], [0], [1], [0, 0, 1, 1], [], []>} : vector<2x32xf32>, vector<32x96xf32>, vector<2x96xf32> -> vector<2x96xf32>
    %525 = vector.extract_strided_slice %523 {offsets = [0, 0], sizes = [2, 64], strides = [1, 1]} : vector<2x96xf32> to vector<2x64xf32>
    %526 = vector.extract_strided_slice %524 {offsets = [0, 0], sizes = [2, 64], strides = [1, 1]} : vector<2x96xf32> to vector<2x64xf32>
    %527 = arith.addf %525, %526 : vector<2x64xf32>
    %528 = arith.negf %527 : vector<2x64xf32>
    %529 = math.exp %528 : vector<2x64xf32>
    %cst_139 = arith.constant 1.000000e+00 : f32
    %530 = vector.broadcast %cst_139 : f32 to vector<2x64xf32>
    %531 = arith.addf %530, %529 : vector<2x64xf32>
    %532 = arith.divf %530, %531 : vector<2x64xf32>
    %533 = vector.extract_strided_slice %532 {offsets = [0, 0], sizes = [2, 32], strides = [1, 1]} : vector<2x64xf32> to vector<2x32xf32>
    %534 = vector.extract_strided_slice %532 {offsets = [0, 32], sizes = [2, 32], strides = [1, 1]} : vector<2x64xf32> to vector<2x32xf32>
    %535 = vector.extract_strided_slice %523 {offsets = [0, 64], sizes = [2, 32], strides = [1, 1]} : vector<2x96xf32> to vector<2x32xf32>
    %536 = vector.extract_strided_slice %524 {offsets = [0, 64], sizes = [2, 32], strides = [1, 1]} : vector<2x96xf32> to vector<2x32xf32>
    %537 = vector.broadcast %340 : vector<1x32xf32> to vector<2x32xf32>
    %538 = arith.addf %536, %537 : vector<2x32xf32>
    %539 = arith.mulf %533, %538 : vector<2x32xf32>
    %540 = arith.addf %535, %539 : vector<2x32xf32>
    %541 = math.tanh %540 : vector<2x32xf32>
    %cst_140 = arith.constant 1.000000e+00 : f32
    %542 = vector.broadcast %cst_140 : f32 to vector<2x32xf32>
    %543 = arith.subf %542, %534 : vector<2x32xf32>
    %544 = arith.mulf %543, %541 : vector<2x32xf32>
    %545 = arith.mulf %534, %516 : vector<2x32xf32>
    %546 = arith.addf %544, %545 : vector<2x32xf32>
    %547 = arith.index_cast %c6_i32_135 : i32 to index
    %c0_141 = arith.constant 0 : index
    %c0_142 = arith.constant 0 : index
    %548 = vector.load %arg14[%547, %c0_141, %c0_142] : memref<8x2x32xf32, #tpu.memory_space<vmem>>, vector<1x2x32xf32>
    %549 = vector.shape_cast %548 : vector<1x2x32xf32> to vector<2x32xf32>
    %550 = vector.shape_cast %546 : vector<2x32xf32> to vector<1x2x32xf32>
    tpu.vector_store %arg14[%547, %c0_141, %c0_142], %550 {strides = array<i32>} : memref<8x2x32xf32, #tpu.memory_space<vmem>>, vector<1x2x32xf32>,
    %c7_i32_143 = arith.constant 7 : i32
    %551 = arith.index_cast %c7_i32_143 : i32 to index
    %c0_144 = arith.constant 0 : index
    %c0_145 = arith.constant 0 : index
    %552 = vector.load %arg5[%551, %c0_144, %c0_145] : memref<8x2x96xf32, #tpu.memory_space<vmem>>, vector<1x2x96xf32>
    %553 = vector.shape_cast %552 : vector<1x2x96xf32> to vector<2x96xf32>
    %cst_146 = arith.constant dense<0.000000e+00> : vector<2x96xf32>
    %554 = tpu.matmul %546, %339, %cst_146 {dimension_numbers = #tpu.dot_dimension_numbers<[1], [0], [0], [1], [0, 0, 1, 1], [], []>} : vector<2x32xf32>, vector<32x96xf32>, vector<2x96xf32> -> vector<2x96xf32>
    %555 = vector.extract_strided_slice %553 {offsets = [0, 0], sizes = [2, 64], strides = [1, 1]} : vector<2x96xf32> to vector<2x64xf32>
    %556 = vector.extract_strided_slice %554 {offsets = [0, 0], sizes = [2, 64], strides = [1, 1]} : vector<2x96xf32> to vector<2x64xf32>
    %557 = arith.addf %555, %556 : vector<2x64xf32>
    %558 = arith.negf %557 : vector<2x64xf32>
    %559 = math.exp %558 : vector<2x64xf32>
    %cst_147 = arith.constant 1.000000e+00 : f32
    %560 = vector.broadcast %cst_147 : f32 to vector<2x64xf32>
    %561 = arith.addf %560, %559 : vector<2x64xf32>
    %562 = arith.divf %560, %561 : vector<2x64xf32>
    %563 = vector.extract_strided_slice %562 {offsets = [0, 0], sizes = [2, 32], strides = [1, 1]} : vector<2x64xf32> to vector<2x32xf32>
    %564 = vector.extract_strided_slice %562 {offsets = [0, 32], sizes = [2, 32], strides = [1, 1]} : vector<2x64xf32> to vector<2x32xf32>
    %565 = vector.extract_strided_slice %553 {offsets = [0, 64], sizes = [2, 32], strides = [1, 1]} : vector<2x96xf32> to vector<2x32xf32>
    %566 = vector.extract_strided_slice %554 {offsets = [0, 64], sizes = [2, 32], strides = [1, 1]} : vector<2x96xf32> to vector<2x32xf32>
    %567 = vector.broadcast %340 : vector<1x32xf32> to vector<2x32xf32>
    %568 = arith.addf %566, %567 : vector<2x32xf32>
    %569 = arith.mulf %563, %568 : vector<2x32xf32>
    %570 = arith.addf %565, %569 : vector<2x32xf32>
    %571 = math.tanh %570 : vector<2x32xf32>
    %cst_148 = arith.constant 1.000000e+00 : f32
    %572 = vector.broadcast %cst_148 : f32 to vector<2x32xf32>
    %573 = arith.subf %572, %564 : vector<2x32xf32>
    %574 = arith.mulf %573, %571 : vector<2x32xf32>
    %575 = arith.mulf %564, %546 : vector<2x32xf32>
    %576 = arith.addf %574, %575 : vector<2x32xf32>
    %577 = arith.index_cast %c7_i32_143 : i32 to index
    %c0_149 = arith.constant 0 : index
    %c0_150 = arith.constant 0 : index
    %578 = vector.load %arg14[%577, %c0_149, %c0_150] : memref<8x2x32xf32, #tpu.memory_space<vmem>>, vector<1x2x32xf32>
    %579 = vector.shape_cast %578 : vector<1x2x32xf32> to vector<2x32xf32>
    %580 = vector.shape_cast %576 : vector<2x32xf32> to vector<1x2x32xf32>
    tpu.vector_store %arg14[%577, %c0_149, %c0_150], %580 {strides = array<i32>} : memref<8x2x32xf32, #tpu.memory_space<vmem>>, vector<1x2x32xf32>,
    %c8_i32_151 = arith.constant 8 : i32
    %c0_152 = arith.constant 0 : index
    %c0_153 = arith.constant 0 : index
    %c0_154 = arith.constant 0 : index
    %581 = vector.load %arg13[%c0_152, %c0_153, %c0_154] : memref<8x2x32xf32, #tpu.memory_space<vmem>>, vector<8x2x32xf32>
    %c0_155 = arith.constant 0 : index
    %c0_156 = arith.constant 0 : index
    %c0_157 = arith.constant 0 : index
    %582 = vector.load %arg14[%c0_155, %c0_156, %c0_157] : memref<8x2x32xf32, #tpu.memory_space<vmem>>, vector<8x2x32xf32>
    %c0_158 = arith.constant 0 : index
    %c0_159 = arith.constant 0 : index
    %583 = vector.load %arg8[%c0_158, %c0_159] : memref<2x8xf32, #tpu.memory_space<vmem>>, vector<2x8xf32>
    "tpu.trace_start"() <{level = 10 : i32, message = "tbh,sbh->bts"}> : () -> ()
    %cst_160 = arith.constant dense<0.000000e+00> : vector<2x8x8xf32>
    %584 = tpu.matmul %582, %581, %cst_160 {dimension_numbers = #tpu.dot_dimension_numbers<[2], [2], [0], [0], [0, 1, 0, 0, 1, 0], [1], [1]>} : vector<8x2x32xf32>, vector<8x2x32xf32>, vector<2x8x8xf32> -> vector<2x8x8xf32>
    "tpu.trace_stop"() : () -> ()
    %585 = vector.shape_cast %583 : vector<2x8xf32> to vector<2x1x8xf32>
    %586 = vector.broadcast %585 : vector<2x1x8xf32> to vector<2x8x8xf32>
    %587 = arith.addf %584, %586 : vector<2x8x8xf32>
    %cst_161 = arith.constant dense<0xFF800000> : vector<2x8xf32>
    %588 = vector.multi_reduction <maximumf>, %587, %cst_161 [2] : vector<2x8x8xf32> to vector<2x8xf32>
    %589 = vector.shape_cast %588 : vector<2x8xf32> to vector<2x8x1xf32>
    %590 = vector.broadcast %589 : vector<2x8x1xf32> to vector<2x8x8xf32>
    %591 = arith.subf %587, %590 : vector<2x8x8xf32>
    %592 = math.exp %591 : vector<2x8x8xf32>
    %cst_162 = arith.constant dense<0.000000e+00> : vector<2x8xf32>
    %593 = vector.multi_reduction <add>, %592, %cst_162 [2] : vector<2x8x8xf32> to vector<2x8xf32>
    %594 = vector.shape_cast %593 : vector<2x8xf32> to vector<2x8x1xf32>
    %595 = vector.broadcast %594 : vector<2x8x1xf32> to vector<2x8x8xf32>
    %596 = arith.divf %592, %595 : vector<2x8x8xf32>
    "tpu.trace_start"() <{level = 10 : i32, message = "bts,sbh->bth"}> : () -> ()
    %cst_163 = arith.constant dense<0.000000e+00> : vector<2x8x32xf32>
    %597 = tpu.matmul %596, %581, %cst_163 {dimension_numbers = #tpu.dot_dimension_numbers<[2], [0], [1], [2], [0, 0, 0, 1, 1, 2], [0], [1]>} : vector<2x8x8xf32>, vector<8x2x32xf32>, vector<2x8x32xf32> -> vector<2x8x32xf32>
    "tpu.trace_stop"() : () -> ()
    %c0_164 = arith.constant 0 : index
    %c0_165 = arith.constant 0 : index
    %598 = vector.load %arg10[%c0_164, %c0_165] : memref<32x32xf32, #tpu.memory_space<vmem>>, vector<32x32xf32>
    %599 = vector.shape_cast %598 : vector<32x32xf32> to vector<1x32x32xf32>
    %600 = vector.broadcast %599 : vector<1x32x32xf32> to vector<2x32x32xf32>
    "tpu.trace_start"() <{level = 10 : i32, message = "tbh,bhk->btk"}> : () -> ()
    %cst_166 = arith.constant dense<0.000000e+00> : vector<2x8x32xf32>
    %601 = tpu.matmul %582, %600, %cst_166 {dimension_numbers = #tpu.dot_dimension_numbers<[2], [1], [0], [2], [0, 1, 0, 0, 1, 2], [1], [0]>} : vector<8x2x32xf32>, vector<2x32x32xf32>, vector<2x8x32xf32> -> vector<2x8x32xf32>
    "tpu.trace_stop"() : () -> ()
    %602 = vector.shape_cast %597 : vector<2x8x32xf32> to vector<16x32xf32>
    %c0_167 = arith.constant 0 : index
    %c0_168 = arith.constant 0 : index
    %603 = vector.load %arg9[%c0_167, %c0_168] : memref<32x32xf32, #tpu.memory_space<vmem>>, vector<32x32xf32>
    %cst_169 = arith.constant dense<0.000000e+00> : vector<16x32xf32>
    %604 = tpu.matmul %602, %603, %cst_169 {dimension_numbers = #tpu.dot_dimension_numbers<[1], [0], [0], [1], [0, 0, 1, 1], [], []>} : vector<16x32xf32>, vector<32x32xf32>, vector<16x32xf32> -> vector<16x32xf32>
    %605 = vector.shape_cast %601 : vector<2x8x32xf32> to vector<16x32xf32>
    %606 = arith.addf %604, %605 : vector<16x32xf32>
    %607 = math.tanh %606 : vector<16x32xf32>
    %c0_170 = arith.constant 0 : index
    %c0_171 = arith.constant 0 : index
    %608 = vector.load %arg11[%c0_170, %c0_171] : memref<16x32xf32, #tpu.memory_space<vmem>>, vector<16x32xf32>
    tpu.vector_store %arg11[%c0_170, %c0_171], %607 {strides = array<i32>} : memref<16x32xf32, #tpu.memory_space<vmem>>, vector<16x32xf32>,
    %609 = vector.shape_cast %596 : vector<2x8x8xf32> to vector<16x8xf32>
    %c0_172 = arith.constant 0 : index
    %c0_173 = arith.constant 0 : index
    %610 = vector.load %arg12[%c0_172, %c0_173] : memref<16x8xf32, #tpu.memory_space<vmem>>, vector<16x8xf32>
    tpu.vector_store %arg12[%c0_172, %c0_173], %609 {strides = array<i32>} : memref<16x8xf32, #tpu.memory_space<vmem>>, vector<16x8xf32>,
    return
  }
  func.func @transform_0(%arg0: i32) -> (i32, i32, i32) {
    %c0_i32 = arith.constant 0 : i32
    %c0_i32_0 = arith.constant 0 : i32
    %c0_i32_1 = arith.constant 0 : i32
    %c0_i32_2 = arith.constant 0 : i32
    return %c0_i32, %c0_i32_0, %c0_i32_1 : i32, i32, i32
  }
  func.func @transform_1(%arg0: i32) -> (i32, i32) {
    %c0_i32 = arith.constant 0 : i32
    %c0_i32_0 = arith.constant 0 : i32
    %c0_i32_1 = arith.constant 0 : i32
    return %c0_i32, %c0_i32_0 : i32, i32
  }
  func.func @transform_2(%arg0: i32) -> (i32, i32) {
    %c0_i32 = arith.constant 0 : i32
    %c0_i32_0 = arith.constant 0 : i32
    %c0_i32_1 = arith.constant 0 : i32
    return %c0_i32, %c0_i32_0 : i32, i32
  }
  func.func @transform_3(%arg0: i32) -> (i32, i32, i32) {
    %c0_i32 = arith.constant 0 : i32
    %c0_i32_0 = arith.constant 0 : i32
    %c0_i32_1 = arith.constant 0 : i32
    %c0_i32_2 = arith.constant 0 : i32
    return %c0_i32, %c0_i32_0, %c0_i32_1 : i32, i32, i32
  }
  func.func @transform_4(%arg0: i32) -> (i32, i32, i32) {
    %c0_i32 = arith.constant 0 : i32
    %c0_i32_0 = arith.constant 0 : i32
    %c0_i32_1 = arith.constant 0 : i32
    %c0_i32_2 = arith.constant 0 : i32
    return %c0_i32, %c0_i32_0, %c0_i32_1 : i32, i32, i32
  }
  func.func @transform_5(%arg0: i32) -> (i32, i32) {
    %c0_i32 = arith.constant 0 : i32
    %c0_i32_0 = arith.constant 0 : i32
    %c0_i32_1 = arith.constant 0 : i32
    return %c0_i32, %c0_i32_0 : i32, i32
  }
  func.func @transform_6(%arg0: i32) -> (i32, i32) {
    %c0_i32 = arith.constant 0 : i32
    %c0_i32_0 = arith.constant 0 : i32
    %c0_i32_1 = arith.constant 0 : i32
    return %c0_i32, %c0_i32_0 : i32, i32
  }
  func.func @transform_7(%arg0: i32) -> (i32, i32) {
    %c0_i32 = arith.constant 0 : i32
    %c0_i32_0 = arith.constant 0 : i32
    %c0_i32_1 = arith.constant 0 : i32
    return %c0_i32, %c0_i32_0 : i32, i32
  }
  func.func @transform_8(%arg0: i32) -> (i32, i32) {
    %c0_i32 = arith.constant 0 : i32
    %c0_i32_0 = arith.constant 0 : i32
    %c0_i32_1 = arith.constant 0 : i32
    return %c0_i32, %c0_i32_0 : i32, i32
  }
  func.func @transform_9(%arg0: i32) -> (i32, i32) {
    %c0_i32 = arith.constant 0 : i32
    %c0_i32_0 = arith.constant 0 : i32
    %c0_i32_1 = arith.constant 0 : i32
    return %c0_i32, %c0_i32_0 : i32, i32
  }
  func.func @transform_10(%arg0: i32) -> (i32, i32) {
    %c0_i32 = arith.constant 0 : i32
    %c0_i32_0 = arith.constant 0 : i32
    %c0_i32_1 = arith.constant 0 : i32
    return %c0_i32, %c0_i32_0 : i32, i32
  }
  func.func @transform_11(%arg0: i32) -> (i32, i32) {
    %c0_i32 = arith.constant 0 : i32
    %c0_i32_0 = arith.constant 0 : i32
    %c0_i32_1 = arith.constant 0 : i32
    return %c0_i32, %c0_i32_0 : i32, i32
  }
}

</mosaic_0001>

<bundles_post_ra>
// kernel: nmt_forward.1
= control target key start
LH: loop header
LB: loop body
LE: loop exit
PB: predicated region body
PF: predicated region fallthrough
CT: control target
= control target key end

     0   :  { %v5329_v0 = vmov 0.0|0.0   ;;  %vm5330_vm0 = vmmov 0   ;;  %v5331_v4 = vmov 0.0   ;;  %s5332_s27 = smov 64   ;;  %v5333_v9 = vmov 0   ;;  %s5334_s30 = smov 96   ;;  %s6234_s1 = inlined_call_operand.vmem [shape: f32[32,96], index: 1, kind: input, shape index: {}]   ;;  %s6235_s2 = inlined_call_operand.vmem [shape: f32[1,32], index: 2, kind: input, shape index: {}]   ;;  %s6236_s3 = inlined_call_operand.vmem [shape: f32[8,2,1], index: 3, kind: input, shape index: {}]   ;;  %s6237_s0 = inlined_call_operand.vmem [shape: f32[8,2,96], index: 0, kind: input, shape index: {}]   ;;  %s6238_s5 = inlined_call_operand.vmem [shape: f32[32,96], index: 5, kind: input, shape index: {}]   ;;  %s6239_s6 = inlined_call_operand.vmem [shape: f32[1,32], index: 6, kind: input, shape index: {}]   ;;  %s6240_s4 = inlined_call_operand.vmem [shape: f32[8,2,96], index: 4, kind: input, shape index: {}]   ;;  %s6241_s9 = inlined_call_operand.vmem [shape: f32[32,32], index: 9, kind: input, shape index: {}]   ;;  %s6242_s7 = inlined_call_operand.vmem [shape: f32[2,8], index: 7, kind: input, shape index: {}]   ;;  %s6243_s8 = inlined_call_operand.vmem [shape: f32[32,32], index: 8, kind: input, shape index: {}]   ;;  %s6244_s11 = inlined_call_operand.vmem [shape: f32[16,8], index: 11, kind: output, shape index: {1}]   ;;  %s6245_s10 = inlined_call_operand.vmem [shape: f32[16,32], index: 10, kind: output, shape index: {0}]  }
   0x1   :  { %5071 = vmatprep.subr.bf16.mxu0 %v5329_v0  ;;  %v37_v1 = vld [vmem:[%s6234_s1] sm:$0xff]  ;;  %v38_v2 = vld [vmem:[%s6234_s1 + $0x8] sm:$0xff]  ;;  %v39_v3 = vld [vmem:[%s6234_s1 + $0x10] sm:$0xff]  ;;  %4838 = vmatprep.mubr.msk.f32.mxu0 %vm5330_vm0, %v5331_v4  ;;  %vm43_vm1 = vcmask 261120   ;;  %vm163_vm2 = vcmask 254976   ;;  %vm4195_vm3 = vcmask 64512  }
   0x2   :  { %v5410_v5 = vpack.c.bf16 %v38_v2, %v37_v1  ;;  %v40_v6 = vld [vmem:[%s6234_s1 + $0x18] sm:$0xff]  ;;  %v4658_v7 = vld [vmem:[%s6235_s2] ss:$0 sm:$0xff]  ;;  %5077 = vmatprep.subr.bf16.mxu1 %v5329_v0  ;;  %4849 = vmatprep.mubr.msk.f32.mxu1 %vm5330_vm0, %v5331_v4  ;;  %v4662_v41 = vld [vmem:[%s6236_s3 + $0x2] sm:$0x3] }
   0x3   :  { %129 = vrot.lane.b32.xlu0 %v4658_v7, %s5332_s27  ;;  %v5423_v8 = vpack.c.bf16 %v40_v6, %v39_v3  ;;  %5208 = vset.pattern.permute.xlu1 %v5333_v9  ;;  %v152_v14 = vld [vmem:[%s6236_s3] sm:$0x3]  ;;  %v4659_v42 = vld [vmem:[%s6237_s0 + $0x2] sm:$0x3]  ;;  %v291_v50 = vsub.f32 1.0, %v4662_v41 }
   0x4   :  { %5073 = vmatpush3.bf16.msra.mxu0 %v5410_v5  ;;  %5079 = vmatpush3.bf16.msra.mxu1 %v5410_v5  ;;  %v165_v15 = vsub.f32 1.0, %v152_v14  ;;  %v42_v16 = vld [vmem:[%s6237_s0] sm:$0x3]  ;;  %v4666_v7 = vld [vmem:[%s6236_s3 + $0x4] sm:$0x3] }
   0x5   :  { %5074 = vmatprep.subr.bf16.mxu0 %v5329_v0  ;;  %5080 = vmatprep.subr.bf16.mxu1 %v5329_v0 }
   0x6   :  { %5209 = vset.pattern.permute.xlu0 %v5333_v9  ;;  %v4663_v9 = vld [vmem:[%s6237_s0 + $0x4] sm:$0x3] }
   0x8   :  { %5076 = vmatpush3.bf16.msra.mxu0 %v5423_v8  ;;  %5082 = vmatpush3.bf16.msra.mxu1 %v5423_v8 }
   0x9   :  { %5083 = vmatprep.subr.bf16.mxu0 %v5329_v0  ;;  %5089 = vmatprep.subr.bf16.mxu1 %v5329_v0 }
   0xb   :  { %4839 = vmatmul.mubr.f32.vlgmr.msra.gmra.mrb[0].mxu0 %v5331_v4 }
   0xc   :  { %5085 = vmatpush3.bf16.msra.mxu0 %v5410_v5  ;;  %4860 = vmatprep.mubr.msk.f32.mxu0 %vm5330_vm0, %v5331_v4 }
   0xd   :  { %5086 = vmatprep.subr.bf16.mxu0 %v5329_v0 }
  0x10   :  { %5088 = vmatpush3.bf16.msra.mxu0 %v5423_v8 }
  0x11   :  { %5095 = vmatprep.subr.bf16.mxu0 %v5329_v0 }
  0x75   :  { %v5439_v10 = vpop.permute.xlu0 %129 }
  0xde   :  { %v113_v11 = vpop.f32.mrb[0].mxu0 }
  0xdf   :  { %v132_v12 = vadd.f32 %v5439_v10, %v113_v11  ;;  %v4840_v13 = vpop.f32.mrb[1].mxu0  ;;  %v117_v17 = vadd.f32 %v113_v11, %v42_v16 }
  0xe1   :  { %134 = vrot.lane.b32.xlu0 %v132_v12, %s5332_s27  ;;  %v4657_v18 = vmul.f32 -1.442695, %v117_v17 }
  0xe3   :  { %5217 = vpow2.f32 %v4657_v18  ;;  %v417_v18 = vsub.f32 1.0, %v4666_v7 }
  0xe5   :  { %168 = vperm.xlu0 %5209, %v165_v15  }
  0xed   :  { %v5218_v19 = vpop.eup %5217 }
  0xee   :  { %v121_v20 = vadd.f32 1.0, %v5218_v19 }
  0xf0   :  { %5219 = vrcp.f32 %v121_v20 }
  0xfa   :  { %v5220_v21 = vpop.eup %5219 }
  0xfb   :  { %v144_v28 = vsub.f32 1.0, %v5220_v21  ;;  %v150_v31 = vmul.f32 0.0, %v5220_v21 }
 0x153   :  { %v135_v22 = vpop.permute.xlu0 %134 }
 0x154   :  { %v137_v23 = vmul.f32 %v5220_v21, %v135_v22 }
 0x156   :  { %139 = vrot.lane.b32.xlu1 %v137_v23, %s5332_s27 }
 0x15a   :  { %155 = vperm.xlu1 %5208, %v152_v14  }
 0x164   :  { %v169_v30 = vpop.permute.xlu0 %168 }
 0x165   :  { %v171_v34 = vmul.f32 0.0, %v169_v30 }
 0x1c8   :  { %v140_v24 = vpop.permute.xlu1 %139 }
 0x1c9   :  { %v142_v25 = vadd.f32 %v140_v24, %v42_v16 }
 0x1cb   :  { %5221 = vtanh.f32 %v142_v25 }
 0x1d5   :  { %v5222_v26 = vpop.eup %5221 }
 0x1d6   :  { %146 = vrot.lane.b32.xlu1 %v5222_v26, %s5334_s30 }
 0x1d9   :  { %v156_v27 = vpop.permute.xlu1 %155 }
 0x248   :  { %v147_v29 = vpop.permute.xlu1 %146 }
 0x249   :  { %v149_v32 = vmul.f32 %v147_v29, %v144_v28 }
 0x24b   :  { %v151_v33 = vadd.f32 %v150_v31, %v149_v32 }
 0x24d   :  { %v5451_v35 = vmul.f32 %v156_v27, %v151_v33 }
 0x24f   :  { %v172_v36 = vadd.f32 %v171_v34, %v5451_v35 }
 0x251   :  { %176 = vrot.lane.b32.xlu1 %v172_v36, %s5334_s30 }
 0x2c3   :  { %v177_v37 = vpop.permute.xlu1 %176 }
 0x2c4   :  { %4850 = vmatmul.mubr.msk.f32.vlgmr.msra.gmra.mrb[0].mxu1 %vm43_vm1, %v177_v37  ;;  %v4670_v37 = vld [vmem:[%s6236_s3 + $0x6] sm:$0x3] }
 0x2c5   :  { %5091 = vmatpush3.bf16.msra.mxu1 %v5410_v5  ;;  %4871 = vmatprep.mubr.msk.f32.mxu1 %vm5330_vm0, %v5331_v4 }
 0x2c6   :  { %5092 = vmatprep.subr.bf16.mxu1 %v5329_v0 }
 0x2c9   :  { %5094 = vmatpush3.bf16.msra.mxu1 %v5423_v8 }
 0x2ca   :  { %5101 = vmatprep.subr.bf16.mxu1 %v5329_v0 }
 0x397   :  { %v246_v38 = vpop.f32.mrb[0].mxu1 }
 0x398   :  { %v257_v39 = vadd.f32 %v246_v38, %v5439_v10  ;;  %v4851_v40 = vpop.f32.mrb[1].mxu1  ;;  %v250_v43 = vadd.f32 %v4659_v42, %v246_v38  ;;  %v4667_v38 = vld [vmem:[%s6237_s0 + $0x6] sm:$0x3] }
 0x39a   :  { %259 = vrot.lane.b32.xlu0 %v257_v39, %s5332_s27  ;;  %v4661_v44 = vmul.f32 -1.442695, %v250_v43 }
 0x39c   :  { %5223 = vpow2.f32 %v4661_v44 }
 0x39e   :  { %281 = vperm.xlu0 %5209, %v4662_v41  }
 0x3a6   :  { %v5224_v45 = vpop.eup %5223 }
 0x3a7   :  { %v254_v46 = vadd.f32 1.0, %v5224_v45 }
 0x3a9   :  { %5225 = vrcp.f32 %v254_v46  ;;  %v543_v46 = vsub.f32 1.0, %v4670_v37 }
 0x3b3   :  { %v5226_v47 = vpop.eup %5225 }
 0x3b4   :  { %v269_v55 = vsub.f32 1.0, %v5226_v47  ;;  %v275_v57 = vmul.f32 %v5226_v47, %v172_v36 }
 0x40c   :  { %v260_v48 = vpop.permute.xlu0 %259 }
 0x40d   :  { %v262_v49 = vmul.f32 %v5226_v47, %v260_v48 }
 0x40f   :  { %264 = vrot.lane.b32.xlu1 %v262_v49, %s5332_s27 }
 0x413   :  { %294 = vperm.xlu1 %5208, %v291_v50  }
 0x41d   :  { %v282_v54 = vpop.permute.xlu0 %281 }
 0x481   :  { %v265_v51 = vpop.permute.xlu1 %264 }
 0x482   :  { %v267_v52 = vadd.f32 %v4659_v42, %v265_v51 }
 0x484   :  { %5227 = vtanh.f32 %v267_v52 }
 0x48e   :  { %v5228_v53 = vpop.eup %5227 }
 0x48f   :  { %271 = vrot.lane.b32.xlu0 %v5228_v53, %s5334_s30 }
 0x492   :  { %v295_v59 = vpop.permute.xlu1 %294 }
 0x493   :  { %v297_v61 = vmul.f32 %v295_v59, %v172_v36 }
 0x501   :  { %v272_v56 = vpop.permute.xlu0 %271 }
 0x502   :  { %v274_v58 = vmul.f32 %v272_v56, %v269_v55 }
 0x504   :  { %v276_v60 = vadd.f32 %v275_v57, %v274_v58 }
 0x506   :  { %v5472_v62 = vmul.f32 %v282_v54, %v276_v60 }
 0x508   :  { %v298_v63 = vadd.f32 %v297_v61, %v5472_v62 }
 0x50a   :  { %302 = vrot.lane.b32.xlu1 %v298_v63, %s5334_s30 }
 0x57c   :  { %v303_v1 = vpop.permute.xlu1 %302 }
 0x57d   :  { %4861 = vmatmul.mubr.msk.f32.vlgmr.msra.gmra.mrb[2].mxu0 %vm43_vm1, %v303_v1 }
 0x57e   :  { %5097 = vmatpush3.bf16.msra.mxu0 %v5410_v5  ;;  %4882 = vmatprep.mubr.msk.f32.mxu0 %vm5330_vm0, %v5331_v4 }
 0x57f   :  { %5098 = vmatprep.subr.bf16.mxu0 %v5329_v0 }
 0x582   :  { %5100 = vmatpush3.bf16.msra.mxu0 %v5423_v8 }
 0x583   :  { %5107 = vmatprep.subr.bf16.mxu0 %v5329_v0 }
 0x650   :  { %v372_v2 = vpop.f32.mrb[2].mxu0 }
 0x651   :  { %v383_v3 = vadd.f32 %v372_v2, %v5439_v10  ;;  %v4862_v6 = vpop.f32.mrb[3].mxu0  ;;  %v376_v11 = vadd.f32 %v4663_v9, %v372_v2  ;;  %v4674_v2 = vld [vmem:[%s6236_s3 + $0x8] sm:$0x3] }
 0x653   :  { %385 = vrot.lane.b32.xlu0 %v383_v3, %s5332_s27  ;;  %v4665_v12 = vmul.f32 -1.442695, %v376_v11  ;;  %v4671_v3 = vld [vmem:[%s6237_s0 + $0x8] sm:$0x3] }
 0x655   :  { %5229 = vpow2.f32 %v4665_v12 }
 0x657   :  { %407 = vperm.xlu0 %5209, %v4666_v7  }
 0x65f   :  { %v5230_v13 = vpop.eup %5229 }
 0x660   :  { %v380_v14 = vadd.f32 1.0, %v5230_v13 }
 0x662   :  { %5231 = vrcp.f32 %v380_v14 }
 0x66c   :  { %v5232_v15 = vpop.eup %5231 }
 0x66d   :  { %v395_v23 = vsub.f32 1.0, %v5232_v15  ;;  %v401_v25 = vmul.f32 %v5232_v15, %v298_v63 }
 0x6c5   :  { %v386_v16 = vpop.permute.xlu0 %385 }
 0x6c6   :  { %v388_v17 = vmul.f32 %v5232_v15, %v386_v16  ;;  %v669_v15 = vsub.f32 1.0, %v4674_v2 }
 0x6c8   :  { %390 = vrot.lane.b32.xlu1 %v388_v17, %s5332_s27 }
 0x6cc   :  { %420 = vperm.xlu1 %5208, %v417_v18  }
 0x6d6   :  { %v408_v22 = vpop.permute.xlu0 %407 }
 0x73a   :  { %v391_v19 = vpop.permute.xlu1 %390 }
 0x73b   :  { %v393_v20 = vadd.f32 %v4663_v9, %v391_v19 }
 0x73d   :  { %5233 = vtanh.f32 %v393_v20 }
 0x747   :  { %v5234_v21 = vpop.eup %5233 }
 0x748   :  { %397 = vrot.lane.b32.xlu0 %v5234_v21, %s5334_s30 }
 0x74b   :  { %v421_v27 = vpop.permute.xlu1 %420 }
 0x74c   :  { %v423_v29 = vmul.f32 %v421_v27, %v298_v63 }
 0x7ba   :  { %v398_v24 = vpop.permute.xlu0 %397 }
 0x7bb   :  { %v400_v26 = vmul.f32 %v398_v24, %v395_v23 }
 0x7bd   :  { %v402_v28 = vadd.f32 %v401_v25, %v400_v26 }
 0x7bf   :  { %v5493_v30 = vmul.f32 %v408_v22, %v402_v28 }
 0x7c1   :  { %v424_v31 = vadd.f32 %v423_v29, %v5493_v30 }
 0x7c3   :  { %428 = vrot.lane.b32.xlu1 %v424_v31, %s5334_s30 }
 0x835   :  { %v429_v32 = vpop.permute.xlu1 %428 }
 0x836   :  { %4872 = vmatmul.mubr.msk.f32.vlgmr.msra.gmra.mrb[2].mxu1 %vm43_vm1, %v429_v32 }
 0x837   :  { %5103 = vmatpush3.bf16.msra.mxu1 %v5410_v5  ;;  %4893 = vmatprep.mubr.msk.f32.mxu1 %vm5330_vm0, %v5331_v4 }
 0x838   :  { %5104 = vmatprep.subr.bf16.mxu1 %v5329_v0 }
 0x83b   :  { %5106 = vmatpush3.bf16.msra.mxu1 %v5423_v8 }
 0x83c   :  { %5113 = vmatprep.subr.bf16.mxu1 %v5329_v0 }
 0x909   :  { %v498_v33 = vpop.f32.mrb[2].mxu1 }
 0x90a   :  { %v509_v34 = vadd.f32 %v498_v33, %v5439_v10  ;;  %v4873_v36 = vpop.f32.mrb[3].mxu1  ;;  %v502_v39 = vadd.f32 %v4667_v38, %v498_v33 }
 0x90c   :  { %511 = vrot.lane.b32.xlu0 %v509_v34, %s5332_s27  ;;  %v4669_v40 = vmul.f32 -1.442695, %v502_v39  ;;  %v4678_v34 = vld [vmem:[%s6236_s3 + $0xa] sm:$0x3] }
 0x90e   :  { %5235 = vpow2.f32 %v4669_v40 }
 0x910   :  { %533 = vperm.xlu0 %5209, %v4670_v37  }
 0x918   :  { %v5236_v41 = vpop.eup %5235 }
 0x919   :  { %v506_v42 = vadd.f32 1.0, %v5236_v41 }
 0x91b   :  { %5237 = vrcp.f32 %v506_v42  ;;  %v795_v42 = vsub.f32 1.0, %v4678_v34 }
 0x925   :  { %v5238_v43 = vpop.eup %5237 }
 0x926   :  { %v521_v51 = vsub.f32 1.0, %v5238_v43  ;;  %v527_v53 = vmul.f32 %v5238_v43, %v424_v31 }
 0x97e   :  { %v512_v44 = vpop.permute.xlu0 %511 }
 0x97f   :  { %v514_v45 = vmul.f32 %v5238_v43, %v512_v44 }
 0x981   :  { %516 = vrot.lane.b32.xlu1 %v514_v45, %s5332_s27 }
 0x985   :  { %546 = vperm.xlu1 %5208, %v543_v46  }
 0x98f   :  { %v534_v50 = vpop.permute.xlu0 %533 }
 0x9f3   :  { %v517_v47 = vpop.permute.xlu1 %516 }
 0x9f4   :  { %v519_v48 = vadd.f32 %v4667_v38, %v517_v47 }
 0x9f6   :  { %5239 = vtanh.f32 %v519_v48 }
 0xa00   :  { %v5240_v49 = vpop.eup %5239 }
 0xa01   :  { %523 = vrot.lane.b32.xlu0 %v5240_v49, %s5334_s30 }
 0xa04   :  { %v547_v55 = vpop.permute.xlu1 %546 }
 0xa05   :  { %v549_v57 = vmul.f32 %v547_v55, %v424_v31 }
 0xa73   :  { %v524_v52 = vpop.permute.xlu0 %523 }
 0xa74   :  { %v526_v54 = vmul.f32 %v524_v52, %v521_v51 }
 0xa76   :  { %v528_v56 = vadd.f32 %v527_v53, %v526_v54 }
 0xa78   :  { %v5514_v58 = vmul.f32 %v534_v50, %v528_v56 }
 0xa7a   :  { %v550_v59 = vadd.f32 %v549_v57, %v5514_v58 }
 0xa7c   :  { %554 = vrot.lane.b32.xlu1 %v550_v59, %s5334_s30 }
 0xaee   :  { %v555_v60 = vpop.permute.xlu1 %554 }
 0xaef   :  { %4883 = vmatmul.mubr.msk.f32.vlgmr.msra.gmra.mrb[4].mxu0 %vm43_vm1, %v555_v60 }
 0xaf0   :  { %5109 = vmatpush3.bf16.msra.mxu0 %v5410_v5  ;;  %4904 = vmatprep.mubr.msk.f32.mxu0 %vm5330_vm0, %v5331_v4 }
 0xaf1   :  { %5110 = vmatprep.subr.bf16.mxu0 %v5329_v0 }
 0xaf4   :  { %5112 = vmatpush3.bf16.msra.mxu0 %v5423_v8 }
 0xaf5   :  { %5119 = vmatprep.subr.bf16.mxu0 %v5329_v0 }
 0xbc2   :  { %v624_v61 = vpop.f32.mrb[4].mxu0 }
 0xbc3   :  { %v635_v63 = vadd.f32 %v624_v61, %v5439_v10  ;;  %v4884_v1 = vpop.f32.mrb[5].mxu0  ;;  %v628_v6 = vadd.f32 %v4671_v3, %v624_v61  ;;  %v4682_v61 = vld [vmem:[%s6236_s3 + $0xc] sm:$0x3] }
 0xbc5   :  { %637 = vrot.lane.b32.xlu0 %v635_v63, %s5332_s27  ;;  %v4673_v7 = vmul.f32 -1.442695, %v628_v6  ;;  %v4679_v63 = vld [vmem:[%s6237_s0 + $0xc] sm:$0x3] }
 0xbc7   :  { %5241 = vpow2.f32 %v4673_v7 }
 0xbc9   :  { %659 = vperm.xlu0 %5209, %v4674_v2  }
 0xbd1   :  { %v5242_v9 = vpop.eup %5241 }
 0xbd2   :  { %v632_v11 = vadd.f32 1.0, %v5242_v9 }
 0xbd4   :  { %5243 = vrcp.f32 %v632_v11 }
 0xbde   :  { %v5244_v12 = vpop.eup %5243 }
 0xbdf   :  { %v647_v20 = vsub.f32 1.0, %v5244_v12  ;;  %v653_v22 = vmul.f32 %v5244_v12, %v550_v59 }
 0xc37   :  { %v638_v13 = vpop.permute.xlu0 %637 }
 0xc38   :  { %v640_v14 = vmul.f32 %v5244_v12, %v638_v13  ;;  %v921_v12 = vsub.f32 1.0, %v4682_v61 }
 0xc3a   :  { %642 = vrot.lane.b32.xlu1 %v640_v14, %s5332_s27 }
 0xc3e   :  { %672 = vperm.xlu1 %5208, %v669_v15  }
 0xc48   :  { %v660_v19 = vpop.permute.xlu0 %659 }
 0xcac   :  { %v643_v16 = vpop.permute.xlu1 %642 }
 0xcad   :  { %v645_v17 = vadd.f32 %v4671_v3, %v643_v16 }
 0xcaf   :  { %5245 = vtanh.f32 %v645_v17 }
 0xcb9   :  { %v5246_v18 = vpop.eup %5245 }
 0xcba   :  { %649 = vrot.lane.b32.xlu0 %v5246_v18, %s5334_s30 }
 0xcbd   :  { %v673_v24 = vpop.permute.xlu1 %672 }
 0xcbe   :  { %v675_v26 = vmul.f32 %v673_v24, %v550_v59 }
 0xd2c   :  { %v650_v21 = vpop.permute.xlu0 %649 }
 0xd2d   :  { %v652_v23 = vmul.f32 %v650_v21, %v647_v20 }
 0xd2f   :  { %v654_v25 = vadd.f32 %v653_v22, %v652_v23 }
 0xd31   :  { %v5535_v27 = vmul.f32 %v660_v19, %v654_v25 }
 0xd33   :  { %v676_v28 = vadd.f32 %v675_v26, %v5535_v27 }
 0xd35   :  { %680 = vrot.lane.b32.xlu1 %v676_v28, %s5334_s30 }
 0xda7   :  { %v681_v29 = vpop.permute.xlu1 %680 }
 0xda8   :  { %4894 = vmatmul.mubr.msk.f32.vlgmr.msra.gmra.mrb[4].mxu1 %vm43_vm1, %v681_v29 }
 0xda9   :  { %5115 = vmatpush3.bf16.msra.mxu1 %v5410_v5  ;;  %4915 = vmatprep.mubr.msk.f32.mxu1 %vm5330_vm0, %v5331_v4  ;;  %v4675_v5 = vld [vmem:[%s6237_s0 + $0xa] sm:$0x3] }
 0xdaa   :  { %5116 = vmatprep.subr.bf16.mxu1 %v5329_v0 }
 0xdad   :  { %5118 = vmatpush3.bf16.msra.mxu1 %v5423_v8 }
 0xdae   :  { %5125 = vmatprep.subr.bf16.mxu1 %v5329_v0 }
 0xe7b   :  { %v750_v31 = vpop.f32.mrb[4].mxu1 }
 0xe7c   :  { %v761_v32 = vadd.f32 %v750_v31, %v5439_v10  ;;  %v4895_v33 = vpop.f32.mrb[5].mxu1  ;;  %v754_v36 = vadd.f32 %v4675_v5, %v750_v31 }
 0xe7d   :  { %v4683_v33 = vld [vmem:[%s6237_s0 + $0xe] sm:$0x3] }
 0xe7e   :  { %763 = vrot.lane.b32.xlu0 %v761_v32, %s5332_s27  ;;  %v4677_v37 = vmul.f32 -1.442695, %v754_v36  ;;  %v4686_v32 = vld [vmem:[%s6236_s3 + $0xe] sm:$0x3] }
 0xe80   :  { %5247 = vpow2.f32 %v4677_v37 }
 0xe82   :  { %785 = vperm.xlu0 %5209, %v4678_v34  }
 0xe8a   :  { %v5248_v8 = vpop.eup %5247 }
 0xe8b   :  { %v758_v38 = vadd.f32 1.0, %v5248_v8 }
 0xe8d   :  { %5249 = vrcp.f32 %v758_v38 }
 0xe97   :  { %v5250_v39 = vpop.eup %5249 }
 0xe98   :  { %v773_v47 = vsub.f32 1.0, %v5250_v39  ;;  %v779_v49 = vmul.f32 %v5250_v39, %v676_v28 }
 0xef0   :  { %v764_v40 = vpop.permute.xlu0 %763 }
 0xef1   :  { %v766_v41 = vmul.f32 %v5250_v39, %v764_v40  ;;  %v1047_v39 = vsub.f32 1.0, %v4686_v32 }
 0xef3   :  { %768 = vrot.lane.b32.xlu1 %v766_v41, %s5332_s27 }
 0xef7   :  { %798 = vperm.xlu1 %5208, %v795_v42   ;;  %v1055_v42 = vld [vmem:[%s6238_s5] sm:$0xff] }
 0xf01   :  { %v786_v46 = vpop.permute.xlu0 %785 }
 0xf65   :  { %v769_v43 = vpop.permute.xlu1 %768 }
 0xf66   :  { %v771_v44 = vadd.f32 %v4675_v5, %v769_v43  ;;  %v1056_v43 = vld [vmem:[%s6238_s5 + $0x8] sm:$0xff] }
 0xf68   :  { %5251 = vtanh.f32 %v771_v44  ;;  %v1057_v44 = vld [vmem:[%s6238_s5 + $0x10] sm:$0xff] }
 0xf72   :  { %v5252_v45 = vpop.eup %5251 }
 0xf73   :  { %775 = vrot.lane.b32.xlu0 %v5252_v45, %s5334_s30  ;;  %v5598_v45 = vpack.c.bf16 %v1056_v43, %v1055_v42 }
 0xf76   :  { %v799_v51 = vpop.permute.xlu1 %798 }
 0xf77   :  { %v801_v53 = vmul.f32 %v799_v51, %v676_v28 }
 0xfe5   :  { %v776_v48 = vpop.permute.xlu0 %775 }
 0xfe6   :  { %v778_v50 = vmul.f32 %v776_v48, %v773_v47 }
 0xfe8   :  { %v780_v52 = vadd.f32 %v779_v49, %v778_v50  ;;  %v4689_v50 = vld [vmem:[%s6239_s6] ss:$0 sm:$0xff] }
 0xfea   :  { %v5556_v54 = vmul.f32 %v786_v46, %v780_v52  ;;  %v1058_v46 = vld [vmem:[%s6238_s5 + $0x18] sm:$0xff] }
 0xfeb   :  { %v5604_v48 = vpack.c.bf16 %v1058_v46, %v1057_v44 }
 0xfec   :  { %v802_v55 = vadd.f32 %v801_v53, %v5556_v54 }
 0xfee   :  { %806 = vrot.lane.b32.xlu1 %v802_v55, %s5334_s30 }
0x1060   :  { %v807_v56 = vpop.permute.xlu1 %806 }
0x1061   :  { %4905 = vmatmul.mubr.msk.f32.vlgmr.msra.gmra.mrb[6].mxu0 %vm43_vm1, %v807_v56 }
0x1062   :  { %4926 = vmatprep.mubr.msk.f32.mxu0 %vm5330_vm0, %v5331_v4  ;;  %5121 = vmatpush3.bf16.msra.mxu0 %v5598_v45 }
0x1063   :  { %5122 = vmatprep.subr.bf16.mxu0 %v5329_v0 }
0x1066   :  { %5124 = vmatpush3.bf16.msra.mxu0 %v5604_v48 }
0x1067   :  { %5131 = vmatprep.subr.bf16.mxu0 %v5329_v0 }
0x1134   :  { %v876_v57 = vpop.f32.mrb[6].mxu0 }
0x1135   :  { %v887_v59 = vadd.f32 %v876_v57, %v5439_v10  ;;  %v4906_v60 = vpop.f32.mrb[7].mxu0  ;;  %v880_v1 = vadd.f32 %v4679_v63, %v876_v57 }
0x1137   :  { %889 = vrot.lane.b32.xlu0 %v887_v59, %s5332_s27  ;;  %v4681_v2 = vmul.f32 -1.442695, %v880_v1 }
0x1139   :  { %5253 = vpow2.f32 %v4681_v2 }
0x113b   :  { %911 = vperm.xlu0 %5209, %v4682_v61  }
0x1143   :  { %v5254_v3 = vpop.eup %5253 }
0x1144   :  { %v884_v6 = vadd.f32 1.0, %v5254_v3 }
0x1146   :  { %5255 = vrcp.f32 %v884_v6 }
0x1150   :  { %v5256_v7 = vpop.eup %5255 }
0x1151   :  { %v899_v17 = vsub.f32 1.0, %v5256_v7  ;;  %v905_v19 = vmul.f32 %v5256_v7, %v802_v55 }
0x11a9   :  { %v890_v9 = vpop.permute.xlu0 %889 }
0x11aa   :  { %v892_v11 = vmul.f32 %v5256_v7, %v890_v9  ;;  %v1060_v7 = vld [vmem:[%s6240_s4] sm:$0x3] }
0x11ac   :  { %894 = vrot.lane.b32.xlu1 %v892_v11, %s5332_s27 }
0x11b0   :  { %924 = vperm.xlu1 %5208, %v921_v12  }
0x11ba   :  { %v912_v16 = vpop.permute.xlu0 %911 }
0x121e   :  { %v895_v13 = vpop.permute.xlu1 %894 }
0x121f   :  { %v897_v14 = vadd.f32 %v4679_v63, %v895_v13 }
0x1221   :  { %5257 = vtanh.f32 %v897_v14 }
0x122b   :  { %v5258_v15 = vpop.eup %5257 }
0x122c   :  { %901 = vrot.lane.b32.xlu0 %v5258_v15, %s5334_s30 }
0x122f   :  { %v925_v21 = vpop.permute.xlu1 %924 }
0x1230   :  { %v927_v23 = vmul.f32 %v925_v21, %v802_v55 }
0x129e   :  { %v902_v18 = vpop.permute.xlu0 %901 }
0x129f   :  { %v904_v20 = vmul.f32 %v902_v18, %v899_v17 }
0x12a1   :  { %v906_v22 = vadd.f32 %v905_v19, %v904_v20 }
0x12a3   :  { %v5573_v24 = vmul.f32 %v912_v16, %v906_v22 }
0x12a5   :  { %v928_v25 = vadd.f32 %v927_v23, %v5573_v24 }
0x12a7   :  { %932 = vrot.lane.b32.xlu1 %v928_v25, %s5334_s30 }
0x1319   :  { %v933_v26 = vpop.permute.xlu1 %932 }
0x131a   :  { %4916 = vmatmul.mubr.msk.f32.vlgmr.msra.gmra.mrb[6].mxu1 %vm43_vm1, %v933_v26 }
0x131b   :  { %4937 = vmatprep.mubr.msk.f32.mxu1 %vm5330_vm0, %v5331_v4  ;;  %5127 = vmatpush3.bf16.msra.mxu1 %v5598_v45 }
0x131c   :  { %5128 = vmatprep.subr.bf16.mxu1 %v5329_v0 }
0x131f   :  { %5130 = vmatpush3.bf16.msra.mxu1 %v5604_v48 }
0x1320   :  { %5137 = vmatprep.subr.bf16.mxu1 %v5329_v0 }
0x13ed   :  { %v1002_v28 = vpop.f32.mrb[6].mxu1 }
0x13ee   :  { %v1013_v29 = vadd.f32 %v1002_v28, %v5439_v10  ;;  %v4917_v31 = vpop.f32.mrb[7].mxu1  ;;  %v1006_v34 = vadd.f32 %v4683_v33, %v1002_v28 }
0x13f0   :  { %1015 = vrot.lane.b32.xlu0 %v1013_v29, %s5332_s27  ;;  %v4685_v5 = vmul.f32 -1.442695, %v1006_v34 }
0x13f2   :  { %5259 = vpow2.f32 %v4685_v5 }
0x13f4   :  { %1037 = vperm.xlu0 %5209, %v4686_v32   ;;  %v4690_v32 = vld [vmem:[%s6240_s4 + $0x2] sm:$0x3] }
0x13fc   :  { %v5260_v36 = vpop.eup %5259 }
0x13fd   :  { %v1010_v37 = vadd.f32 1.0, %v5260_v36 }
0x13ff   :  { %5261 = vrcp.f32 %v1010_v37 }
0x1409   :  { %v5262_v8 = vpop.eup %5261 }
0x140a   :  { %v1025_v51 = vsub.f32 1.0, %v5262_v8  ;;  %v1031_v53 = vmul.f32 %v5262_v8, %v928_v25 }
0x1462   :  { %v1016_v10 = vpop.permute.xlu0 %1015 }
0x1463   :  { %v1018_v38 = vmul.f32 %v5262_v8, %v1016_v10 }
0x1465   :  { %1020 = vrot.lane.b32.xlu1 %v1018_v38, %s5332_s27 }
0x1469   :  { %1050 = vperm.xlu1 %5208, %v1047_v39  }
0x1473   :  { %v1038_v49 = vpop.permute.xlu0 %1037 }
0x14d7   :  { %v1021_v40 = vpop.permute.xlu1 %1020 }
0x14d8   :  { %v1023_v41 = vadd.f32 %v4683_v33, %v1021_v40 }
0x14da   :  { %5263 = vtanh.f32 %v1023_v41 }
0x14e4   :  { %v5264_v47 = vpop.eup %5263 }
0x14e5   :  { %1027 = vrot.lane.b32.xlu0 %v5264_v47, %s5334_s30 }
0x14e8   :  { %v1051_v56 = vpop.permute.xlu1 %1050 }
0x14e9   :  { %1148 = vrot.lane.b32.xlu0 %v4689_v50, %s5332_s27  ;;  %v1053_v59 = vmul.f32 %v1051_v56, %v928_v25 }
0x1557   :  { %v1028_v52 = vpop.permute.xlu0 %1027 }
0x1558   :  { %v1030_v55 = vmul.f32 %v1028_v52, %v1025_v51  ;;  %v4693_v52 = vld [vmem:[%s6240_s4 + $0x4] sm:$0x3] }
0x155a   :  { %v1032_v57 = vadd.f32 %v1031_v53, %v1030_v55 }
0x155b   :  { %v5629_v1 = vpop.permute.xlu0 %1148 }
0x155c   :  { %v5618_v60 = vmul.f32 %v1038_v49, %v1032_v57 }
0x155e   :  { %v1054_v61 = vadd.f32 %v1053_v59, %v5618_v60 }
0x1560   :  { %1062 = vrot.lane.b32.xlu1 %v1054_v61, %s5334_s30 }
0x15d2   :  { %v1063_v63 = vpop.permute.xlu1 %1062 }
0x15d3   :  { %4927 = vmatmul.mubr.msk.f32.vlgmr.msra.gmra.mrb[8].mxu0 %vm43_vm1, %v1063_v63 }
0x15d4   :  { %5133 = vmatpush3.bf16.msra.mxu0 %v5598_v45  ;;  %4948 = vmatprep.mubr.msk.f32.mxu0 %vm5330_vm0, %v5331_v4 }
0x15d5   :  { %5134 = vmatprep.subr.bf16.mxu0 %v5329_v0 }
0x15d8   :  { %5136 = vmatpush3.bf16.msra.mxu0 %v5604_v48 }
0x15d9   :  { %5143 = vmatprep.subr.bf16.mxu0 %v5329_v0 }
0x16a6   :  { %v1132_v2 = vpop.f32.mrb[8].mxu0 }
0x16a7   :  { %v1151_v3 = vadd.f32 %v5629_v1, %v1132_v2  ;;  %v4928_v6 = vpop.f32.mrb[9].mxu0  ;;  %v1136_v9 = vadd.f32 %v1132_v2, %v1060_v7 }
0x16a9   :  { %1153 = vrot.lane.b32.xlu1 %v1151_v3, %s5332_s27  ;;  %v4688_v11 = vmul.f32 -1.442695, %v1136_v9 }
0x16ab   :  { %5265 = vpow2.f32 %v4688_v11 }
0x16b5   :  { %v5266_v12 = vpop.eup %5265 }
0x16b6   :  { %v1140_v13 = vadd.f32 1.0, %v5266_v12 }
0x16b8   :  { %5267 = vrcp.f32 %v1140_v13 }
0x16c2   :  { %v5268_v14 = vpop.eup %5267 }
0x16c3   :  { %v1163_v20 = vsub.f32 1.0, %v5268_v14  ;;  %v1169_v22 = vmul.f32 %v5268_v14, %v1054_v61 }
0x171b   :  { %v1154_v15 = vpop.permute.xlu1 %1153 }
0x171c   :  { %v1156_v16 = vmul.f32 %v5268_v14, %v1154_v15 }
0x171e   :  { %1158 = vrot.lane.b32.xlu0 %v1156_v16, %s5332_s27 }
0x1790   :  { %v1159_v17 = vpop.permute.xlu0 %1158 }
0x1791   :  { %v1161_v18 = vadd.f32 %v1159_v17, %v1060_v7 }
0x1793   :  { %5269 = vtanh.f32 %v1161_v18  ;;  %v4696_v18 = vld [vmem:[%s6240_s4 + $0x6] sm:$0x3] }
0x179d   :  { %v5270_v19 = vpop.eup %5269 }
0x179e   :  { %1165 = vrot.lane.b32.xlu1 %v5270_v19, %s5334_s30 }
0x1810   :  { %v1166_v21 = vpop.permute.xlu1 %1165 }
0x1811   :  { %v1168_v23 = vmul.f32 %v1166_v21, %v1163_v20 }
0x1813   :  { %v1170_v25 = vadd.f32 %v1169_v22, %v1168_v23 }
0x1815   :  { %1172 = vrot.lane.b32.xlu0 %v1170_v25, %s5334_s30 }
0x1887   :  { %v1173_v26 = vpop.permute.xlu0 %1172 }
0x1888   :  { %1175 = vst.msk [vmem:[#allocation3] sm:$0x3] %vm163_vm2, %v1173_v26  ;;  %4938 = vmatmul.mubr.msk.f32.vlgmr.msra.gmra.mrb[8].mxu1 %vm43_vm1, %v1173_v26 }
0x1889   :  { %5139 = vmatpush3.bf16.msra.mxu1 %v5598_v45  ;;  %4959 = vmatprep.mubr.msk.f32.mxu1 %vm5330_vm0, %v5331_v4 }
0x188a   :  { %5140 = vmatprep.subr.bf16.mxu1 %v5329_v0 }
0x188d   :  { %5142 = vmatpush3.bf16.msra.mxu1 %v5604_v48 }
0x188e   :  { %5149 = vmatprep.subr.bf16.mxu1 %v5329_v0 }
0x195b   :  { %v1246_v28 = vpop.f32.mrb[8].mxu1 }
0x195c   :  { %v1257_v29 = vadd.f32 %v1246_v28, %v5629_v1  ;;  %v4939_v31 = vpop.f32.mrb[9].mxu1  ;;  %v1250_v33 = vadd.f32 %v4690_v32, %v1246_v28 }
0x195e   :  { %1259 = vrot.lane.b32.xlu1 %v1257_v29, %s5332_s27  ;;  %v4692_v34 = vmul.f32 -1.442695, %v1250_v33 }
0x1960   :  { %5271 = vpow2.f32 %v4692_v34 }
0x196a   :  { %v5272_v5 = vpop.eup %5271 }
0x196b   :  { %v1254_v36 = vadd.f32 1.0, %v5272_v5 }
0x196d   :  { %5273 = vrcp.f32 %v1254_v36 }
0x1977   :  { %v5274_v37 = vpop.eup %5273 }
0x1978   :  { %v1269_v41 = vsub.f32 1.0, %v5274_v37  ;;  %v1275_v43 = vmul.f32 %v5274_v37, %v1170_v25 }
0x19d0   :  { %v1260_v8 = vpop.permute.xlu1 %1259 }
0x19d1   :  { %v1262_v10 = vmul.f32 %v5274_v37, %v1260_v8 }
0x19d3   :  { %1264 = vrot.lane.b32.xlu0 %v1262_v10, %s5332_s27 }
0x1a45   :  { %v1265_v38 = vpop.permute.xlu0 %1264 }
0x1a46   :  { %v1267_v39 = vadd.f32 %v4690_v32, %v1265_v38 }
0x1a48   :  { %5275 = vtanh.f32 %v1267_v39  ;;  %v4699_v39 = vld [vmem:[%s6240_s4 + $0x8] sm:$0x3] }
0x1a52   :  { %v5276_v40 = vpop.eup %5275 }
0x1a53   :  { %1271 = vrot.lane.b32.xlu1 %v5276_v40, %s5334_s30 }
0x1ac5   :  { %v1272_v42 = vpop.permute.xlu1 %1271 }
0x1ac6   :  { %v1274_v44 = vmul.f32 %v1272_v42, %v1269_v41 }
0x1ac8   :  { %v1276_v46 = vadd.f32 %v1275_v43, %v1274_v44 }
0x1aca   :  { %1278 = vrot.lane.b32.xlu0 %v1276_v46, %s5334_s30 }
0x1b3c   :  { %v1279_v47 = vpop.permute.xlu0 %1278 }
0x1b3d   :  { %1282 = vst.msk [vmem:[#allocation3 + $0x2] sm:$0x3] %vm163_vm2, %v1279_v47  ;;  %4949 = vmatmul.mubr.msk.f32.vlgmr.msra.gmra.mrb[10].mxu0 %vm43_vm1, %v1279_v47 }
0x1b3e   :  { %5145 = vmatpush3.bf16.msra.mxu0 %v5598_v45  ;;  %4970 = vmatprep.mubr.msk.f32.mxu0 %vm5330_vm0, %v5331_v4 }
0x1b3f   :  { %5146 = vmatprep.subr.bf16.mxu0 %v5329_v0 }
0x1b42   :  { %5148 = vmatpush3.bf16.msra.mxu0 %v5604_v48 }
0x1b43   :  { %5155 = vmatprep.subr.bf16.mxu0 %v5329_v0 }
0x1c10   :  { %v1353_v49 = vpop.f32.mrb[10].mxu0 }
0x1c11   :  { %v1364_v50 = vadd.f32 %v1353_v49, %v5629_v1  ;;  %v4950_v51 = vpop.f32.mrb[11].mxu0  ;;  %v1357_v53 = vadd.f32 %v4693_v52, %v1353_v49 }
0x1c13   :  { %1366 = vrot.lane.b32.xlu1 %v1364_v50, %s5332_s27  ;;  %v4695_v55 = vmul.f32 -1.442695, %v1357_v53 }
0x1c15   :  { %5277 = vpow2.f32 %v4695_v55 }
0x1c1f   :  { %v5278_v56 = vpop.eup %5277 }
0x1c20   :  { %v1361_v57 = vadd.f32 1.0, %v5278_v56 }
0x1c22   :  { %5279 = vrcp.f32 %v1361_v57 }
0x1c2c   :  { %v5280_v59 = vpop.eup %5279 }
0x1c2d   :  { %v1376_v7 = vsub.f32 1.0, %v5280_v59  ;;  %v1382_v11 = vmul.f32 %v5280_v59, %v1276_v46 }
0x1c85   :  { %v1367_v61 = vpop.permute.xlu1 %1366 }
0x1c86   :  { %v1369_v63 = vmul.f32 %v5280_v59, %v1367_v61 }
0x1c88   :  { %1371 = vrot.lane.b32.xlu0 %v1369_v63, %s5332_s27 }
0x1cfa   :  { %v1372_v2 = vpop.permute.xlu0 %1371 }
0x1cfb   :  { %v1374_v3 = vadd.f32 %v4693_v52, %v1372_v2 }
0x1cfd   :  { %5281 = vtanh.f32 %v1374_v3  ;;  %v4702_v3 = vld [vmem:[%s6240_s4 + $0xa] sm:$0x3] }
0x1d07   :  { %v5282_v6 = vpop.eup %5281 }
0x1d08   :  { %1378 = vrot.lane.b32.xlu1 %v5282_v6, %s5334_s30 }
0x1d7a   :  { %v1379_v9 = vpop.permute.xlu1 %1378 }
0x1d7b   :  { %v1381_v12 = vmul.f32 %v1379_v9, %v1376_v7 }
0x1d7d   :  { %v1383_v13 = vadd.f32 %v1382_v11, %v1381_v12 }
0x1d7f   :  { %1385 = vrot.lane.b32.xlu0 %v1383_v13, %s5334_s30 }
0x1df1   :  { %v1386_v14 = vpop.permute.xlu0 %1385 }
0x1df2   :  { %1389 = vst.msk [vmem:[#allocation3 + $0x4] sm:$0x3] %vm163_vm2, %v1386_v14  ;;  %4960 = vmatmul.mubr.msk.f32.vlgmr.msra.gmra.mrb[10].mxu1 %vm43_vm1, %v1386_v14 }
0x1df3   :  { %5151 = vmatpush3.bf16.msra.mxu1 %v5598_v45  ;;  %4981 = vmatprep.mubr.msk.f32.mxu1 %vm5330_vm0, %v5331_v4 }
0x1df4   :  { %5152 = vmatprep.subr.bf16.mxu1 %v5329_v0 }
0x1df7   :  { %5154 = vmatpush3.bf16.msra.mxu1 %v5604_v48 }
0x1df8   :  { %5161 = vmatprep.subr.bf16.mxu1 %v5329_v0 }
0x1ec5   :  { %v1460_v15 = vpop.f32.mrb[10].mxu1 }
0x1ec6   :  { %v1471_v16 = vadd.f32 %v1460_v15, %v5629_v1  ;;  %v4961_v17 = vpop.f32.mrb[11].mxu1  ;;  %v1464_v19 = vadd.f32 %v4696_v18, %v1460_v15 }
0x1ec8   :  { %1473 = vrot.lane.b32.xlu1 %v1471_v16, %s5332_s27  ;;  %v4698_v20 = vmul.f32 -1.442695, %v1464_v19 }
0x1eca   :  { %5283 = vpow2.f32 %v4698_v20 }
0x1ed4   :  { %v5284_v21 = vpop.eup %5283 }
0x1ed5   :  { %v1468_v22 = vadd.f32 1.0, %v5284_v21 }
0x1ed7   :  { %5285 = vrcp.f32 %v1468_v22 }
0x1ee1   :  { %v5286_v23 = vpop.eup %5285 }
0x1ee2   :  { %v1483_v32 = vsub.f32 1.0, %v5286_v23  ;;  %v1489_v34 = vmul.f32 %v5286_v23, %v1383_v13 }
0x1f3a   :  { %v1474_v25 = vpop.permute.xlu1 %1473 }
0x1f3b   :  { %v1476_v26 = vmul.f32 %v5286_v23, %v1474_v25 }
0x1f3d   :  { %1478 = vrot.lane.b32.xlu0 %v1476_v26, %s5332_s27  ;;  %v4705_v26 = vld [vmem:[%s6240_s4 + $0xc] sm:$0x3] }
0x1faf   :  { %v1479_v28 = vpop.permute.xlu0 %1478 }
0x1fb0   :  { %v1481_v29 = vadd.f32 %v4696_v18, %v1479_v28 }
0x1fb2   :  { %5287 = vtanh.f32 %v1481_v29 }
0x1fbc   :  { %v5288_v31 = vpop.eup %5287 }
0x1fbd   :  { %1485 = vrot.lane.b32.xlu1 %v5288_v31, %s5334_s30 }
0x202f   :  { %v1486_v33 = vpop.permute.xlu1 %1485 }
0x2030   :  { %v1488_v5 = vmul.f32 %v1486_v33, %v1483_v32 }
0x2032   :  { %v1490_v36 = vadd.f32 %v1489_v34, %v1488_v5 }
0x2034   :  { %1492 = vrot.lane.b32.xlu0 %v1490_v36, %s5334_s30 }
0x20a6   :  { %v1493_v37 = vpop.permute.xlu0 %1492 }
0x20a7   :  { %1496 = vst.msk [vmem:[#allocation3 + $0x6] sm:$0x3] %vm163_vm2, %v1493_v37  ;;  %4971 = vmatmul.mubr.msk.f32.vlgmr.msra.gmra.mrb[12].mxu0 %vm43_vm1, %v1493_v37 }
0x20a8   :  { %5157 = vmatpush3.bf16.msra.mxu0 %v5598_v45  ;;  %4992 = vmatprep.mubr.msk.f32.mxu0 %vm5330_vm0, %v5331_v4 }
0x20a9   :  { %5158 = vmatprep.subr.bf16.mxu0 %v5329_v0 }
0x20ac   :  { %5160 = vmatpush3.bf16.msra.mxu0 %v5604_v48 }
0x20ad   :  { %5167 = vmatprep.subr.bf16.mxu0 %v5329_v0 }
0x217a   :  { %v1567_v8 = vpop.f32.mrb[12].mxu0 }
0x217b   :  { %v1578_v10 = vadd.f32 %v1567_v8, %v5629_v1  ;;  %v4972_v38 = vpop.f32.mrb[13].mxu0  ;;  %v1571_v40 = vadd.f32 %v4699_v39, %v1567_v8 }
0x217d   :  { %1580 = vrot.lane.b32.xlu1 %v1578_v10, %s5332_s27  ;;  %v4701_v41 = vmul.f32 -1.442695, %v1571_v40 }
0x217f   :  { %5289 = vpow2.f32 %v4701_v41 }
0x2189   :  { %v5290_v42 = vpop.eup %5289 }
0x218a   :  { %v1575_v43 = vadd.f32 1.0, %v5290_v42 }
0x218c   :  { %5291 = vrcp.f32 %v1575_v43 }
0x2196   :  { %v5292_v44 = vpop.eup %5291 }
0x2197   :  { %v1590_v52 = vsub.f32 1.0, %v5292_v44  ;;  %v1596_v55 = vmul.f32 %v5292_v44, %v1490_v36 }
0x21ef   :  { %v1581_v46 = vpop.permute.xlu1 %1580 }
0x21f0   :  { %v1583_v47 = vmul.f32 %v5292_v44, %v1581_v46 }
0x21f2   :  { %1585 = vrot.lane.b32.xlu0 %v1583_v47, %s5332_s27 }
0x2264   :  { %v1586_v49 = vpop.permute.xlu0 %1585 }
0x2265   :  { %v1588_v50 = vadd.f32 %v4699_v39, %v1586_v49 }
0x2267   :  { %5293 = vtanh.f32 %v1588_v50 }
0x2271   :  { %v5294_v51 = vpop.eup %5293 }
0x2272   :  { %1592 = vrot.lane.b32.xlu1 %v5294_v51, %s5334_s30 }
0x22e4   :  { %v1593_v53 = vpop.permute.xlu1 %1592 }
0x22e5   :  { %v1595_v56 = vmul.f32 %v1593_v53, %v1590_v52 }
0x22e7   :  { %v1597_v57 = vadd.f32 %v1596_v55, %v1595_v56 }
0x22e9   :  { %1599 = vrot.lane.b32.xlu0 %v1597_v57, %s5334_s30 }
0x235b   :  { %v1600_v59 = vpop.permute.xlu0 %1599 }
0x235c   :  { %1603 = vst.msk [vmem:[#allocation3 + $0x8] sm:$0x3] %vm163_vm2, %v1600_v59  ;;  %4982 = vmatmul.mubr.msk.f32.vlgmr.msra.gmra.mrb[12].mxu1 %vm43_vm1, %v1600_v59 }
0x235d   :  { %5163 = vmatpush3.bf16.msra.mxu1 %v5598_v45  ;;  %5003 = vmatprep.mubr.msk.f32.mxu1 %vm5330_vm0, %v5331_v4 }
0x235e   :  { %5164 = vmatprep.subr.bf16.mxu1 %v5329_v0 }
0x2361   :  { %5166 = vmatpush3.bf16.msra.mxu1 %v5604_v48 }
0x2362   :  { %5173 = vmatprep.subr.bf16.mxu1 %v5329_v0 }
0x242f   :  { %v1674_v61 = vpop.f32.mrb[12].mxu1 }
0x2430   :  { %v1685_v63 = vadd.f32 %v1674_v61, %v5629_v1  ;;  %v4983_v2 = vpop.f32.mrb[13].mxu1  ;;  %v1678_v45 = vadd.f32 %v4702_v3, %v1674_v61  ;;  %v1954_v61 = vlaneseq }
0x2432   :  { %1687 = vrot.lane.b32.xlu1 %v1685_v63, %s5332_s27  ;;  %v4704_v6 = vmul.f32 -1.442695, %v1678_v45  ;;  %v5779_v45 = vshrl.u32 %v1954_v61, 7 }
0x2434   :  { %5295 = vpow2.f32 %v4704_v6 }
0x243e   :  { %v5296_v7 = vpop.eup %5295 }
0x243f   :  { %v1682_v9 = vadd.f32 1.0, %v5296_v7 }
0x2441   :  { %5297 = vrcp.f32 %v1682_v9 }
0x244b   :  { %v5298_v11 = vpop.eup %5297 }
0x244c   :  { %v1697_v16 = vsub.f32 1.0, %v5298_v11  ;;  %v1703_v18 = vmul.f32 %v5298_v11, %v1597_v57 }
0x24a4   :  { %v1688_v48 = vpop.permute.xlu1 %1687 }
0x24a5   :  { %v1690_v12 = vmul.f32 %v5298_v11, %v1688_v48 }
0x24a7   :  { %1692 = vrot.lane.b32.xlu0 %v1690_v12, %s5332_s27  ;;  %v5336_v12 = vmov 1934713408  }
0x2519   :  { %v1693_v13 = vpop.permute.xlu0 %1692 }
0x251a   :  { %v1695_v14 = vadd.f32 %v4702_v3, %v1693_v13  ;;  %v2009_v13 = vunpack.c.l.s4 %v5336_v12 }
0x251c   :  { %5299 = vtanh.f32 %v1695_v14 }
0x2526   :  { %v5300_v15 = vpop.eup %5299 }
0x2527   :  { %1699 = vrot.lane.b32.xlu1 %v5300_v15, %s5334_s30 }
0x2599   :  { %v1700_v17 = vpop.permute.xlu1 %1699 }
0x259a   :  { %v1702_v19 = vmul.f32 %v1700_v17, %v1697_v16 }
0x259c   :  { %v1704_v20 = vadd.f32 %v1703_v18, %v1702_v19 }
0x259e   :  { %1706 = vrot.lane.b32.xlu0 %v1704_v20, %s5334_s30 }
0x2610   :  { %v1707_v21 = vpop.permute.xlu0 %1706 }
0x2611   :  { %1710 = vst.msk [vmem:[#allocation3 + $0xa] sm:$0x3] %vm163_vm2, %v1707_v21  ;;  %4993 = vmatmul.mubr.msk.f32.vlgmr.msra.gmra.mrb[14].mxu0 %vm43_vm1, %v1707_v21  ;;  %v2010_v21 = vunpack.c.0.s8 %v2009_v13 }
0x2612   :  { %5014 = vmatprep.mubr.msk.f32.mxu0 %vm5330_vm0, %v5331_v4 }
0x26e4   :  { %v1781_v22 = vpop.f32.mrb[14].mxu0 }
0x26e5   :  { %v1792_v23 = vadd.f32 %v1781_v22, %v5629_v1  ;;  %v4994_v25 = vpop.f32.mrb[15].mxu0  ;;  %v1785_v28 = vadd.f32 %v4705_v26, %v1781_v22 }
0x26e7   :  { %1794 = vrot.lane.b32.xlu1 %v1792_v23, %s5332_s27  ;;  %v4707_v29 = vmul.f32 -1.442695, %v1785_v28  ;;  %v5790_v28 = vsub.s32 %v2010_v21, %v5779_v45 }
0x26e9   :  { %5301 = vpow2.f32 %v4707_v29 }
0x26f3   :  { %v5302_v31 = vpop.eup %5301 }
0x26f4   :  { %v1789_v32 = vadd.f32 1.0, %v5302_v31 }
0x26f6   :  { %5303 = vrcp.f32 %v1789_v32 }
0x2700   :  { %v5304_v33 = vpop.eup %5303 }
0x2701   :  { %v1804_v10 = vsub.f32 1.0, %v5304_v33  ;;  %v1810_v39 = vmul.f32 %v5304_v33, %v1704_v20 }
0x2759   :  { %v1795_v34 = vpop.permute.xlu1 %1794 }
0x275a   :  { %v1797_v5 = vmul.f32 %v5304_v33, %v1795_v34  ;;  %v5803_v33 = vld [vmem:[%s6240_s4 + $0xe] sm:$0x3] }
0x275c   :  { %1799 = vrot.lane.b32.xlu0 %v1797_v5, %s5332_s27 }
0x27ce   :  { %v1800_v36 = vpop.permute.xlu0 %1799 }
0x27cf   :  { %v1802_v37 = vadd.f32 %v4705_v26, %v1800_v36 }
0x27d1   :  { %5305 = vtanh.f32 %v1802_v37 }
0x27db   :  { %v5306_v8 = vpop.eup %5305 }
0x27dc   :  { %1806 = vrot.lane.b32.xlu1 %v5306_v8, %s5334_s30 }
0x27e0   :  { %160 = vrot.lane.b32.xlu1 %v5451_v35, %s5334_s30 }
0x284e   :  { %v1807_v38 = vpop.permute.xlu1 %1806 }
0x284f   :  { %v1809_v40 = vmul.f32 %v1807_v38, %v1804_v10 }
0x2851   :  { %v5732_v41 = vadd.f32 %v1810_v39, %v1809_v40 }
0x2852   :  { %v161_v42 = vpop.permute.xlu1 %160 }
0x2853   :  { %164 = vst.msk [vmem:[#allocation2] sm:$0x3] %vm163_vm2, %v161_v42  ;;  %1813 = vrot.lane.b32.xlu0 %v5732_v41, %s5334_s30 }
0x285a   :  { %v1925_v43 = vld [vmem:[#allocation2] sm:$0x3] }
0x2871   :  { %2025 = vxpose.xlu0.b32.start.end [1/1] (short) (narrow) %v1925_v43, 32 }
0x28a6   :  { %286 = vrot.lane.b32.xlu0 %v5472_v62, %s5334_s30 }
0x28aa   :  { %538 = vrot.lane.b32.xlu0 %v5514_v58, %s5334_s30 }
0x28ae   :  { %790 = vrot.lane.b32.xlu0 %v5556_v54, %s5334_s30 }
0x28b2   :  { %1042 = vrot.lane.b32.xlu0 %v5618_v60, %s5334_s30 }
0x28c5   :  { %v1814_v35 = vpop.permute.xlu0 %1813 }
0x28c6   :  { %1817 = vst.msk [vmem:[#allocation3 + $0xc] sm:$0x3] %vm163_vm2, %v1814_v35  ;;  %5004 = vmatmul.mubr.msk.f32.vlgmr.msra.gmra.mrb[14].mxu1 %vm43_vm1, %v1814_v35 }
0x28c7   :  { %5025 = vmatprep.mubr.msk.f32.mxu1 %vm5330_vm0, %v5331_v4 }
0x28f1   :  { %v5749_v44 = vpop.trf.xlu0 }
0x28f5   :  { %v5751_v62 = vpop.trf.xlu0 }
0x28f9   :  { %v5753_v46 = vpop.trf.xlu0 }
0x28fd   :  { %v5755_v58 = vpop.trf.xlu0 }
0x2918   :  { %v287_v54 = vpop.permute.xlu0 %286 }
0x2919   :  { %290 = vst.msk [vmem:[#allocation2 + $0x2] sm:$0x3] %vm163_vm2, %v287_v54 }
0x291c   :  { %v539_v60 = vpop.permute.xlu0 %538 }
0x291d   :  { %542 = vst.msk [vmem:[#allocation2 + $0x6] sm:$0x3] %vm163_vm2, %v539_v60 }
0x2920   :  { %v791_v47 = vpop.permute.xlu0 %790  ;;  %v1926_v49 = vld [vmem:[#allocation2 + $0x2] sm:$0x3] }
0x2921   :  { %794 = vst.msk [vmem:[#allocation2 + $0xa] sm:$0x3] %vm163_vm2, %v791_v47  ;;  %2057 = vxpose.xlu1.b32.start.end [1/1] (short) (narrow) %v1926_v49, 32 }
0x2924   :  { %v1043_v50 = vpop.permute.xlu0 %1042 }
0x2925   :  { %1046 = vst.msk [vmem:[#allocation2 + $0xe] sm:$0x3] %vm163_vm2, %v1043_v50 }
0x2928   :  { %v1930_v14 = vld [vmem:[#allocation2 + $0xa] sm:$0x3] }
0x292c   :  { %v1932_v9 = vld [vmem:[#allocation2 + $0xe] sm:$0x3] }
0x292d   :  { %v4242_v15 = vcombine.low %v1930_v14, %v1932_v9 }
0x294b   :  { %412 = vrot.lane.b32.xlu1 %v5493_v30, %s5334_s30 }
0x294f   :  { %664 = vrot.lane.b32.xlu1 %v5535_v27, %s5334_s30 }
0x2953   :  { %916 = vrot.lane.b32.xlu1 %v5573_v24, %s5334_s30  ;;  %v5335_v24 = vmov 1983009808  }
0x2954   :  { %v1977_v63 = vunpack.c.l.s4 %v5335_v24 }
0x2956   :  { %v1978_v6 = vunpack.c.0.s8 %v1977_v63 }
0x2958   :  { %v5783_v11 = vsub.s32 %v1978_v6, %v5779_v45 }
0x295a   :  { %v4249_v22 = vrot.slane %v4242_v15, %v5783_v11 }
0x2999   :  { %v1888_v51 = vpop.f32.mrb[14].mxu1 }
0x299a   :  { %v1899_v52 = vadd.f32 %v1888_v51, %v5629_v1  ;;  %v5005_v53 = vpop.f32.mrb[15].mxu1  ;;  %v1928_v1 = vld [vmem:[#allocation2 + $0x6] sm:$0x3]  ;;  %v1892_v34 = vadd.f32 %v5803_v33, %v1888_v51 }
0x299b   :  { %v4226_v48 = vcombine.low %v1926_v49, %v1928_v1 }
0x299c   :  { %1901 = vrot.lane.b32.xlu1 %v1899_v52, %s5332_s27  ;;  %v4710_v5 = vmul.f32 -1.442695, %v1892_v34 }
0x299d   :  { %v4233_v19 = vrot.slane %v4226_v48, %v5783_v11 }
0x299e   :  { %5307 = vpow2.f32 %v4710_v5 }
0x29a1   :  { %v5769_v55 = vpop.trf.xlu1 }
0x29a5   :  { %v5771_v56 = vpop.trf.xlu1 }
0x29a8   :  { %v5308_v36 = vpop.eup %5307 }
0x29a9   :  { %v5773_v57 = vpop.trf.xlu1  ;;  %v1896_v37 = vadd.f32 1.0, %v5308_v36 }
0x29ab   :  { %5309 = vrcp.f32 %v1896_v37 }
0x29ad   :  { %v5775_v59 = vpop.trf.xlu1 }
0x29b5   :  { %v5806_v8 = vpop.eup %5309 }
0x29bd   :  { %v413_v30 = vpop.permute.xlu1 %412 }
0x29be   :  { %416 = vst.msk [vmem:[#allocation2 + $0x4] sm:$0x3] %vm163_vm2, %v413_v30 }
0x29c1   :  { %v665_v27 = vpop.permute.xlu1 %664 }
0x29c2   :  { %668 = vst.msk [vmem:[#allocation2 + $0x8] sm:$0x3] %vm163_vm2, %v665_v27 }
0x29c5   :  { %v917_v2 = vpop.permute.xlu1 %916  ;;  %2121 = vxpose.xlu1.b32.start.end [1/1] (short) (narrow) %v1928_v1, 32  ;;  %v1927_v3 = vld [vmem:[#allocation2 + $0x4] sm:$0x3] }
0x29c6   :  { %920 = vst.msk [vmem:[#allocation2 + $0xc] sm:$0x3] %vm163_vm2, %v917_v2  ;;  %v4218_v7 = vcombine.low %v1925_v43, %v1927_v3 }
0x29c8   :  { %v4225_v16 = vrot.slane %v4218_v7, %v5783_v11 }
0x29c9   :  { %v1929_v17 = vld [vmem:[#allocation2 + $0x8] sm:$0x3] }
0x29ca   :  { %v4250_v23 = vcombine.low %v4225_v16, %v4233_v19 }
0x29cc   :  { %v5793_v29 = vrot.slane %v4250_v23, %v5790_v28 }
0x29cd   :  { %v1931_v18 = vld [vmem:[#allocation2 + $0xc] sm:$0x3] }
0x29ce   :  { %v4234_v20 = vcombine.low %v1929_v17, %v1931_v18 }
0x29d0   :  { %v4241_v25 = vrot.slane %v4234_v20, %v5783_v11 }
0x29d2   :  { %2185 = vxpose.xlu1.b32.start.end [1/1] (short) (narrow) %v1930_v14, 32  ;;  %v4258_v26 = vcombine.low %v4241_v25, %v4249_v22 }
0x29d4   :  { %v5796_v31 = vrot.slane %v4258_v26, %v5790_v28 }
0x29d6   :  { %v4267_v32 = vcombine.high %v5793_v29, %v5796_v31 }
0x29df   :  { %2249 = vxpose.xlu1.b32.start.end [1/1] (short) (narrow) %v1932_v9, 32 }
0x2a0e   :  { %v1902_v10 = vpop.permute.xlu1 %1901 }
0x2a0f   :  { %v1904_v38 = vmul.f32 %v5806_v8, %v1902_v10 }
0x2a11   :  { %1906 = vrot.lane.b32.xlu0 %v1904_v38, %s5332_s27 }
0x2a2f   :  { %2089 = vxpose.xlu0.b32.start.end [1/1] (short) (narrow) %v1927_v3, 32 }
0x2a3c   :  { %2153 = vxpose.xlu0.b32.start.end [1/1] (short) (narrow) %v1929_v17, 32 }
0x2a45   :  { %v2137_v39 = vpop.trf.xlu1 }
0x2a46   :  { %v2297_v17 = vcombine.low %v5769_v55, %v2137_v39 }
0x2a48   :  { %v2305_v36 = vrot.slane %v2297_v17, %v5783_v11 }
0x2a49   :  { %v2138_v40 = vpop.trf.xlu1  ;;  %2217 = vxpose.xlu0.b32.start.end [1/1] (short) (narrow) %v1931_v18, 32  ;;  %v2298_v18 = vcombine.high %v5769_v55, %v2137_v39 }
0x2a4a   :  { %v2434_v30 = vcombine.high %v5771_v56, %v2138_v40  ;;  %v2433_v20 = vcombine.low %v5771_v56, %v2138_v40 }
0x2a4b   :  { %v5861_v55 = vrot.slane %v2298_v18, %v5783_v11 }
0x2a4c   :  { %v5822_v24 = vrot.slane %v2434_v30, %v5783_v11 }
0x2a4d   :  { %v2139_v42 = vpop.trf.xlu1 }
0x2a4e   :  { %v2569_v21 = vcombine.low %v5773_v57, %v2139_v42  ;;  %v2570_v26 = vcombine.high %v5773_v57, %v2139_v42  ;;  %v2441_v57 = vrot.slane %v2433_v20, %v5783_v11 }
0x2a51   :  { %v2140_v43 = vpop.trf.xlu1 }
0x2a52   :  { %v2706_v6 = vcombine.high %v5775_v59, %v2140_v43  ;;  %v2705_v34 = vcombine.low %v5775_v59, %v2140_v43  ;;  %v2577_v59 = vrot.slane %v2569_v21, %v5783_v11  ;;  %v2584_v43 = vrot.slane %v2570_v26, %v5783_v11 }
0x2a54   :  { %v5837_v48 = vrot.slane %v2706_v6, %v5783_v11 }
0x2a55   :  { %v2201_v35 = vpop.trf.xlu1 }
0x2a59   :  { %v5810_v54 = vpop.trf.xlu1 }
0x2a5d   :  { %v5812_v60 = vpop.trf.xlu1 }
0x2a61   :  { %v5814_v47 = vpop.trf.xlu1 }
0x2a65   :  { %v2265_v49 = vpop.trf.xlu1 }
0x2a66   :  { %v2329_v5 = vcombine.low %v2201_v35, %v2265_v49  ;;  %v2330_v10 = vcombine.high %v2201_v35, %v2265_v49 }
0x2a69   :  { %v2266_v50 = vpop.trf.xlu1 }
0x2a6a   :  { %v2466_v51 = vcombine.high %v5810_v54, %v2266_v50 }
0x2a6d   :  { %v2267_v16 = vpop.trf.xlu1 }
0x2a6e   :  { %v2601_v35 = vcombine.low %v5812_v60, %v2267_v16  ;;  %v2602_v49 = vcombine.high %v5812_v60, %v2267_v16 }
0x2a70   :  { %v5900_v20 = vrot.slane %v2601_v35, %v5783_v11 }
0x2a71   :  { %v2268_v38 = vpop.trf.xlu1 }
0x2a72   :  { %v2738_v30 = vcombine.high %v5814_v47, %v2268_v38 }
0x2a83   :  { %v5817_v52 = vpop.permute.xlu0 %1906 }
0x2aaf   :  { %v2105_v53 = vpop.trf.xlu0 }
0x2ab0   :  { %v2281_v19 = vcombine.low %v5749_v44, %v2105_v53  ;;  %v2282_v22 = vcombine.high %v5749_v44, %v2105_v53  ;;  %v5877_v53 = vrot.slane %v2705_v34, %v5783_v11 }
0x2ab2   :  { %v2289_v37 = vrot.slane %v2281_v19, %v5783_v11  ;;  %v5870_v39 = vrot.slane %v2282_v22, %v5783_v11  ;;  %v5895_v19 = vrot.slane %v2466_v51, %v5783_v11  ;;  %v5910_v51 = vrot.slane %v2738_v30, %v5783_v11 }
0x2ab3   :  { %v2106_v27 = vpop.trf.xlu0 }
0x2ab4   :  { %v2418_v61 = vcombine.high %v5751_v62, %v2106_v27  ;;  %v2417_v23 = vcombine.low %v5751_v62, %v2106_v27  ;;  %v2465_v62 = vcombine.low %v5810_v54, %v2266_v50  ;;  %v2737_v50 = vcombine.low %v5814_v47, %v2268_v38 }
0x2ab5   :  { %v2345_v27 = vcombine.low %v2289_v37, %v2305_v36  ;;  %v2361_v17 = vcombine.low %v5870_v39, %v5861_v55 }
0x2ab6   :  { %v5825_v63 = vrot.slane %v2418_v61, %v5783_v11  ;;  %v2425_v40 = vrot.slane %v2417_v23, %v5783_v11  ;;  %v2473_v6 = vrot.slane %v2465_v62, %v5783_v11  ;;  %v5904_v23 = vrot.slane %v2602_v49, %v5783_v11 }
0x2ab7   :  { %v2107_v1 = vpop.trf.xlu0  ;;  %v5907_v26 = vrot.slane %v2737_v50, %v5783_v11  ;;  %v2353_v34 = vrot.slane %v2345_v27, %v5790_v28 }
0x2ab8   :  { %v2497_v2 = vcombine.low %v5825_v63, %v5822_v24  ;;  %v2498_v3 = vcombine.high %v5825_v63, %v5822_v24  ;;  %v2553_v56 = vcombine.low %v5753_v46, %v2107_v1  ;;  %v2554_v44 = vcombine.high %v5753_v46, %v2107_v1 }
0x2ab9   :  { %v5880_v46 = vrot.slane %v2329_v5, %v5783_v11  ;;  %v5889_v1 = vrot.slane %v2330_v10, %v5783_v11  ;;  %v2481_v18 = vcombine.low %v2425_v40, %v2441_v57  ;;  %v2482_v16 = vcombine.high %v2425_v40, %v2441_v57 }
0x2aba   :  { %v2561_v54 = vrot.slane %v2553_v56, %v5783_v11  ;;  %v2568_v61 = vrot.slane %v2554_v44, %v5783_v11  ;;  %v5918_v56 = vrot.slane %v2361_v17, %v5790_v28  ;;  %v5930_v38 = vrot.slane %v2497_v2, %v5790_v28 }
0x2abb   :  { %v5832_v7 = vpop.trf.xlu0  ;;  %v5924_v62 = vrot.slane %v2482_v16, %v5790_v28  ;;  %v5940_v40 = vrot.slane %v2498_v3, %v5790_v28 }
0x2abc   :  { %v2690_v9 = vcombine.high %v5755_v58, %v5832_v7  ;;  %v2689_v47 = vcombine.low %v5755_v58, %v5832_v7  ;;  %v2617_v22 = vcombine.low %v2561_v54, %v2577_v59  ;;  %v2618_v5 = vcombine.high %v2561_v54, %v2577_v59 }
0x2abd   :  { %v2634_v44 = vcombine.high %v2568_v61, %v2584_v43 }
0x2abe   :  { %v5840_v12 = vrot.slane %v2690_v9, %v5783_v11  ;;  %v2346_v9 = vcombine.high %v2289_v37, %v2305_v36  ;;  %v2633_v36 = vcombine.low %v2568_v61, %v2584_v43  ;;  %v5921_v37 = vrot.slane %v2481_v18, %v5790_v28 }
0x2abf   :  { %v5842_v13 = vpop.trf.xlu0  ;;  %v5933_v57 = vrot.slane %v2689_v47, %v5783_v11  ;;  %v5943_v43 = vrot.slane %v2617_v22, %v5790_v28  ;;  %v5948_v2 = vrot.slane %v2618_v5, %v5790_v28  ;;  %v5956_v24 = vrot.slane %v2634_v44, %v5790_v28 }
0x2ac0   :  { %v2770_v14 = vcombine.high %v5840_v12, %v5837_v48  ;;  %v5915_v7 = vrot.slane %v2346_v9, %v5790_v28  ;;  %v5951_v49 = vrot.slane %v2633_v36, %v5790_v28 }
0x2ac1   :  { %v2753_v61 = vcombine.low %v5933_v57, %v5877_v53 }
0x2ac3   :  { %v5846_v15 = vpop.trf.xlu0 }
0x2ac7   :  { %v5855_v25 = vpop.trf.xlu0 }
0x2acb   :  { %v5873_v42 = vpop.trf.xlu0 }
0x2acf   :  { %v2233_v60 = vpop.trf.xlu0 }
0x2ad0   :  { %v2313_v21 = vcombine.low %v5842_v13, %v2233_v60  ;;  %v2314_v50 = vcombine.high %v5842_v13, %v2233_v60 }
0x2ad2   :  { %v2321_v58 = vrot.slane %v2313_v21, %v5783_v11  ;;  %v5970_v21 = vrot.slane %v2314_v50, %v5783_v11 }
0x2ad3   :  { %v2234_v10 = vpop.trf.xlu0 }
0x2ad4   :  { %v2377_v59 = vcombine.low %v2321_v58, %v5880_v46  ;;  %v2449_v35 = vcombine.low %v5846_v15, %v2234_v10  ;;  %v2450_v54 = vcombine.high %v5846_v15, %v2234_v10  ;;  %v2378_v63 = vcombine.high %v2321_v58, %v5880_v46 }
0x2ad5   :  { %v2754_v46 = vcombine.high %v5933_v57, %v5877_v53  ;;  %v5984_v58 = vrot.slane %v2753_v61, %v5790_v28 }
0x2ad6   :  { %v2385_v30 = vrot.slane %v2377_v59, %v5790_v28  ;;  %v2457_v3 = vrot.slane %v2449_v35, %v5783_v11  ;;  %v2464_v27 = vrot.slane %v2450_v54, %v5783_v11 }
0x2ad7   :  { %v2235_v15 = vpop.trf.xlu0 }
0x2ad8   :  { %v2585_v9 = vcombine.low %v5855_v25, %v2235_v15  ;;  %v2586_v17 = vcombine.high %v5855_v25, %v2235_v15  ;;  %v2409_v13 = vcombine.low %v2353_v34, %v2385_v30  ;;  %v2513_v18 = vcombine.low %v2457_v3, %v2473_v6 }
0x2ad9   :  { %v2514_v60 = vcombine.high %v2457_v3, %v2473_v6  ;;  %v2529_v16 = vcombine.low %v2464_v27, %v5895_v19  ;;  %v2530_v47 = vcombine.high %v2464_v27, %v5895_v19  ;;  %v2769_v25 = vcombine.low %v5840_v12, %v5837_v48 }
0x2ada   :  { %v2593_v22 = vrot.slane %v2585_v9, %v5783_v11  ;;  %v2600_v5 = vrot.slane %v2586_v17, %v5783_v11  ;;  %2825 = vxpose.xlu1.b32.start.end [1/1] (short) (narrow) %v2409_v13, 8  ;;  %v2392_v6 = vrot.slane %v2378_v63, %v5790_v28  ;;  %v5978_v36 = vrot.slane %v2513_v18, %v5790_v28 }
0x2adb   :  { %v5981_v19 = vrot.slane %v2514_v60, %v5790_v28  ;;  %v2236_v53 = vpop.trf.xlu0  ;;  %v2410_v57 = vcombine.high %v2353_v34, %v2385_v30  ;;  %v2393_v63 = vcombine.low %v5970_v21, %v5889_v1  ;;  %v6005_v34 = vrot.slane %v2770_v14, %v5790_v28 }
0x2adc   :  { %v2649_v44 = vcombine.low %v2593_v22, %v5900_v20  ;;  %v2650_v10 = vcombine.high %v2593_v22, %v5900_v20  ;;  %v2721_v35 = vcombine.low %v5873_v42, %v2236_v53  ;;  %v2722_v54 = vcombine.high %v5873_v42, %v2236_v53 }
0x2add   :  { %v2548_v59 = vcombine.high %v5924_v62, %v5981_v19  ;;  %v2546_v50 = vcombine.high %v5921_v37, %v5978_v36  ;;  %v2665_v27 = vcombine.low %v2600_v5, %v5904_v23  ;;  %v2666_v20 = vcombine.high %v2600_v5, %v5904_v23 }
0x2ade   :  { %v5997_v3 = vrot.slane %v2649_v44, %v5790_v28  ;;  %2857 = vxpose.xlu1.b32.start.end [1/1] (short) (narrow) %v2410_v57, 8  ;;  %v2729_v42 = vrot.slane %v2721_v35, %v5783_v11  ;;  %v2736_v30 = vrot.slane %v2722_v54, %v5783_v11  ;;  %v2411_v15 = vcombine.low %v5915_v7, %v2392_v6 }
0x2adf   :  { %3113 = vxpose.xlu0.b32.start.end [1/1] (short) (narrow) %v2546_v50, 8  ;;  %v6011_v61 = vrot.slane %v2529_v16, %v5790_v28  ;;  %v6014_v9 = vrot.slane %v2530_v47, %v5790_v28  ;;  %v6017_v23 = vrot.slane %v2650_v10, %v5790_v28  ;;  %v2401_v18 = vrot.slane %v2393_v63, %v5790_v28 }
0x2ae0   :  { %v2682_v48 = vcombine.high %v5943_v43, %v5997_v3  ;;  %v2785_v12 = vcombine.low %v2729_v42, %v5907_v26  ;;  %v2786_v14 = vcombine.high %v2729_v42, %v5907_v26  ;;  %v2801_v17 = vcombine.low %v2736_v30, %v5910_v51 }
0x2ae1   :  { %v2802_v13 = vcombine.high %v2736_v30, %v5910_v51  ;;  %v6027_v60 = vrot.slane %v2665_v27, %v5790_v28  ;;  %v6030_v16 = vrot.slane %v2666_v20, %v5790_v28  ;;  %v2412_v47 = vcombine.high %v5915_v7, %v2392_v6 }
0x2ae2   :  { %2889 = vxpose.xlu1.b32.start.end [1/1] (short) (narrow) %v2411_v15, 8  ;;  %v6034_v22 = vrot.slane %v2785_v12, %v5790_v28  ;;  %v6037_v26 = vrot.slane %v2786_v14, %v5790_v28  ;;  %v6040_v5 = vrot.slane %v2801_v17, %v5790_v28  ;;  %v2549_v53 = vcombine.low %v5930_v38, %v6011_v61 }
0x2ae3   :  { %v6043_v51 = vrot.slane %v2802_v13, %v5790_v28  ;;  %3369 = vxpose.xlu0.b32.start.end [1/1] (short) (narrow) %v2682_v48, 8  ;;  %v2550_v44 = vcombine.high %v5930_v38, %v6011_v61  ;;  %v2551_v7 = vcombine.low %v5940_v40, %v6014_v9  ;;  %v2552_v6 = vcombine.high %v5940_v40, %v6014_v9 }
0x2ae4   :  { %v6054_v10 = vrot.slane %v2754_v46, %v5790_v28  ;;  %v6057_v57 = vrot.slane %v2769_v25, %v5790_v28  ;;  %v2684_v54 = vcombine.high %v5948_v2, %v6017_v23  ;;  %v2681_v38 = vcombine.low %v5943_v43, %v5997_v3 }
0x2ae5   :  { %v2824_v35 = vcombine.high %v6005_v34, %v6043_v51  ;;  %v2683_v50 = vcombine.low %v5948_v2, %v6017_v23  ;;  %v2685_v40 = vcombine.low %v5951_v49, %v6027_v60  ;;  %v2687_v46 = vcombine.low %v5956_v24, %v6030_v16 }
0x2ae6   :  { %2921 = vxpose.xlu1.b32.start.end [1/1] (short) (narrow) %v2412_v47, 8  ;;  %v2817_v25 = vcombine.low %v5984_v58, %v6034_v22  ;;  %v2819_v63 = vcombine.low %v6054_v10, %v6037_v26  ;;  %v2821_v27 = vcombine.low %v6057_v57, %v6040_v5  ;;  %v2823_v43 = vcombine.low %v6005_v34, %v6043_v51 }
0x2ae7   :  { %3433 = vxpose.xlu0.b32.start.end [1/1] (short) (narrow) %v2684_v54, 8  ;;  %v2394_v2 = vcombine.high %v5970_v21, %v5889_v1  ;;  %v2413_v3 = vcombine.low %v5918_v56, %v2401_v18  ;;  %v2686_v20 = vcombine.high %v5951_v49, %v6027_v60  ;;  %v2362_v42 = vcombine.high %v5870_v39, %v5861_v55 }
0x2ae8   :  { %v2414_v15 = vcombine.high %v5918_v56, %v2401_v18  ;;  %v2688_v61 = vcombine.high %v5956_v24, %v6030_v16  ;;  %v2818_v49 = vcombine.high %v5984_v58, %v6034_v22  ;;  %v2820_v39 = vcombine.high %v6054_v10, %v6037_v26 }
0x2ae9   :  { %v2408_v30 = vrot.slane %v2394_v2, %v5790_v28  ;;  %v2376_v9 = vrot.slane %v2362_v42, %v5790_v28  ;;  %v2545_v56 = vcombine.low %v5921_v37, %v5978_v36  ;;  %v2822_v24 = vcombine.high %v6057_v57, %v6040_v5 }
0x2aea   :  { %2953 = vxpose.xlu1.b32.start.end [1/1] (short) (narrow) %v2413_v3, 8  ;;  %v2547_v21 = vcombine.low %v5924_v62, %v5981_v19  ;;  %v1909_v58 = vadd.f32 %v5803_v33, %v5817_v52 }
0x2aeb   :  { %3497 = vxpose.xlu0.b32.start.end [1/1] (short) (narrow) %v2686_v20, 8  ;;  %v2415_v1 = vcombine.low %v2376_v9, %v2408_v30  ;;  %v2416_v55 = vcombine.high %v2376_v9, %v2408_v30 }
0x2aec   :  { %5311 = vtanh.f32 %v1909_v58 }
0x2aee   :  { %2985 = vxpose.xlu1.b32.start.end [1/1] (short) (narrow) %v2414_v15, 8 }
0x2aef   :  { %3561 = vxpose.xlu0.b32.start.end [1/1] (short) (narrow) %v2688_v61, 8 }
0x2af2   :  { %3017 = vxpose.xlu1.b32.start.end [1/1] (short) (narrow) %v2415_v1, 8 }
0x2af3   :  { %3625 = vxpose.xlu0.b32.start.end [1/1] (short) (narrow) %v2818_v49, 8 }
0x2af6   :  { %3049 = vxpose.xlu1.b32.start.end [1/1] (short) (narrow) %v2416_v55, 8  ;;  %v5312_v23 = vpop.eup %5311 }
0x2af7   :  { %3689 = vxpose.xlu0.b32.start.end [1/1] (short) (narrow) %v2820_v39, 8 }
0x2afa   :  { %3081 = vxpose.xlu1.b32.start.end [1/1] (short) (narrow) %v2545_v56, 8 }
0x2afb   :  { %3753 = vxpose.xlu0.b32.start.end [1/1] (short) (narrow) %v2822_v24, 8 }
0x2afe   :  { %3145 = vxpose.xlu1.b32.start.end [1/1] (short) (narrow) %v2547_v21, 8 }
0x2b1c   :  { %1913 = vrot.lane.b32.xlu1 %v5312_v23, %s5334_s30 }
0x2b45   :  { %3177 = vxpose.xlu1.b32.start.end [1/1] (short) (narrow) %v2548_v59, 8 }
0x2b49   :  { %3209 = vxpose.xlu1.b32.start.end [1/1] (short) (narrow) %v2549_v53, 8 }
0x2b4d   :  { %3241 = vxpose.xlu1.b32.start.end [1/1] (short) (narrow) %v2550_v44, 8 }
0x2b51   :  { %3273 = vxpose.xlu1.b32.start.end [1/1] (short) (narrow) %v2551_v7, 8 }
0x2b55   :  { %3305 = vxpose.xlu1.b32.start.end [1/1] (short) (narrow) %v2552_v6, 8 }
0x2b59   :  { %3337 = vxpose.xlu1.b32.start.end [1/1] (short) (narrow) %v2681_v38, 8 }
0x2b5a   :  { %v2841_v37 = vpop.trf.xlu1 }
0x2b5d   :  { %3401 = vxpose.xlu1.b32.start.end [1/1] (short) (narrow) %v2683_v50, 8 }
0x2b5e   :  { %v2873_v36 = vpop.trf.xlu1 }
0x2b5f   :  { %v3129_v48 = vpop.trf.xlu0 }
0x2b61   :  { %3465 = vxpose.xlu1.b32.start.end [1/1] (short) (narrow) %v2685_v40, 8 }
0x2b62   :  { %v2905_v12 = vpop.trf.xlu1 }
0x2b63   :  { %v3849_v33 = vcombine.low %v2841_v37, %v2905_v12  ;;  %v6107_v52 = vpop.trf.xlu0 }
0x2b65   :  { %3529 = vxpose.xlu1.b32.start.end [1/1] (short) (narrow) %v2687_v46, 8  ;;  %v3856_v17 = vrot.slane %v3849_v33, %v5783_v11  ;;  %v1911_v46 = vsub.f32 1.0, %v5806_v8 }
0x2b66   :  { %v2937_v14 = vpop.trf.xlu1 }
0x2b67   :  { %v3857_v62 = vcombine.low %v2873_v36, %v2937_v14  ;;  %v3449_v19 = vpop.trf.xlu0 }
0x2b68   :  { %v3957_v59 = vcombine.low %v6107_v52, %v3449_v19 }
0x2b69   :  { %v3864_v13 = vrot.slane %v3857_v62, %v5783_v11  ;;  %3593 = vxpose.xlu1.b32.start.end [1/1] (short) (narrow) %v2817_v25, 8 }
0x2b6a   :  { %v2969_v18 = vpop.trf.xlu1  ;;  %v3964_v33 = vrot.slane %v3957_v59, %v5783_v11 }
0x2b6b   :  { %v3881_v60 = vcombine.low %v3856_v17, %v3864_v13  ;;  %v3513_v51 = vpop.trf.xlu0 }
0x2b6d   :  { %3657 = vxpose.xlu1.b32.start.end [1/1] (short) (narrow) %v2819_v63, 8  ;;  %v3888_v10 = vrot.slane %v3881_v60, %v5790_v28  ;;  %v1917_v63 = vmul.f32 %v5806_v8, %v5732_v41 }
0x2b6e   :  { %v3001_v16 = vpop.trf.xlu1 }
0x2b71   :  { %3721 = vxpose.xlu1.b32.start.end [1/1] (short) (narrow) %v2821_v27, 8 }
0x2b72   :  { %v3033_v47 = vpop.trf.xlu1 }
0x2b73   :  { %v3865_v22 = vcombine.low %v2969_v18, %v3033_v47 }
0x2b75   :  { %3785 = vxpose.xlu1.b32.start.end [1/1] (short) (narrow) %v2823_v43, 8  ;;  %v3872_v5 = vrot.slane %v3865_v22, %v5783_v11 }
0x2b76   :  { %v3065_v26 = vpop.trf.xlu1 }
0x2b77   :  { %v3873_v53 = vcombine.low %v3001_v16, %v3065_v26 }
0x2b79   :  { %v3880_v44 = vrot.slane %v3873_v53, %v5783_v11 }
0x2b7a   :  { %v3097_v7 = vpop.trf.xlu1 }
0x2b7b   :  { %v3889_v6 = vcombine.low %v3872_v5, %v3880_v44 }
0x2b7d   :  { %v3896_v57 = vrot.slane %v3889_v6, %v5790_v28 }
0x2b7e   :  { %v3161_v54 = vpop.trf.xlu1 }
0x2b7f   :  { %v3897_v38 = vcombine.low %v3888_v10, %v3896_v57  ;;  %v3898_v50 = vcombine.high %v3888_v10, %v3896_v57  ;;  %v3899_v40 = vcombine.low %v3097_v7, %v3161_v54 }
0x2b81   :  { %v3906_v1 = vrot.slane %v3899_v40, %v5783_v11 }
0x2b8e   :  { %v1914_v25 = vpop.permute.xlu1 %1913 }
0x2b8f   :  { %v1916_v27 = vmul.f32 %v1914_v25, %v1911_v46 }
0x2b91   :  { %v1918_v43 = vadd.f32 %v1917_v63, %v1916_v27  ;;  %v5326_v27 = vld.sshfl [vmem:[#allocation3 + $0x2] sm:$0xf pattern:$0x76325410] }
0x2b93   :  { %1920 = vrot.lane.b32.xlu0 %v1918_v43, %s5334_s30  ;;  %v5327_v43 = vld.sshfl [vmem:[#allocation3 + $0x8] sm:$0xf pattern:$0x76325410] }
0x2bb1   :  { %3817 = vxpose.xlu0.b32.start.end [1/1] (short) (narrow) %v2824_v35, 8 }
0x2bc5   :  { %v3193_v2 = vpop.trf.xlu1 }
0x2bc6   :  { %v3907_v42 = vcombine.low %v3129_v48, %v3193_v2  ;;  %v3577_v48 = vpop.trf.xlu0 }
0x2bc7   :  { %v3973_v52 = vcombine.low %v3513_v51, %v3577_v48 }
0x2bc8   :  { %v3914_v61 = vrot.slane %v3907_v42, %v5783_v11 }
0x2bc9   :  { %v3225_v3 = vpop.trf.xlu1  ;;  %v3980_v62 = vrot.slane %v3973_v52, %v5783_v11 }
0x2bca   :  { %v3931_v49 = vcombine.low %v3906_v1, %v3914_v61  ;;  %v3641_v26 = vpop.trf.xlu0 }
0x2bcc   :  { %v3938_v35 = vrot.slane %v3931_v49, %v5790_v28 }
0x2bcd   :  { %v3257_v20 = vpop.trf.xlu1 }
0x2bce   :  { %v3705_v5 = vpop.trf.xlu0 }
0x2bcf   :  { %v4007_v57 = vcombine.low %v3641_v26, %v3705_v5 }
0x2bd1   :  { %v3289_v30 = vpop.trf.xlu1  ;;  %v4014_v40 = vrot.slane %v4007_v57, %v5783_v11 }
0x2bd2   :  { %v3915_v15 = vcombine.low %v3225_v3, %v3289_v30  ;;  %v3769_v53 = vpop.trf.xlu0  ;;  %v5328_v3 = vld.sshfl [vmem:[#allocation3] sm:$0xf pattern:$0x76325410] }
0x2bd4   :  { %v3922_v41 = vrot.slane %v3915_v15, %v5783_v11 }
0x2bd5   :  { %v3321_v9 = vpop.trf.xlu1 }
0x2bd6   :  { %v3923_v8 = vcombine.low %v3257_v20, %v3321_v9 }
0x2bd8   :  { %v3930_v55 = vrot.slane %v3923_v8, %v5783_v11 }
0x2bd9   :  { %v3353_v39 = vpop.trf.xlu1 }
0x2bda   :  { %v3939_v34 = vcombine.low %v3922_v41, %v3930_v55  ;;  %v2007_v41 = vcombine.low %v5328_v3, %v5326_v27  ;;  %v4559_v27 = vld [vmem:[%s6243_s8 + $0x8] sm:$0xff] }
0x2bdc   :  { %v3946_v56 = vrot.slane %v3939_v34, %v5790_v28  ;;  %v4415_v34 = vld [vmem:[%s6241_s9 + $0x8] sm:$0xff] }
0x2bdd   :  { %v3417_v24 = vpop.trf.xlu1 }
0x2bde   :  { %v3947_v21 = vcombine.low %v3938_v35, %v3946_v56  ;;  %v3948_v58 = vcombine.high %v3938_v35, %v3946_v56  ;;  %v3949_v23 = vcombine.low %v3353_v39, %v3417_v24  ;;  %v4414_v39 = vld [vmem:[%s6241_s9] sm:$0xff]  ;;  %v2014_v35 = vrot.slane %v2007_v41, %v5790_v28 }
0x2bdf   :  { %v6152_v56 = vpack.c.bf16 %v4415_v34, %v4414_v39 }
0x2be0   :  { %v5168_v37 = vpack.c.bf16 %v3947_v21, %v3897_v38  ;;  %v5174_v36 = vpack.c.bf16 %v3948_v58, %v3898_v50  ;;  %v3956_v14 = vrot.slane %v3949_v23, %v5783_v11  ;;  %v4416_v58 = vld [vmem:[%s6241_s9 + $0x10] sm:$0xff]  ;;  %v4417_v23 = vld [vmem:[%s6241_s9 + $0x18] sm:$0xff] }
0x2be1   :  { %v3481_v12 = vpop.trf.xlu1 }
0x2be2   :  { %5169 = vmatpush3.bf16.msra.mxu0 %v5168_v37  ;;  %5175 = vmatpush3.bf16.msra.mxu1 %v5174_v36  ;;  %v3981_v19 = vcombine.low %v3956_v14, %v3964_v33  ;;  %v6170_v37 = vpack.c.bf16 %v4417_v23, %v4416_v58  ;;  %v5337_v36 = vmov 1966171168   ;;  %v4711_v33 = vld.sshfl [vmem:[%s6242_s7] sm:$0x11 pattern:$0x75316420] }
0x2be3   :  { %5170 = vmatprep.subr.bf16.mxu0 %v5329_v0  ;;  %5176 = vmatprep.subr.bf16.mxu1 %v5329_v0  ;;  %v1952_v48 = vunpack.c.l.s4 %v5337_v36  ;;  %v1950_v14 = vcombine.high %v4711_v33, %v4711_v33 }
0x2be4   :  { %v3988_v60 = vrot.slane %v3981_v19, %v5790_v28 }
0x2be5   :  { %v3545_v17 = vpop.trf.xlu1 }
0x2be6   :  { %v3965_v13 = vcombine.low %v3481_v12, %v3545_v17  ;;  %v1953_v12 = vunpack.c.0.s8 %v1952_v48 }
0x2be8   :  { %v3972_v18 = vrot.slane %v3965_v13, %v5783_v11  ;;  %v1956_v52 = vsub.s32 %v1953_v12, %v5779_v45 }
0x2be9   :  { %v3609_v7 = vpop.trf.xlu1 }
0x2bea   :  { %v3989_v16 = vcombine.low %v3972_v18, %v3980_v62  ;;  %v1957_v17 = vrot.slane %v4711_v33, %v1956_v52  ;;  %v1967_v62 = vsub.s32 0, %v5779_v45  ;;  %v1964_v19 = vrot.slane %v1950_v14, %v1956_v52 }
0x2bec   :  { %v3996_v47 = vrot.slane %v3989_v16, %v5790_v28  ;;  %v1968_v13 = vrot.slane %v1957_v17, %v1967_v62  ;;  %v1972_v18 = vrot.slane %v1964_v19, %v1967_v62 }
0x2bed   :  { %v3673_v6 = vpop.trf.xlu1 }
0x2bee   :  { %v3997_v59 = vcombine.low %v3988_v60, %v3996_v47  ;;  %v3998_v22 = vcombine.high %v3988_v60, %v3996_v47  ;;  %v3999_v54 = vcombine.low %v3609_v7, %v3673_v6 }
0x2bf0   :  { %v4006_v46 = vrot.slane %v3999_v54, %v5783_v11 }
0x2bf1   :  { %v3737_v10 = vpop.trf.xlu1 }
0x2bf2   :  { %v4031_v20 = vcombine.low %v4006_v46, %v4014_v40 }
0x2bf4   :  { %v4038_v9 = vrot.slane %v4031_v20, %v5790_v28 }
0x2bf5   :  { %v3801_v38 = vpop.trf.xlu1 }
0x2bf6   :  { %v4015_v25 = vcombine.low %v3737_v10, %v3801_v38 }
0x2bf8   :  { %v4022_v42 = vrot.slane %v4015_v25, %v5783_v11 }
0x2c05   :  { %v1921_v44 = vpop.permute.xlu0 %1920 }
0x2c06   :  { %1924 = vst.msk [vmem:[#allocation3 + $0xe] sm:$0x3] %vm163_vm2, %v1921_v44 }
0x2c0d   :  { %v5325_v50 = vld.sshfl [vmem:[#allocation3 + $0xa] sm:$0xf pattern:$0x76325410] }
0x2c0e   :  { %v2015_v61 = vcombine.low %v5327_v43, %v5325_v50 }
0x2c10   :  { %v2022_v55 = vrot.slane %v2015_v61, %v5790_v28 }
0x2c12   :  { %v2023_v24 = vcombine.low %v2014_v35, %v2022_v55  ;;  %v6154_v21 = vcombine.high %v2014_v35, %v2022_v55 }
0x2c31   :  { %v3833_v63 = vpop.trf.xlu0 }
0x2c32   :  { %v4023_v2 = vcombine.low %v3769_v53, %v3833_v63  ;;  %v4558_v63 = vld [vmem:[%s6243_s8] sm:$0xff] }
0x2c33   :  { %v5191_v43 = vpack.c.bf16 %v4559_v27, %v4558_v63 }
0x2c34   :  { %v4030_v30 = vrot.slane %v4023_v2, %v5783_v11 }
0x2c36   :  { %v4039_v15 = vcombine.low %v4022_v42, %v4030_v30 }
0x2c38   :  { %v4046_v1 = vrot.slane %v4039_v15, %v5790_v28  ;;  %v4266_v28 = vcombine.low %v5793_v29, %v5796_v31  ;;  %v4560_v29 = vld [vmem:[%s6243_s8 + $0x10] sm:$0xff]  ;;  %v4561_v31 = vld [vmem:[%s6243_s8 + $0x18] sm:$0xff] }
0x2c3a   :  { %v4047_v8 = vcombine.low %v4038_v9, %v4046_v1  ;;  %v4048_v49 = vcombine.high %v4038_v9, %v4046_v1 }
0x2c3c   :  { %v5171_v11 = vpack.c.bf16 %v4047_v8, %v3997_v59  ;;  %v5177_v51 = vpack.c.bf16 %v4048_v49, %v3998_v22 }
0x2c3e   :  { %5172 = vmatpush3.bf16.msra.mxu0 %v5171_v11  ;;  %5178 = vmatpush3.bf16.msra.mxu1 %v5177_v51 }
0x2c3f   :  { %5028 = vmatprep.subr.mxu1 %v5331_v4  ;;  %5179 = vmatprep.subr.bf16.mxu0 %v5329_v0 }
0x2c41   :  { %5015 = vmatmul.mubr.msk.f32.vlgmr.msra.gmra.mrb[16].mxu0 %vm43_vm1, %v2023_v24  ;;  %5026 = vmatmul.mubr.msk.f32.vlgmr.msra.gmra.mrb[16].mxu1 %vm43_vm1, %v6154_v21 }
0x2c42   :  { %5029 = vmatpush3.msra.mxu1 %v4266_v28  ;;  %5181 = vmatpush3.bf16.msra.mxu0 %v6152_v56 }
0x2c43   :  { %5182 = vmatprep.subr.bf16.mxu0 %v5329_v0  ;;  %5046 = vmatprep.mubr.msk.f32.mxu0 %vm5330_vm0, %v5331_v4 }
0x2c44   :  { %5030 = vmatprep.mubr.msk.f32.mxu1 %vm5330_vm0, %v5331_v4  ;;  %5033 = vmatprep.subr.mxu1 %v5331_v4 }
0x2c46   :  { %5184 = vmatpush3.bf16.msra.mxu0 %v6170_v37 }
0x2c47   :  { %5192 = vmatprep.subr.bf16.mxu0 %v5191_v43 }
0x2c49   :  { %5047 = vmatmul.mubr.msk.f32.vlgmr.msra.gmra.mrb[18].mxu0 %vm43_vm1, %v2023_v24 }
0x2c4a   :  { %5194 = vmatpush3.bf16.msra.mxu0 %v5191_v43 }
0x2d14   :  { %v4118_v60 = vpop.f32.mrb[16].mxu0  ;;  %v4191_v16 = vpop.f32.mrb[16].mxu1 }
0x2d15   :  { %v4119_v47 = vadd.f32 %v4118_v60, %v1968_v13  ;;  %v4192_v59 = vadd.f32 %v4191_v16, %v1972_v18  ;;  %v5016_v22 = vpop.f32.mrb[17].mxu0  ;;  %v5027_v26 = vpop.f32.mrb[17].mxu1 }
0x2d17   :  { %v4196_v5 = vsel %vm4195_vm3, %v4119_v47, -inf  ;;  %v4199_v53 = vsel %vm4195_vm3, %v4192_v59, -inf }
0x2d18   :  { %4197 = vmax.xlane.f32.xlu1 %v4196_v5  ;;  %4200 = vmax.xlane.f32.xlu0 %v4199_v53 }
0x2d1c   :  { %v4484_v44 = vpop.f32.mrb[18].mxu0 }
0x2d1d   :  { %v5048_v7 = vpop.f32.mrb[19].mxu0 }
0x2da5   :  { %v4198_v6 = vpop.xlane.xlu1 %4197  ;;  %v4201_v45 = vpop.xlane.xlu0 %4200 }
0x2da6   :  { %v4202_v10 = vsub.f32 %v4119_v47, %v4198_v6  ;;  %v4203_v57 = vsub.f32 %v4192_v59, %v4201_v45 }
0x2da8   :  { %v4204_v54 = vmul.f32 1.442695, %v4202_v10  ;;  %v4206_v38 = vmul.f32 1.442695, %v4203_v57 }
0x2daa   :  { %5313 = vpow2.f32 %v4204_v54 }
0x2dab   :  { %5315 = vpow2.f32 %v4206_v38 }
0x2db4   :  { %v5314_v50 = vpop.eup %5313 }
0x2db5   :  { %v4208_v40 = vsel %vm4195_vm3, %v5314_v50, 0.0  ;;  %v5316_v46 = vpop.eup %5315 }
0x2db6   :  { %4209 = vadd.xlane.f32.xlu1 %v4208_v40  ;;  %v4211_v25 = vsel %vm4195_vm3, %v5316_v46, 0.0 }
0x2dba   :  { %4212 = vadd.xlane.f32.xlu1 %v4211_v25 }
0x2e43   :  { %v4210_v2 = vpop.xlane.xlu1 %4209 }
0x2e44   :  { %5317 = vrcp.f32 %v4210_v2 }
0x2e47   :  { %v4213_v3 = vpop.xlane.xlu1 %4212 }
0x2e48   :  { %5319 = vrcp.f32 %v4213_v3 }
0x2e4e   :  { %v5318_v20 = vpop.eup %5317 }
0x2e4f   :  { %v4215_v42 = vmul.f32 %v5318_v20, %v5314_v50 }
0x2e51   :  { %4647 = vst.msk [vmem:[%s6244_s11] sm:$0xff] %vm4195_vm3, %v4215_v42  ;;  %5031 = vmatmul.mubr.msk.f32.vlgmr.msra.gmra.mrb[18].mxu1 %vm4195_vm3, %v4215_v42 }
0x2e52   :  { %v5320_v30 = vpop.eup %5319  ;;  %5034 = vmatpush3.msra.mxu1 %v4267_v32  ;;  %5035 = vmatprep.mubr.msk.f32.mxu1 %vm5330_vm0, %v5331_v4  ;;  %v5195_v32 = vpack.c.bf16 %v4561_v31, %v4560_v29 }
0x2e53   :  { %v4217_v15 = vmul.f32 %v5320_v30, %v5316_v46  ;;  %5185 = vmatprep.subr.bf16.mxu1 %v5329_v0 }
0x2e54   :  { %5196 = vmatprep.subr.bf16.mxu0 %v5195_v32 }
0x2e55   :  { %4648 = vst.msk [vmem:[%s6244_s11 + $0x8] sm:$0xff] %vm4195_vm3, %v4217_v15  ;;  %5036 = vmatmul.mubr.msk.f32.vlgmr.msra.gmra.mrb[20].mxu1 %vm4195_vm3, %v4217_v15  ;;  %5198 = vmatpush3.bf16.msra.mxu0 %v5195_v32 }
0x2e56   :  { %5187 = vmatpush3.bf16.msra.mxu1 %v6152_v56  ;;  %5057 = vmatprep.mubr.msk.f32.mxu1 %vm5330_vm0, %v5331_v4 }
0x2e57   :  { %5188 = vmatprep.subr.bf16.mxu1 %v5329_v0 }
0x2e5a   :  { %5190 = vmatpush3.bf16.msra.mxu1 %v6170_v37 }
0x2e5d   :  { %5058 = vmatmul.mubr.msk.f32.vlgmr.msra.gmra.mrb[22].mxu1 %vm43_vm1, %v6154_v21 }
0x2f24   :  { %v4337_v61 = vpop.f32.mrb[18].mxu1 }
0x2f25   :  { %v5032_v4 = vpop.f32.mrb[19].mxu1  ;;  %5068 = vmatprep.mubr.msk.f32.mxu0 %vm43_vm1, %v4337_v61 }
0x2f28   :  { %v4410_v0 = vpop.f32.mrb[20].mxu1 }
0x2f29   :  { %v5037_v9 = vpop.f32.mrb[21].mxu1  ;;  %5069 = vmatmul.mubr.msk.f32.vlgmr.msra.gmra.mrb[20].mxu0 %vm43_vm1, %v4410_v0 }
0x2f30   :  { %v4554_v1 = vpop.f32.mrb[22].mxu1 }
0x2f31   :  { %v5059_v41 = vpop.f32.mrb[23].mxu1 }
0x2ffc   :  { %v5070_v8 = vpop.f32.mrb[20].mxu0 }
0x2ffd   :  { %v4640_v49 = vadd.f32 %v5070_v8, %v4554_v1  ;;  %v4634_v55 = vpop.f32.mrb[21].mxu0 }
0x2ffe   :  { %v4635_v39 = vadd.f32 %v4634_v55, %v4484_v44 }
0x2fff   :  { %5321 = vtanh.f32 %v4640_v49 }
0x3000   :  { %5323 = vtanh.f32 %v4635_v39 }
0x3009   :  { %v5322_v34 = vpop.eup %5321 }
0x300a   :  { %v5324_v11 = vpop.eup %5323  ;;  %4646 = vst.msk [vmem:[%s6245_s10 + $0x8] sm:$0xff] %vm43_vm1, %v5322_v34 }
0x300b   :  { %4645 = vst.msk [vmem:[%s6245_s10] sm:$0xff] %vm43_vm1, %v5324_v11 }

</bundles_post_ra>
